<compile_context>
chip_gen: v6e
topology: v6e:2x2x1
jax: 0.10.0
libtpu: 0.0.40
codegen_flags: <defaults>
</compile_context>

<pallas_src>
import functools

import jax
import jax.numpy as jnp
from jax.experimental import pallas as pl
from jax.experimental.pallas import tpu as pltpu


def _round_up(x, m):
    return ((x + m - 1) // m) * m


def _pick_rows(m, cap=512):
    """Largest row tile that divides m: full m if small, else a multiple of 8."""
    if m <= cap:
        return m
    for r in range(cap - cap % 8, 7, -8):
        if m % r == 0:
            return r
    return m


# ----------------------------- Pallas kernels ------------------------------


def _conv_taps(x_ref, w_ref, q0, rows, wp):
    """Accumulate the nine 3x3 taps for `rows` flattened output pixels."""
    cop = w_ref.shape[-1]
    acc = jnp.zeros((rows, cop), jnp.float32)
    for kh in range(3):
        start = pl.multiple_of(q0 + kh * wp, 8)
        chunk = x_ref[0, pl.ds(start, rows + 2), :]            # [rows+2, Cin] f32
        for kw in range(3):
            lhs = chunk[kw:kw + rows, :].astype(jnp.bfloat16)  # shifted tap view
            acc = acc + jnp.dot(lhs, w_ref[kh * 3 + kw],
                                preferred_element_type=jnp.float32)
    return acc


def _conv3x3_kernel(x_ref, w_ref, b_ref, o_ref, *, wp, relu):
    rows = o_ref.shape[1]
    q0 = pl.program_id(1) * rows
    acc = _conv_taps(x_ref, w_ref, q0, rows, wp) + b_ref[...]
    if relu:
        acc = jnp.maximum(acc, 0.0)
    o_ref[...] = acc[None].astype(o_ref.dtype)


def _conv3x3_head_kernel(x_ref, w_ref, b_ref, wh_ref, bh_ref, o_ref, *, wp):
    """3x3 conv + bias + ReLU with the 1x1 conv_out head fused in the epilogue."""
    rows = o_ref.shape[1]
    q0 = pl.program_id(1) * rows
    feat = jnp.maximum(_conv_taps(x_ref, w_ref, q0, rows, wp) + b_ref[...], 0.0)
    head = jnp.dot(feat.astype(jnp.bfloat16), wh_ref[...],
                   preferred_element_type=jnp.float32) + bh_ref[...]
    o_ref[...] = head[None].astype(o_ref.dtype)


def _max4_kernel(a_ref, b_ref, c_ref, d_ref, o_ref):
    o_ref[...] = jnp.maximum(jnp.maximum(a_ref[...], b_ref[...]),
                             jnp.maximum(c_ref[...], d_ref[...]))


def _matmul_bias_kernel(x_ref, w_ref, b_ref, o_ref):
    acc = jnp.dot(x_ref[...].astype(jnp.bfloat16), w_ref[...],
                  preferred_element_type=jnp.float32) + b_ref[...]
    o_ref[...] = acc.astype(o_ref.dtype)


# ------------------------------ op wrappers ---------------------------------


def conv3x3(x, w9, b, *, relu=True, head=None):
    """3x3 'same' conv with fused bias (+ReLU) (+1x1 head).

    x:  [N, H, W, Cin]  float32 (clean, no junk columns)
    w9: [9, Cin, Cop]   bfloat16 (Cop a multiple of 128)
    b:  [1, Cop]        float32
    head: optional (wh [Cop, Ch] bf16, bh [1, Ch] f32) -> fused conv_out head.

    Returns [N, H, Wp, Cout] float32 with Wp = round_up(W+2, 8); columns >= W are
    junk produced by the flattened-image trick and are sliced away by consumers.
    """
    n, h, w, cin = x.shape
    wp = _round_up(w + 2, 8)          # lane/sublane-friendly padded width
    hp = h + 3                        # 1 top halo row, >=2 rows of bottom slack
    xp = jnp.pad(x, ((0, 0), (1, hp - h - 1), (1, wp - w - 1), (0, 0)))
    xf = xp.reshape(n, hp * wp, cin)  # flattened padded image (one small pad copy)

    m_out = h * wp
    rows = _pick_rows(m_out, cap=256)
    cop = w9.shape[-1]
    grid = (n, m_out // rows)

    x_spec = pl.BlockSpec((1, hp * wp, cin), lambda nb, i: (nb, 0, 0))
    w_spec = pl.BlockSpec((9, cin, cop), lambda nb, i: (0, 0, 0))
    b_spec = pl.BlockSpec((1, cop), lambda nb, i: (0, 0))
    params = pltpu.CompilerParams(dimension_semantics=("parallel", "parallel"))

    if head is None:
        out = pl.pallas_call(
            functools.partial(_conv3x3_kernel, wp=wp, relu=relu),
            out_shape=jax.ShapeDtypeStruct((n, m_out, cop), jnp.float32),
            grid=grid,
            in_specs=[x_spec, w_spec, b_spec],
            out_specs=pl.BlockSpec((1, rows, cop), lambda nb, i: (nb, i, 0)),
            compiler_params=params,
        )(xf, w9, b)
        return out.reshape(n, h, wp, cop)

    wh, bh = head
    ch = wh.shape[-1]
    out = pl.pallas_call(
        functools.partial(_conv3x3_head_kernel, wp=wp),
        out_shape=jax.ShapeDtypeStruct((n, m_out, ch), jnp.float32),
        grid=grid,
        in_specs=[x_spec, w_spec, b_spec,
                  pl.BlockSpec((cop, ch), lambda nb, i: (0, 0)),
                  pl.BlockSpec((1, ch), lambda nb, i: (0, 0))],
        out_specs=pl.BlockSpec((1, rows, ch), lambda nb, i: (nb, i, 0)),
        compiler_params=params,
    )(xf, w9, b, wh, bh)
    return out.reshape(n, h, wp, ch)


def maxpool2x2(x, w_valid):
    """2x2 stride-2 max pool on NHWC input; columns >= w_valid are ignored."""
    n, h, _, c = x.shape
    h2, w2 = h // 2, w_valid // 2            # PyTorch MaxPool2d(2,2) floor semantics
    a = x[:, 0:2 * h2:2, 0:2 * w2:2, :].reshape(n * h2 * w2, c)
    b = x[:, 0:2 * h2:2, 1:2 * w2:2, :].reshape(n * h2 * w2, c)
    cc = x[:, 1:2 * h2:2, 0:2 * w2:2, :].reshape(n * h2 * w2, c)
    d = x[:, 1:2 * h2:2, 1:2 * w2:2, :].reshape(n * h2 * w2, c)
    m = n * h2 * w2
    tm = _pick_rows(m, cap=1024)
    spec = pl.BlockSpec((tm, c), lambda i: (i, 0))
    out = pl.pallas_call(
        _max4_kernel,
        out_shape=jax.ShapeDtypeStruct((m, c), x.dtype),
        grid=(m // tm,),
        in_specs=[spec, spec, spec, spec],
        out_specs=spec,
        compiler_params=pltpu.CompilerParams(dimension_semantics=("parallel",)),
    )(a, b, cc, d)
    return out.reshape(n, h2, w2, c)


def conv1x1(x, wh, bh):
    """Standalone pointwise conv (only used if the feature stack ends in 'M')."""
    n, h, w, cin = x.shape
    ch = wh.shape[-1]
    m = n * h * w
    tm = _pick_rows(m)
    out = pl.pallas_call(
        _matmul_bias_kernel,
        out_shape=jax.ShapeDtypeStruct((m, ch), jnp.float32),
        grid=(m // tm,),
        in_specs=[pl.BlockSpec((tm, cin), lambda i: (i, 0)),
                  pl.BlockSpec((cin, ch), lambda i: (0, 0)),
                  pl.BlockSpec((1, ch), lambda i: (0, 0))],
        out_specs=pl.BlockSpec((tm, ch), lambda i: (i, 0)),
        compiler_params=pltpu.CompilerParams(dimension_semantics=("parallel",)),
    )(x.reshape(m, cin), wh, bh)
    return out.reshape(n, h, w, ch)


# ----------------------------- parameter setup ------------------------------


def make_vgg_params(key, cfg, in_channels=3, nb_classes=9):
    """Init mirroring VGG._initialize_weights (kaiming fan_out for feature convs,
    PyTorch-default uniform init for conv_out), with channels padded to 128."""
    feature_params = []
    cin_real, cin_pad = in_channels, in_channels          # network input not padded
    for v in cfg:
        if v == 'M':
            feature_params.append(('M', None))
            continue
        key, sub = jax.random.split(key)
        std = (2.0 / (v * 9)) ** 0.5                      # kaiming_normal_, fan_out
        w = std * jax.random.normal(sub, (v, cin_real, 3, 3), jnp.float32)
        cop = _round_up(v, 128)
        w9 = jnp.transpose(w, (2, 3, 1, 0)).reshape(9, cin_real, v)   # [tap, Cin, Cout]
        w9 = jnp.pad(w9, ((0, 0), (0, cin_pad - cin_real), (0, cop - v)))
        b = jnp.zeros((1, cop), jnp.float32)              # constant_(bias, 0)
        feature_params.append(('C', (w9.astype(jnp.bfloat16), b)))
        cin_real, cin_pad = v, cop
    assert cin_real == 256, "conv_out expects 256 input channels"
    # conv_out: PyTorch default Conv2d init -> U(-1/sqrt(fan_in), 1/sqrt(fan_in)) for w and b.
    key, kw_, kb_ = jax.random.split(key, 3)
    bound = (1.0 / cin_real) ** 0.5
    wh = jax.random.uniform(kw_, (cin_real, nb_classes), jnp.float32, -bound, bound)
    bh = jax.random.uniform(kb_, (nb_classes,), jnp.float32, -bound, bound)
    ch = _round_up(nb_classes, 128)
    wh = jnp.pad(wh, ((0, cin_pad - cin_real), (0, ch - nb_classes)))
    bh = jnp.pad(bh, (0, ch - nb_classes)).reshape(1, ch)
    return feature_params, (wh.astype(jnp.bfloat16), bh)


# --------------------------------- forward ----------------------------------


def vgg_forward(x_nchw, feature_params, head_params, nb_classes=9):
    x = jnp.transpose(x_nchw, (0, 2, 3, 1)).astype(jnp.float32)   # NCHW -> NHWC once
    w_valid = x.shape[2]
    has_junk = False
    fuse_head = bool(feature_params) and feature_params[-1][0] == 'C'
    for idx, (kind, p) in enumerate(feature_params):
        if kind == 'M':
            x = maxpool2x2(x, w_valid)           # consumes junk columns, returns clean
            w_valid, has_junk = x.shape[2], False
        else:
            if has_junk:
                x = x[:, :, :w_valid, :]
            is_last = idx == len(feature_params) - 1
            head = head_params if (fuse_head and is_last) else None
            x = conv3x3(x, p[0], p[1], relu=True, head=head)
            has_junk = True                      # 'same' conv: width stays w_valid
    if not fuse_head:
        if has_junk:
            x = x[:, :, :w_valid, :]
            has_junk = False
        x = conv1x1(x, head_params[0], head_params[1])
    if has_junk:
        x = x[:, :, :w_valid, :]
    x = x[..., :nb_classes]                      # drop channel padding
    return jnp.transpose(x, (0, 3, 1, 2))        # NHWC -> NCHW at the exit only


# ---------------------------------- main -------------------------------------

if __name__ == "__main__":
    key = jax.random.PRNGKey(0)
    key, kx, kp = jax.random.split(key, 3)

    # Representative VGG `features` stack ending at 256 channels ('M' = maxpool).
    cfg = [64, 'M', 128, 'M', 256]
    feature_params, head_params = make_vgg_params(kp, cfg, in_channels=3, nb_classes=9)

    # Small NCHW input (PyTorch convention).
    x = jax.random.normal(kx, (2, 3, 16, 16), jnp.float32)

    fwd = jax.jit(lambda xx: vgg_forward(xx, feature_params, head_params, 9))
    y = fwd(x)
    jax.block_until_ready(y)

    assert y.shape == (2, 9, 4, 4), y.shape
    assert bool(jnp.all(jnp.isfinite(y)))
    print("KERNEL_OK")
</pallas_src>

<mosaic_0001>
module attributes {stable_mosaic.version = 11 : i64} {
  func.func @_conv3x3_kernel(%arg0: i32, %arg1: i32, %arg2: memref<1x456x3xf32, #tpu.memory_space<vmem>>, %arg3: memref<9x3x128xbf16, #tpu.memory_space<vmem>>, %arg4: memref<1x128xf32, #tpu.memory_space<vmem>>, %arg5: memref<1x192x128xf32, #tpu.memory_space<vmem>>) attributes {dimension_semantics = [#tpu.dimension_semantics<parallel>, #tpu.dimension_semantics<parallel>], iteration_bounds = array<i64: 2, 2>, scalar_prefetch = 0 : i64, scratch_operands = 0 : i64, tpu.core_type = #tpu.core_type<tc>, window_params = [{transform_indices = @transform_0, window_bounds = array<i64: 1, 456, 3>}, {pipeline_mode = #tpu.pipeline_mode<synchronous>, transform_indices = @transform_1, window_bounds = array<i64: 9, 3, 128>}, {pipeline_mode = #tpu.pipeline_mode<synchronous>, transform_indices = @transform_2, window_bounds = array<i64: 1, 128>}, {transform_indices = @transform_3, window_bounds = array<i64: 1, 192, 128>}]} {
    %c192_i32 = arith.constant 192 : i32
    %0 = arith.muli %arg1, %c192_i32 : i32
    %cst = arith.constant 0.000000e+00 : f32
    %1 = vector.broadcast %cst : f32 to vector<192x128xf32>
    %c0_i32 = arith.constant 0 : i32
    %2 = arith.addi %0, %c0_i32 : i32
    %3 = tpu.assume_multiple %2, 8 : i32
    %c0 = arith.constant 0 : index
    %4 = arith.index_cast %3 : i32 to index
    %c0_0 = arith.constant 0 : index
    %5 = vector.load %arg2[%c0, %4, %c0_0] : memref<1x456x3xf32, #tpu.memory_space<vmem>>, vector<1x194x3xf32>
    %6 = vector.shape_cast %5 : vector<1x194x3xf32> to vector<194x3xf32>
    %7 = vector.extract_strided_slice %6 {offsets = [0, 0], sizes = [192, 3], strides = [1, 1]} : vector<194x3xf32> to vector<192x3xf32>
    %8 = arith.truncf %7 : vector<192x3xf32> to vector<192x3xbf16>
    %c0_1 = arith.constant 0 : index
    %c0_2 = arith.constant 0 : index
    %c0_3 = arith.constant 0 : index
    %9 = vector.load %arg3[%c0_1, %c0_2, %c0_3] : memref<9x3x128xbf16, #tpu.memory_space<vmem>>, vector<1x3x128xbf16>
    %10 = vector.shape_cast %9 : vector<1x3x128xbf16> to vector<3x128xbf16>
    %cst_4 = arith.constant dense<0.000000e+00> : vector<192x128xf32>
    %11 = tpu.matmul %8, %10, %cst_4 {dimension_numbers = #tpu.dot_dimension_numbers<[1], [0], [0], [1], [0, 0, 1, 1], [], []>} : vector<192x3xbf16>, vector<3x128xbf16>, vector<192x128xf32> -> vector<192x128xf32>
    %12 = arith.addf %1, %11 : vector<192x128xf32>
    %13 = vector.extract_strided_slice %6 {offsets = [1, 0], sizes = [192, 3], strides = [1, 1]} : vector<194x3xf32> to vector<192x3xf32>
    %14 = arith.truncf %13 : vector<192x3xf32> to vector<192x3xbf16>
    %c1 = arith.constant 1 : index
    %c0_5 = arith.constant 0 : index
    %c0_6 = arith.constant 0 : index
    %15 = vector.load %arg3[%c1, %c0_5, %c0_6] : memref<9x3x128xbf16, #tpu.memory_space<vmem>>, vector<1x3x128xbf16>
    %16 = vector.shape_cast %15 : vector<1x3x128xbf16> to vector<3x128xbf16>
    %cst_7 = arith.constant dense<0.000000e+00> : vector<192x128xf32>
    %17 = tpu.matmul %14, %16, %cst_7 {dimension_numbers = #tpu.dot_dimension_numbers<[1], [0], [0], [1], [0, 0, 1, 1], [], []>} : vector<192x3xbf16>, vector<3x128xbf16>, vector<192x128xf32> -> vector<192x128xf32>
    %18 = arith.addf %12, %17 : vector<192x128xf32>
    %19 = vector.extract_strided_slice %6 {offsets = [2, 0], sizes = [192, 3], strides = [1, 1]} : vector<194x3xf32> to vector<192x3xf32>
    %20 = arith.truncf %19 : vector<192x3xf32> to vector<192x3xbf16>
    %c2 = arith.constant 2 : index
    %c0_8 = arith.constant 0 : index
    %c0_9 = arith.constant 0 : index
    %21 = vector.load %arg3[%c2, %c0_8, %c0_9] : memref<9x3x128xbf16, #tpu.memory_space<vmem>>, vector<1x3x128xbf16>
    %22 = vector.shape_cast %21 : vector<1x3x128xbf16> to vector<3x128xbf16>
    %cst_10 = arith.constant dense<0.000000e+00> : vector<192x128xf32>
    %23 = tpu.matmul %20, %22, %cst_10 {dimension_numbers = #tpu.dot_dimension_numbers<[1], [0], [0], [1], [0, 0, 1, 1], [], []>} : vector<192x3xbf16>, vector<3x128xbf16>, vector<192x128xf32> -> vector<192x128xf32>
    %24 = arith.addf %18, %23 : vector<192x128xf32>
    %c24_i32 = arith.constant 24 : i32
    %25 = arith.addi %0, %c24_i32 : i32
    %26 = tpu.assume_multiple %25, 8 : i32
    %c0_11 = arith.constant 0 : index
    %27 = arith.index_cast %26 : i32 to index
    %c0_12 = arith.constant 0 : index
    %28 = vector.load %arg2[%c0_11, %27, %c0_12] : memref<1x456x3xf32, #tpu.memory_space<vmem>>, vector<1x194x3xf32>
    %29 = vector.shape_cast %28 : vector<1x194x3xf32> to vector<194x3xf32>
    %30 = vector.extract_strided_slice %29 {offsets = [0, 0], sizes = [192, 3], strides = [1, 1]} : vector<194x3xf32> to vector<192x3xf32>
    %31 = arith.truncf %30 : vector<192x3xf32> to vector<192x3xbf16>
    %c3 = arith.constant 3 : index
    %c0_13 = arith.constant 0 : index
    %c0_14 = arith.constant 0 : index
    %32 = vector.load %arg3[%c3, %c0_13, %c0_14] : memref<9x3x128xbf16, #tpu.memory_space<vmem>>, vector<1x3x128xbf16>
    %33 = vector.shape_cast %32 : vector<1x3x128xbf16> to vector<3x128xbf16>
    %cst_15 = arith.constant dense<0.000000e+00> : vector<192x128xf32>
    %34 = tpu.matmul %31, %33, %cst_15 {dimension_numbers = #tpu.dot_dimension_numbers<[1], [0], [0], [1], [0, 0, 1, 1], [], []>} : vector<192x3xbf16>, vector<3x128xbf16>, vector<192x128xf32> -> vector<192x128xf32>
    %35 = arith.addf %24, %34 : vector<192x128xf32>
    %36 = vector.extract_strided_slice %29 {offsets = [1, 0], sizes = [192, 3], strides = [1, 1]} : vector<194x3xf32> to vector<192x3xf32>
    %37 = arith.truncf %36 : vector<192x3xf32> to vector<192x3xbf16>
    %c4 = arith.constant 4 : index
    %c0_16 = arith.constant 0 : index
    %c0_17 = arith.constant 0 : index
    %38 = vector.load %arg3[%c4, %c0_16, %c0_17] : memref<9x3x128xbf16, #tpu.memory_space<vmem>>, vector<1x3x128xbf16>
    %39 = vector.shape_cast %38 : vector<1x3x128xbf16> to vector<3x128xbf16>
    %cst_18 = arith.constant dense<0.000000e+00> : vector<192x128xf32>
    %40 = tpu.matmul %37, %39, %cst_18 {dimension_numbers = #tpu.dot_dimension_numbers<[1], [0], [0], [1], [0, 0, 1, 1], [], []>} : vector<192x3xbf16>, vector<3x128xbf16>, vector<192x128xf32> -> vector<192x128xf32>
    %41 = arith.addf %35, %40 : vector<192x128xf32>
    %42 = vector.extract_strided_slice %29 {offsets = [2, 0], sizes = [192, 3], strides = [1, 1]} : vector<194x3xf32> to vector<192x3xf32>
    %43 = arith.truncf %42 : vector<192x3xf32> to vector<192x3xbf16>
    %c5 = arith.constant 5 : index
    %c0_19 = arith.constant 0 : index
    %c0_20 = arith.constant 0 : index
    %44 = vector.load %arg3[%c5, %c0_19, %c0_20] : memref<9x3x128xbf16, #tpu.memory_space<vmem>>, vector<1x3x128xbf16>
    %45 = vector.shape_cast %44 : vector<1x3x128xbf16> to vector<3x128xbf16>
    %cst_21 = arith.constant dense<0.000000e+00> : vector<192x128xf32>
    %46 = tpu.matmul %43, %45, %cst_21 {dimension_numbers = #tpu.dot_dimension_numbers<[1], [0], [0], [1], [0, 0, 1, 1], [], []>} : vector<192x3xbf16>, vector<3x128xbf16>, vector<192x128xf32> -> vector<192x128xf32>
    %47 = arith.addf %41, %46 : vector<192x128xf32>
    %c48_i32 = arith.constant 48 : i32
    %48 = arith.addi %0, %c48_i32 : i32
    %49 = tpu.assume_multiple %48, 8 : i32
    %c0_22 = arith.constant 0 : index
    %50 = arith.index_cast %49 : i32 to index
    %c0_23 = arith.constant 0 : index
    %51 = vector.load %arg2[%c0_22, %50, %c0_23] : memref<1x456x3xf32, #tpu.memory_space<vmem>>, vector<1x194x3xf32>
    %52 = vector.shape_cast %51 : vector<1x194x3xf32> to vector<194x3xf32>
    %53 = vector.extract_strided_slice %52 {offsets = [0, 0], sizes = [192, 3], strides = [1, 1]} : vector<194x3xf32> to vector<192x3xf32>
    %54 = arith.truncf %53 : vector<192x3xf32> to vector<192x3xbf16>
    %c6 = arith.constant 6 : index
    %c0_24 = arith.constant 0 : index
    %c0_25 = arith.constant 0 : index
    %55 = vector.load %arg3[%c6, %c0_24, %c0_25] : memref<9x3x128xbf16, #tpu.memory_space<vmem>>, vector<1x3x128xbf16>
    %56 = vector.shape_cast %55 : vector<1x3x128xbf16> to vector<3x128xbf16>
    %cst_26 = arith.constant dense<0.000000e+00> : vector<192x128xf32>
    %57 = tpu.matmul %54, %56, %cst_26 {dimension_numbers = #tpu.dot_dimension_numbers<[1], [0], [0], [1], [0, 0, 1, 1], [], []>} : vector<192x3xbf16>, vector<3x128xbf16>, vector<192x128xf32> -> vector<192x128xf32>
    %58 = arith.addf %47, %57 : vector<192x128xf32>
    %59 = vector.extract_strided_slice %52 {offsets = [1, 0], sizes = [192, 3], strides = [1, 1]} : vector<194x3xf32> to vector<192x3xf32>
    %60 = arith.truncf %59 : vector<192x3xf32> to vector<192x3xbf16>
    %c7 = arith.constant 7 : index
    %c0_27 = arith.constant 0 : index
    %c0_28 = arith.constant 0 : index
    %61 = vector.load %arg3[%c7, %c0_27, %c0_28] : memref<9x3x128xbf16, #tpu.memory_space<vmem>>, vector<1x3x128xbf16>
    %62 = vector.shape_cast %61 : vector<1x3x128xbf16> to vector<3x128xbf16>
    %cst_29 = arith.constant dense<0.000000e+00> : vector<192x128xf32>
    %63 = tpu.matmul %60, %62, %cst_29 {dimension_numbers = #tpu.dot_dimension_numbers<[1], [0], [0], [1], [0, 0, 1, 1], [], []>} : vector<192x3xbf16>, vector<3x128xbf16>, vector<192x128xf32> -> vector<192x128xf32>
    %64 = arith.addf %58, %63 : vector<192x128xf32>
    %65 = vector.extract_strided_slice %52 {offsets = [2, 0], sizes = [192, 3], strides = [1, 1]} : vector<194x3xf32> to vector<192x3xf32>
    %66 = arith.truncf %65 : vector<192x3xf32> to vector<192x3xbf16>
    %c8 = arith.constant 8 : index
    %c0_30 = arith.constant 0 : index
    %c0_31 = arith.constant 0 : index
    %67 = vector.load %arg3[%c8, %c0_30, %c0_31] : memref<9x3x128xbf16, #tpu.memory_space<vmem>>, vector<1x3x128xbf16>
    %68 = vector.shape_cast %67 : vector<1x3x128xbf16> to vector<3x128xbf16>
    %cst_32 = arith.constant dense<0.000000e+00> : vector<192x128xf32>
    %69 = tpu.matmul %66, %68, %cst_32 {dimension_numbers = #tpu.dot_dimension_numbers<[1], [0], [0], [1], [0, 0, 1, 1], [], []>} : vector<192x3xbf16>, vector<3x128xbf16>, vector<192x128xf32> -> vector<192x128xf32>
    %70 = arith.addf %64, %69 : vector<192x128xf32>
    %c0_33 = arith.constant 0 : index
    %c0_34 = arith.constant 0 : index
    %71 = vector.load %arg4[%c0_33, %c0_34] : memref<1x128xf32, #tpu.memory_space<vmem>>, vector<1x128xf32>
    %72 = vector.broadcast %71 : vector<1x128xf32> to vector<192x128xf32>
    %73 = arith.addf %70, %72 : vector<192x128xf32>
    %cst_35 = arith.constant 0.000000e+00 : f32
    %74 = vector.broadcast %cst_35 : f32 to vector<192x128xf32>
    %75 = arith.maximumf %73, %74 : vector<192x128xf32>
    %76 = vector.shape_cast %75 : vector<192x128xf32> to vector<1x192x128xf32>
    %c0_36 = arith.constant 0 : index
    %c0_37 = arith.constant 0 : index
    %c0_38 = arith.constant 0 : index
    %77 = vector.load %arg5[%c0_36, %c0_37, %c0_38] : memref<1x192x128xf32, #tpu.memory_space<vmem>>, vector<1x192x128xf32>
    tpu.vector_store %arg5[%c0_36, %c0_37, %c0_38], %76 {strides = array<i32>} : memref<1x192x128xf32, #tpu.memory_space<vmem>>, vector<1x192x128xf32>,
    return
  }
  func.func @transform_0(%arg0: i32, %arg1: i32) -> (i32, i32, i32) {
    %c0_i32 = arith.constant 0 : i32
    %c0_i32_0 = arith.constant 0 : i32
    %c0_i32_1 = arith.constant 0 : i32
    return %arg0, %c0_i32, %c0_i32_0 : i32, i32, i32
  }
  func.func @transform_1(%arg0: i32, %arg1: i32) -> (i32, i32, i32) {
    %c0_i32 = arith.constant 0 : i32
    %c0_i32_0 = arith.constant 0 : i32
    %c0_i32_1 = arith.constant 0 : i32
    %c0_i32_2 = arith.constant 0 : i32
    return %c0_i32, %c0_i32_0, %c0_i32_1 : i32, i32, i32
  }
  func.func @transform_2(%arg0: i32, %arg1: i32) -> (i32, i32) {
    %c0_i32 = arith.constant 0 : i32
    %c0_i32_0 = arith.constant 0 : i32
    %c0_i32_1 = arith.constant 0 : i32
    return %c0_i32, %c0_i32_0 : i32, i32
  }
  func.func @transform_3(%arg0: i32, %arg1: i32) -> (i32, i32, i32) {
    %c0_i32 = arith.constant 0 : i32
    %c0_i32_0 = arith.constant 0 : i32
    return %arg0, %arg1, %c0_i32 : i32, i32, i32
  }
}

module attributes {stable_mosaic.version = 11 : i64} {
  func.func @_max4_kernel(%arg0: i32, %arg1: memref<128x128xf32, #tpu.memory_space<vmem>>, %arg2: memref<128x128xf32, #tpu.memory_space<vmem>>, %arg3: memref<128x128xf32, #tpu.memory_space<vmem>>, %arg4: memref<128x128xf32, #tpu.memory_space<vmem>>, %arg5: memref<128x128xf32, #tpu.memory_space<vmem>>) attributes {dimension_semantics = [#tpu.dimension_semantics<parallel>], iteration_bounds = array<i64: 1>, scalar_prefetch = 0 : i64, scratch_operands = 0 : i64, tpu.core_type = #tpu.core_type<tc>, window_params = [{transform_indices = @transform_0, window_bounds = array<i64: 128, 128>}, {transform_indices = @transform_1, window_bounds = array<i64: 128, 128>}, {transform_indices = @transform_2, window_bounds = array<i64: 128, 128>}, {transform_indices = @transform_3, window_bounds = array<i64: 128, 128>}, {transform_indices = @transform_4, window_bounds = array<i64: 128, 128>}]} {
    %c0 = arith.constant 0 : index
    %c0_0 = arith.constant 0 : index
    %0 = vector.load %arg1[%c0, %c0_0] : memref<128x128xf32, #tpu.memory_space<vmem>>, vector<128x128xf32>
    %c0_1 = arith.constant 0 : index
    %c0_2 = arith.constant 0 : index
    %1 = vector.load %arg2[%c0_1, %c0_2] : memref<128x128xf32, #tpu.memory_space<vmem>>, vector<128x128xf32>
    %2 = arith.maximumf %0, %1 : vector<128x128xf32>
    %c0_3 = arith.constant 0 : index
    %c0_4 = arith.constant 0 : index
    %3 = vector.load %arg3[%c0_3, %c0_4] : memref<128x128xf32, #tpu.memory_space<vmem>>, vector<128x128xf32>
    %c0_5 = arith.constant 0 : index
    %c0_6 = arith.constant 0 : index
    %4 = vector.load %arg4[%c0_5, %c0_6] : memref<128x128xf32, #tpu.memory_space<vmem>>, vector<128x128xf32>
    %5 = arith.maximumf %3, %4 : vector<128x128xf32>
    %6 = arith.maximumf %2, %5 : vector<128x128xf32>
    %c0_7 = arith.constant 0 : index
    %c0_8 = arith.constant 0 : index
    %7 = vector.load %arg5[%c0_7, %c0_8] : memref<128x128xf32, #tpu.memory_space<vmem>>, vector<128x128xf32>
    tpu.vector_store %arg5[%c0_7, %c0_8], %6 {strides = array<i32>} : memref<128x128xf32, #tpu.memory_space<vmem>>, vector<128x128xf32>,
    return
  }
  func.func @transform_0(%arg0: i32) -> (i32, i32) {
    %c0_i32 = arith.constant 0 : i32
    %c0_i32_0 = arith.constant 0 : i32
    return %arg0, %c0_i32 : i32, i32
  }
  func.func @transform_1(%arg0: i32) -> (i32, i32) {
    %c0_i32 = arith.constant 0 : i32
    %c0_i32_0 = arith.constant 0 : i32
    return %arg0, %c0_i32 : i32, i32
  }
  func.func @transform_2(%arg0: i32) -> (i32, i32) {
    %c0_i32 = arith.constant 0 : i32
    %c0_i32_0 = arith.constant 0 : i32
    return %arg0, %c0_i32 : i32, i32
  }
  func.func @transform_3(%arg0: i32) -> (i32, i32) {
    %c0_i32 = arith.constant 0 : i32
    %c0_i32_0 = arith.constant 0 : i32
    return %arg0, %c0_i32 : i32, i32
  }
  func.func @transform_4(%arg0: i32) -> (i32, i32) {
    %c0_i32 = arith.constant 0 : i32
    %c0_i32_0 = arith.constant 0 : i32
    return %arg0, %c0_i32 : i32, i32
  }
}

module attributes {stable_mosaic.version = 11 : i64} {
  func.func @_conv3x3_kernel(%arg0: i32, %arg1: i32, %arg2: memref<1x176x128xf32, #tpu.memory_space<vmem>>, %arg3: memref<9x128x128xbf16, #tpu.memory_space<vmem>>, %arg4: memref<1x128xf32, #tpu.memory_space<vmem>>, %arg5: memref<1x128x128xf32, #tpu.memory_space<vmem>>) attributes {dimension_semantics = [#tpu.dimension_semantics<parallel>, #tpu.dimension_semantics<parallel>], iteration_bounds = array<i64: 2, 1>, scalar_prefetch = 0 : i64, scratch_operands = 0 : i64, tpu.core_type = #tpu.core_type<tc>, window_params = [{transform_indices = @transform_0, window_bounds = array<i64: 1, 176, 128>}, {pipeline_mode = #tpu.pipeline_mode<synchronous>, transform_indices = @transform_1, window_bounds = array<i64: 9, 128, 128>}, {pipeline_mode = #tpu.pipeline_mode<synchronous>, transform_indices = @transform_2, window_bounds = array<i64: 1, 128>}, {transform_indices = @transform_3, window_bounds = array<i64: 1, 128, 128>}]} {
    %c128_i32 = arith.constant 128 : i32
    %0 = arith.muli %arg1, %c128_i32 : i32
    %cst = arith.constant 0.000000e+00 : f32
    %1 = vector.broadcast %cst : f32 to vector<128x128xf32>
    %c0_i32 = arith.constant 0 : i32
    %2 = arith.addi %0, %c0_i32 : i32
    %3 = tpu.assume_multiple %2, 8 : i32
    %c0 = arith.constant 0 : index
    %4 = arith.index_cast %3 : i32 to index
    %c0_0 = arith.constant 0 : index
    %5 = vector.load %arg2[%c0, %4, %c0_0] : memref<1x176x128xf32, #tpu.memory_space<vmem>>, vector<1x130x128xf32>
    %6 = vector.shape_cast %5 : vector<1x130x128xf32> to vector<130x128xf32>
    %7 = vector.extract_strided_slice %6 {offsets = [0, 0], sizes = [128, 128], strides = [1, 1]} : vector<130x128xf32> to vector<128x128xf32>
    %8 = arith.truncf %7 : vector<128x128xf32> to vector<128x128xbf16>
    %c0_1 = arith.constant 0 : index
    %c0_2 = arith.constant 0 : index
    %c0_3 = arith.constant 0 : index
    %9 = vector.load %arg3[%c0_1, %c0_2, %c0_3] : memref<9x128x128xbf16, #tpu.memory_space<vmem>>, vector<1x128x128xbf16>
    %10 = vector.shape_cast %9 : vector<1x128x128xbf16> to vector<128x128xbf16>
    %cst_4 = arith.constant dense<0.000000e+00> : vector<128x128xf32>
    %11 = tpu.matmul %8, %10, %cst_4 {dimension_numbers = #tpu.dot_dimension_numbers<[1], [0], [0], [1], [0, 0, 1, 1], [], []>} : vector<128x128xbf16>, vector<128x128xbf16>, vector<128x128xf32> -> vector<128x128xf32>
    %12 = arith.addf %1, %11 : vector<128x128xf32>
    %13 = vector.extract_strided_slice %6 {offsets = [1, 0], sizes = [128, 128], strides = [1, 1]} : vector<130x128xf32> to vector<128x128xf32>
    %14 = arith.truncf %13 : vector<128x128xf32> to vector<128x128xbf16>
    %c1 = arith.constant 1 : index
    %c0_5 = arith.constant 0 : index
    %c0_6 = arith.constant 0 : index
    %15 = vector.load %arg3[%c1, %c0_5, %c0_6] : memref<9x128x128xbf16, #tpu.memory_space<vmem>>, vector<1x128x128xbf16>
    %16 = vector.shape_cast %15 : vector<1x128x128xbf16> to vector<128x128xbf16>
    %cst_7 = arith.constant dense<0.000000e+00> : vector<128x128xf32>
    %17 = tpu.matmul %14, %16, %cst_7 {dimension_numbers = #tpu.dot_dimension_numbers<[1], [0], [0], [1], [0, 0, 1, 1], [], []>} : vector<128x128xbf16>, vector<128x128xbf16>, vector<128x128xf32> -> vector<128x128xf32>
    %18 = arith.addf %12, %17 : vector<128x128xf32>
    %19 = vector.extract_strided_slice %6 {offsets = [2, 0], sizes = [128, 128], strides = [1, 1]} : vector<130x128xf32> to vector<128x128xf32>
    %20 = arith.truncf %19 : vector<128x128xf32> to vector<128x128xbf16>
    %c2 = arith.constant 2 : index
    %c0_8 = arith.constant 0 : index
    %c0_9 = arith.constant 0 : index
    %21 = vector.load %arg3[%c2, %c0_8, %c0_9] : memref<9x128x128xbf16, #tpu.memory_space<vmem>>, vector<1x128x128xbf16>
    %22 = vector.shape_cast %21 : vector<1x128x128xbf16> to vector<128x128xbf16>
    %cst_10 = arith.constant dense<0.000000e+00> : vector<128x128xf32>
    %23 = tpu.matmul %20, %22, %cst_10 {dimension_numbers = #tpu.dot_dimension_numbers<[1], [0], [0], [1], [0, 0, 1, 1], [], []>} : vector<128x128xbf16>, vector<128x128xbf16>, vector<128x128xf32> -> vector<128x128xf32>
    %24 = arith.addf %18, %23 : vector<128x128xf32>
    %c16_i32 = arith.constant 16 : i32
    %25 = arith.addi %0, %c16_i32 : i32
    %26 = tpu.assume_multiple %25, 8 : i32
    %c0_11 = arith.constant 0 : index
    %27 = arith.index_cast %26 : i32 to index
    %c0_12 = arith.constant 0 : index
    %28 = vector.load %arg2[%c0_11, %27, %c0_12] : memref<1x176x128xf32, #tpu.memory_space<vmem>>, vector<1x130x128xf32>
    %29 = vector.shape_cast %28 : vector<1x130x128xf32> to vector<130x128xf32>
    %30 = vector.extract_strided_slice %29 {offsets = [0, 0], sizes = [128, 128], strides = [1, 1]} : vector<130x128xf32> to vector<128x128xf32>
    %31 = arith.truncf %30 : vector<128x128xf32> to vector<128x128xbf16>
    %c3 = arith.constant 3 : index
    %c0_13 = arith.constant 0 : index
    %c0_14 = arith.constant 0 : index
    %32 = vector.load %arg3[%c3, %c0_13, %c0_14] : memref<9x128x128xbf16, #tpu.memory_space<vmem>>, vector<1x128x128xbf16>
    %33 = vector.shape_cast %32 : vector<1x128x128xbf16> to vector<128x128xbf16>
    %cst_15 = arith.constant dense<0.000000e+00> : vector<128x128xf32>
    %34 = tpu.matmul %31, %33, %cst_15 {dimension_numbers = #tpu.dot_dimension_numbers<[1], [0], [0], [1], [0, 0, 1, 1], [], []>} : vector<128x128xbf16>, vector<128x128xbf16>, vector<128x128xf32> -> vector<128x128xf32>
    %35 = arith.addf %24, %34 : vector<128x128xf32>
    %36 = vector.extract_strided_slice %29 {offsets = [1, 0], sizes = [128, 128], strides = [1, 1]} : vector<130x128xf32> to vector<128x128xf32>
    %37 = arith.truncf %36 : vector<128x128xf32> to vector<128x128xbf16>
    %c4 = arith.constant 4 : index
    %c0_16 = arith.constant 0 : index
    %c0_17 = arith.constant 0 : index
    %38 = vector.load %arg3[%c4, %c0_16, %c0_17] : memref<9x128x128xbf16, #tpu.memory_space<vmem>>, vector<1x128x128xbf16>
    %39 = vector.shape_cast %38 : vector<1x128x128xbf16> to vector<128x128xbf16>
    %cst_18 = arith.constant dense<0.000000e+00> : vector<128x128xf32>
    %40 = tpu.matmul %37, %39, %cst_18 {dimension_numbers = #tpu.dot_dimension_numbers<[1], [0], [0], [1], [0, 0, 1, 1], [], []>} : vector<128x128xbf16>, vector<128x128xbf16>, vector<128x128xf32> -> vector<128x128xf32>
    %41 = arith.addf %35, %40 : vector<128x128xf32>
    %42 = vector.extract_strided_slice %29 {offsets = [2, 0], sizes = [128, 128], strides = [1, 1]} : vector<130x128xf32> to vector<128x128xf32>
    %43 = arith.truncf %42 : vector<128x128xf32> to vector<128x128xbf16>
    %c5 = arith.constant 5 : index
    %c0_19 = arith.constant 0 : index
    %c0_20 = arith.constant 0 : index
    %44 = vector.load %arg3[%c5, %c0_19, %c0_20] : memref<9x128x128xbf16, #tpu.memory_space<vmem>>, vector<1x128x128xbf16>
    %45 = vector.shape_cast %44 : vector<1x128x128xbf16> to vector<128x128xbf16>
    %cst_21 = arith.constant dense<0.000000e+00> : vector<128x128xf32>
    %46 = tpu.matmul %43, %45, %cst_21 {dimension_numbers = #tpu.dot_dimension_numbers<[1], [0], [0], [1], [0, 0, 1, 1], [], []>} : vector<128x128xbf16>, vector<128x128xbf16>, vector<128x128xf32> -> vector<128x128xf32>
    %47 = arith.addf %41, %46 : vector<128x128xf32>
    %c32_i32 = arith.constant 32 : i32
    %48 = arith.addi %0, %c32_i32 : i32
    %49 = tpu.assume_multiple %48, 8 : i32
    %c0_22 = arith.constant 0 : index
    %50 = arith.index_cast %49 : i32 to index
    %c0_23 = arith.constant 0 : index
    %51 = vector.load %arg2[%c0_22, %50, %c0_23] : memref<1x176x128xf32, #tpu.memory_space<vmem>>, vector<1x130x128xf32>
    %52 = vector.shape_cast %51 : vector<1x130x128xf32> to vector<130x128xf32>
    %53 = vector.extract_strided_slice %52 {offsets = [0, 0], sizes = [128, 128], strides = [1, 1]} : vector<130x128xf32> to vector<128x128xf32>
    %54 = arith.truncf %53 : vector<128x128xf32> to vector<128x128xbf16>
    %c6 = arith.constant 6 : index
    %c0_24 = arith.constant 0 : index
    %c0_25 = arith.constant 0 : index
    %55 = vector.load %arg3[%c6, %c0_24, %c0_25] : memref<9x128x128xbf16, #tpu.memory_space<vmem>>, vector<1x128x128xbf16>
    %56 = vector.shape_cast %55 : vector<1x128x128xbf16> to vector<128x128xbf16>
    %cst_26 = arith.constant dense<0.000000e+00> : vector<128x128xf32>
    %57 = tpu.matmul %54, %56, %cst_26 {dimension_numbers = #tpu.dot_dimension_numbers<[1], [0], [0], [1], [0, 0, 1, 1], [], []>} : vector<128x128xbf16>, vector<128x128xbf16>, vector<128x128xf32> -> vector<128x128xf32>
    %58 = arith.addf %47, %57 : vector<128x128xf32>
    %59 = vector.extract_strided_slice %52 {offsets = [1, 0], sizes = [128, 128], strides = [1, 1]} : vector<130x128xf32> to vector<128x128xf32>
    %60 = arith.truncf %59 : vector<128x128xf32> to vector<128x128xbf16>
    %c7 = arith.constant 7 : index
    %c0_27 = arith.constant 0 : index
    %c0_28 = arith.constant 0 : index
    %61 = vector.load %arg3[%c7, %c0_27, %c0_28] : memref<9x128x128xbf16, #tpu.memory_space<vmem>>, vector<1x128x128xbf16>
    %62 = vector.shape_cast %61 : vector<1x128x128xbf16> to vector<128x128xbf16>
    %cst_29 = arith.constant dense<0.000000e+00> : vector<128x128xf32>
    %63 = tpu.matmul %60, %62, %cst_29 {dimension_numbers = #tpu.dot_dimension_numbers<[1], [0], [0], [1], [0, 0, 1, 1], [], []>} : vector<128x128xbf16>, vector<128x128xbf16>, vector<128x128xf32> -> vector<128x128xf32>
    %64 = arith.addf %58, %63 : vector<128x128xf32>
    %65 = vector.extract_strided_slice %52 {offsets = [2, 0], sizes = [128, 128], strides = [1, 1]} : vector<130x128xf32> to vector<128x128xf32>
    %66 = arith.truncf %65 : vector<128x128xf32> to vector<128x128xbf16>
    %c8 = arith.constant 8 : index
    %c0_30 = arith.constant 0 : index
    %c0_31 = arith.constant 0 : index
    %67 = vector.load %arg3[%c8, %c0_30, %c0_31] : memref<9x128x128xbf16, #tpu.memory_space<vmem>>, vector<1x128x128xbf16>
    %68 = vector.shape_cast %67 : vector<1x128x128xbf16> to vector<128x128xbf16>
    %cst_32 = arith.constant dense<0.000000e+00> : vector<128x128xf32>
    %69 = tpu.matmul %66, %68, %cst_32 {dimension_numbers = #tpu.dot_dimension_numbers<[1], [0], [0], [1], [0, 0, 1, 1], [], []>} : vector<128x128xbf16>, vector<128x128xbf16>, vector<128x128xf32> -> vector<128x128xf32>
    %70 = arith.addf %64, %69 : vector<128x128xf32>
    %c0_33 = arith.constant 0 : index
    %c0_34 = arith.constant 0 : index
    %71 = vector.load %arg4[%c0_33, %c0_34] : memref<1x128xf32, #tpu.memory_space<vmem>>, vector<1x128xf32>
    %72 = vector.broadcast %71 : vector<1x128xf32> to vector<128x128xf32>
    %73 = arith.addf %70, %72 : vector<128x128xf32>
    %cst_35 = arith.constant 0.000000e+00 : f32
    %74 = vector.broadcast %cst_35 : f32 to vector<128x128xf32>
    %75 = arith.maximumf %73, %74 : vector<128x128xf32>
    %76 = vector.shape_cast %75 : vector<128x128xf32> to vector<1x128x128xf32>
    %c0_36 = arith.constant 0 : index
    %c0_37 = arith.constant 0 : index
    %c0_38 = arith.constant 0 : index
    %77 = vector.load %arg5[%c0_36, %c0_37, %c0_38] : memref<1x128x128xf32, #tpu.memory_space<vmem>>, vector<1x128x128xf32>
    tpu.vector_store %arg5[%c0_36, %c0_37, %c0_38], %76 {strides = array<i32>} : memref<1x128x128xf32, #tpu.memory_space<vmem>>, vector<1x128x128xf32>,
    return
  }
  func.func @transform_0(%arg0: i32, %arg1: i32) -> (i32, i32, i32) {
    %c0_i32 = arith.constant 0 : i32
    %c0_i32_0 = arith.constant 0 : i32
    %c0_i32_1 = arith.constant 0 : i32
    return %arg0, %c0_i32, %c0_i32_0 : i32, i32, i32
  }
  func.func @transform_1(%arg0: i32, %arg1: i32) -> (i32, i32, i32) {
    %c0_i32 = arith.constant 0 : i32
    %c0_i32_0 = arith.constant 0 : i32
    %c0_i32_1 = arith.constant 0 : i32
    %c0_i32_2 = arith.constant 0 : i32
    return %c0_i32, %c0_i32_0, %c0_i32_1 : i32, i32, i32
  }
  func.func @transform_2(%arg0: i32, %arg1: i32) -> (i32, i32) {
    %c0_i32 = arith.constant 0 : i32
    %c0_i32_0 = arith.constant 0 : i32
    %c0_i32_1 = arith.constant 0 : i32
    return %c0_i32, %c0_i32_0 : i32, i32
  }
  func.func @transform_3(%arg0: i32, %arg1: i32) -> (i32, i32, i32) {
    %c0_i32 = arith.constant 0 : i32
    %c0_i32_0 = arith.constant 0 : i32
    return %arg0, %arg1, %c0_i32 : i32, i32, i32
  }
}

module attributes {stable_mosaic.version = 11 : i64} {
  func.func @_max4_kernel(%arg0: i32, %arg1: memref<32x128xf32, #tpu.memory_space<vmem>>, %arg2: memref<32x128xf32, #tpu.memory_space<vmem>>, %arg3: memref<32x128xf32, #tpu.memory_space<vmem>>, %arg4: memref<32x128xf32, #tpu.memory_space<vmem>>, %arg5: memref<32x128xf32, #tpu.memory_space<vmem>>) attributes {dimension_semantics = [#tpu.dimension_semantics<parallel>], iteration_bounds = array<i64: 1>, scalar_prefetch = 0 : i64, scratch_operands = 0 : i64, tpu.core_type = #tpu.core_type<tc>, window_params = [{transform_indices = @transform_0, window_bounds = array<i64: 32, 128>}, {transform_indices = @transform_1, window_bounds = array<i64: 32, 128>}, {transform_indices = @transform_2, window_bounds = array<i64: 32, 128>}, {transform_indices = @transform_3, window_bounds = array<i64: 32, 128>}, {transform_indices = @transform_4, window_bounds = array<i64: 32, 128>}]} {
    %c0 = arith.constant 0 : index
    %c0_0 = arith.constant 0 : index
    %0 = vector.load %arg1[%c0, %c0_0] : memref<32x128xf32, #tpu.memory_space<vmem>>, vector<32x128xf32>
    %c0_1 = arith.constant 0 : index
    %c0_2 = arith.constant 0 : index
    %1 = vector.load %arg2[%c0_1, %c0_2] : memref<32x128xf32, #tpu.memory_space<vmem>>, vector<32x128xf32>
    %2 = arith.maximumf %0, %1 : vector<32x128xf32>
    %c0_3 = arith.constant 0 : index
    %c0_4 = arith.constant 0 : index
    %3 = vector.load %arg3[%c0_3, %c0_4] : memref<32x128xf32, #tpu.memory_space<vmem>>, vector<32x128xf32>
    %c0_5 = arith.constant 0 : index
    %c0_6 = arith.constant 0 : index
    %4 = vector.load %arg4[%c0_5, %c0_6] : memref<32x128xf32, #tpu.memory_space<vmem>>, vector<32x128xf32>
    %5 = arith.maximumf %3, %4 : vector<32x128xf32>
    %6 = arith.maximumf %2, %5 : vector<32x128xf32>
    %c0_7 = arith.constant 0 : index
    %c0_8 = arith.constant 0 : index
    %7 = vector.load %arg5[%c0_7, %c0_8] : memref<32x128xf32, #tpu.memory_space<vmem>>, vector<32x128xf32>
    tpu.vector_store %arg5[%c0_7, %c0_8], %6 {strides = array<i32>} : memref<32x128xf32, #tpu.memory_space<vmem>>, vector<32x128xf32>,
    return
  }
  func.func @transform_0(%arg0: i32) -> (i32, i32) {
    %c0_i32 = arith.constant 0 : i32
    %c0_i32_0 = arith.constant 0 : i32
    return %arg0, %c0_i32 : i32, i32
  }
  func.func @transform_1(%arg0: i32) -> (i32, i32) {
    %c0_i32 = arith.constant 0 : i32
    %c0_i32_0 = arith.constant 0 : i32
    return %arg0, %c0_i32 : i32, i32
  }
  func.func @transform_2(%arg0: i32) -> (i32, i32) {
    %c0_i32 = arith.constant 0 : i32
    %c0_i32_0 = arith.constant 0 : i32
    return %arg0, %c0_i32 : i32, i32
  }
  func.func @transform_3(%arg0: i32) -> (i32, i32) {
    %c0_i32 = arith.constant 0 : i32
    %c0_i32_0 = arith.constant 0 : i32
    return %arg0, %c0_i32 : i32, i32
  }
  func.func @transform_4(%arg0: i32) -> (i32, i32) {
    %c0_i32 = arith.constant 0 : i32
    %c0_i32_0 = arith.constant 0 : i32
    return %arg0, %c0_i32 : i32, i32
  }
}

module attributes {stable_mosaic.version = 11 : i64} {
  func.func @_conv3x3_head_kernel(%arg0: i32, %arg1: i32, %arg2: memref<1x56x128xf32, #tpu.memory_space<vmem>>, %arg3: memref<9x128x256xbf16, #tpu.memory_space<vmem>>, %arg4: memref<1x256xf32, #tpu.memory_space<vmem>>, %arg5: memref<256x128xbf16, #tpu.memory_space<vmem>>, %arg6: memref<1x128xf32, #tpu.memory_space<vmem>>, %arg7: memref<1x32x128xf32, #tpu.memory_space<vmem>>) attributes {dimension_semantics = [#tpu.dimension_semantics<parallel>, #tpu.dimension_semantics<parallel>], iteration_bounds = array<i64: 2, 1>, scalar_prefetch = 0 : i64, scratch_operands = 0 : i64, tpu.core_type = #tpu.core_type<tc>, window_params = [{transform_indices = @transform_0, window_bounds = array<i64: 1, 56, 128>}, {pipeline_mode = #tpu.pipeline_mode<synchronous>, transform_indices = @transform_1, window_bounds = array<i64: 9, 128, 256>}, {pipeline_mode = #tpu.pipeline_mode<synchronous>, transform_indices = @transform_2, window_bounds = array<i64: 1, 256>}, {pipeline_mode = #tpu.pipeline_mode<synchronous>, transform_indices = @transform_3, window_bounds = array<i64: 256, 128>}, {pipeline_mode = #tpu.pipeline_mode<synchronous>, transform_indices = @transform_4, window_bounds = array<i64: 1, 128>}, {transform_indices = @transform_5, window_bounds = array<i64: 1, 32, 128>}]} {
    %c32_i32 = arith.constant 32 : i32
    %0 = arith.muli %arg1, %c32_i32 : i32
    %cst = arith.constant 0.000000e+00 : f32
    %1 = vector.broadcast %cst : f32 to vector<32x256xf32>
    %c0_i32 = arith.constant 0 : i32
    %2 = arith.addi %0, %c0_i32 : i32
    %3 = tpu.assume_multiple %2, 8 : i32
    %c0 = arith.constant 0 : index
    %4 = arith.index_cast %3 : i32 to index
    %c0_0 = arith.constant 0 : index
    %5 = vector.load %arg2[%c0, %4, %c0_0] : memref<1x56x128xf32, #tpu.memory_space<vmem>>, vector<1x34x128xf32>
    %6 = vector.shape_cast %5 : vector<1x34x128xf32> to vector<34x128xf32>
    %7 = vector.extract_strided_slice %6 {offsets = [0, 0], sizes = [32, 128], strides = [1, 1]} : vector<34x128xf32> to vector<32x128xf32>
    %8 = arith.truncf %7 : vector<32x128xf32> to vector<32x128xbf16>
    %c0_1 = arith.constant 0 : index
    %c0_2 = arith.constant 0 : index
    %c0_3 = arith.constant 0 : index
    %9 = vector.load %arg3[%c0_1, %c0_2, %c0_3] : memref<9x128x256xbf16, #tpu.memory_space<vmem>>, vector<1x128x256xbf16>
    %10 = vector.shape_cast %9 : vector<1x128x256xbf16> to vector<128x256xbf16>
    %cst_4 = arith.constant dense<0.000000e+00> : vector<32x256xf32>
    %11 = tpu.matmul %8, %10, %cst_4 {dimension_numbers = #tpu.dot_dimension_numbers<[1], [0], [0], [1], [0, 0, 1, 1], [], []>} : vector<32x128xbf16>, vector<128x256xbf16>, vector<32x256xf32> -> vector<32x256xf32>
    %12 = arith.addf %1, %11 : vector<32x256xf32>
    %13 = vector.extract_strided_slice %6 {offsets = [1, 0], sizes = [32, 128], strides = [1, 1]} : vector<34x128xf32> to vector<32x128xf32>
    %14 = arith.truncf %13 : vector<32x128xf32> to vector<32x128xbf16>
    %c1 = arith.constant 1 : index
    %c0_5 = arith.constant 0 : index
    %c0_6 = arith.constant 0 : index
    %15 = vector.load %arg3[%c1, %c0_5, %c0_6] : memref<9x128x256xbf16, #tpu.memory_space<vmem>>, vector<1x128x256xbf16>
    %16 = vector.shape_cast %15 : vector<1x128x256xbf16> to vector<128x256xbf16>
    %cst_7 = arith.constant dense<0.000000e+00> : vector<32x256xf32>
    %17 = tpu.matmul %14, %16, %cst_7 {dimension_numbers = #tpu.dot_dimension_numbers<[1], [0], [0], [1], [0, 0, 1, 1], [], []>} : vector<32x128xbf16>, vector<128x256xbf16>, vector<32x256xf32> -> vector<32x256xf32>
    %18 = arith.addf %12, %17 : vector<32x256xf32>
    %19 = vector.extract_strided_slice %6 {offsets = [2, 0], sizes = [32, 128], strides = [1, 1]} : vector<34x128xf32> to vector<32x128xf32>
    %20 = arith.truncf %19 : vector<32x128xf32> to vector<32x128xbf16>
    %c2 = arith.constant 2 : index
    %c0_8 = arith.constant 0 : index
    %c0_9 = arith.constant 0 : index
    %21 = vector.load %arg3[%c2, %c0_8, %c0_9] : memref<9x128x256xbf16, #tpu.memory_space<vmem>>, vector<1x128x256xbf16>
    %22 = vector.shape_cast %21 : vector<1x128x256xbf16> to vector<128x256xbf16>
    %cst_10 = arith.constant dense<0.000000e+00> : vector<32x256xf32>
    %23 = tpu.matmul %20, %22, %cst_10 {dimension_numbers = #tpu.dot_dimension_numbers<[1], [0], [0], [1], [0, 0, 1, 1], [], []>} : vector<32x128xbf16>, vector<128x256xbf16>, vector<32x256xf32> -> vector<32x256xf32>
    %24 = arith.addf %18, %23 : vector<32x256xf32>
    %c8_i32 = arith.constant 8 : i32
    %25 = arith.addi %0, %c8_i32 : i32
    %26 = tpu.assume_multiple %25, 8 : i32
    %c0_11 = arith.constant 0 : index
    %27 = arith.index_cast %26 : i32 to index
    %c0_12 = arith.constant 0 : index
    %28 = vector.load %arg2[%c0_11, %27, %c0_12] : memref<1x56x128xf32, #tpu.memory_space<vmem>>, vector<1x34x128xf32>
    %29 = vector.shape_cast %28 : vector<1x34x128xf32> to vector<34x128xf32>
    %30 = vector.extract_strided_slice %29 {offsets = [0, 0], sizes = [32, 128], strides = [1, 1]} : vector<34x128xf32> to vector<32x128xf32>
    %31 = arith.truncf %30 : vector<32x128xf32> to vector<32x128xbf16>
    %c3 = arith.constant 3 : index
    %c0_13 = arith.constant 0 : index
    %c0_14 = arith.constant 0 : index
    %32 = vector.load %arg3[%c3, %c0_13, %c0_14] : memref<9x128x256xbf16, #tpu.memory_space<vmem>>, vector<1x128x256xbf16>
    %33 = vector.shape_cast %32 : vector<1x128x256xbf16> to vector<128x256xbf16>
    %cst_15 = arith.constant dense<0.000000e+00> : vector<32x256xf32>
    %34 = tpu.matmul %31, %33, %cst_15 {dimension_numbers = #tpu.dot_dimension_numbers<[1], [0], [0], [1], [0, 0, 1, 1], [], []>} : vector<32x128xbf16>, vector<128x256xbf16>, vector<32x256xf32> -> vector<32x256xf32>
    %35 = arith.addf %24, %34 : vector<32x256xf32>
    %36 = vector.extract_strided_slice %29 {offsets = [1, 0], sizes = [32, 128], strides = [1, 1]} : vector<34x128xf32> to vector<32x128xf32>
    %37 = arith.truncf %36 : vector<32x128xf32> to vector<32x128xbf16>
    %c4 = arith.constant 4 : index
    %c0_16 = arith.constant 0 : index
    %c0_17 = arith.constant 0 : index
    %38 = vector.load %arg3[%c4, %c0_16, %c0_17] : memref<9x128x256xbf16, #tpu.memory_space<vmem>>, vector<1x128x256xbf16>
    %39 = vector.shape_cast %38 : vector<1x128x256xbf16> to vector<128x256xbf16>
    %cst_18 = arith.constant dense<0.000000e+00> : vector<32x256xf32>
    %40 = tpu.matmul %37, %39, %cst_18 {dimension_numbers = #tpu.dot_dimension_numbers<[1], [0], [0], [1], [0, 0, 1, 1], [], []>} : vector<32x128xbf16>, vector<128x256xbf16>, vector<32x256xf32> -> vector<32x256xf32>
    %41 = arith.addf %35, %40 : vector<32x256xf32>
    %42 = vector.extract_strided_slice %29 {offsets = [2, 0], sizes = [32, 128], strides = [1, 1]} : vector<34x128xf32> to vector<32x128xf32>
    %43 = arith.truncf %42 : vector<32x128xf32> to vector<32x128xbf16>
    %c5 = arith.constant 5 : index
    %c0_19 = arith.constant 0 : index
    %c0_20 = arith.constant 0 : index
    %44 = vector.load %arg3[%c5, %c0_19, %c0_20] : memref<9x128x256xbf16, #tpu.memory_space<vmem>>, vector<1x128x256xbf16>
    %45 = vector.shape_cast %44 : vector<1x128x256xbf16> to vector<128x256xbf16>
    %cst_21 = arith.constant dense<0.000000e+00> : vector<32x256xf32>
    %46 = tpu.matmul %43, %45, %cst_21 {dimension_numbers = #tpu.dot_dimension_numbers<[1], [0], [0], [1], [0, 0, 1, 1], [], []>} : vector<32x128xbf16>, vector<128x256xbf16>, vector<32x256xf32> -> vector<32x256xf32>
    %47 = arith.addf %41, %46 : vector<32x256xf32>
    %c16_i32 = arith.constant 16 : i32
    %48 = arith.addi %0, %c16_i32 : i32
    %49 = tpu.assume_multiple %48, 8 : i32
    %c0_22 = arith.constant 0 : index
    %50 = arith.index_cast %49 : i32 to index
    %c0_23 = arith.constant 0 : index
    %51 = vector.load %arg2[%c0_22, %50, %c0_23] : memref<1x56x128xf32, #tpu.memory_space<vmem>>, vector<1x34x128xf32>
    %52 = vector.shape_cast %51 : vector<1x34x128xf32> to vector<34x128xf32>
    %53 = vector.extract_strided_slice %52 {offsets = [0, 0], sizes = [32, 128], strides = [1, 1]} : vector<34x128xf32> to vector<32x128xf32>
    %54 = arith.truncf %53 : vector<32x128xf32> to vector<32x128xbf16>
    %c6 = arith.constant 6 : index
    %c0_24 = arith.constant 0 : index
    %c0_25 = arith.constant 0 : index
    %55 = vector.load %arg3[%c6, %c0_24, %c0_25] : memref<9x128x256xbf16, #tpu.memory_space<vmem>>, vector<1x128x256xbf16>
    %56 = vector.shape_cast %55 : vector<1x128x256xbf16> to vector<128x256xbf16>
    %cst_26 = arith.constant dense<0.000000e+00> : vector<32x256xf32>
    %57 = tpu.matmul %54, %56, %cst_26 {dimension_numbers = #tpu.dot_dimension_numbers<[1], [0], [0], [1], [0, 0, 1, 1], [], []>} : vector<32x128xbf16>, vector<128x256xbf16>, vector<32x256xf32> -> vector<32x256xf32>
    %58 = arith.addf %47, %57 : vector<32x256xf32>
    %59 = vector.extract_strided_slice %52 {offsets = [1, 0], sizes = [32, 128], strides = [1, 1]} : vector<34x128xf32> to vector<32x128xf32>
    %60 = arith.truncf %59 : vector<32x128xf32> to vector<32x128xbf16>
    %c7 = arith.constant 7 : index
    %c0_27 = arith.constant 0 : index
    %c0_28 = arith.constant 0 : index
    %61 = vector.load %arg3[%c7, %c0_27, %c0_28] : memref<9x128x256xbf16, #tpu.memory_space<vmem>>, vector<1x128x256xbf16>
    %62 = vector.shape_cast %61 : vector<1x128x256xbf16> to vector<128x256xbf16>
    %cst_29 = arith.constant dense<0.000000e+00> : vector<32x256xf32>
    %63 = tpu.matmul %60, %62, %cst_29 {dimension_numbers = #tpu.dot_dimension_numbers<[1], [0], [0], [1], [0, 0, 1, 1], [], []>} : vector<32x128xbf16>, vector<128x256xbf16>, vector<32x256xf32> -> vector<32x256xf32>
    %64 = arith.addf %58, %63 : vector<32x256xf32>
    %65 = vector.extract_strided_slice %52 {offsets = [2, 0], sizes = [32, 128], strides = [1, 1]} : vector<34x128xf32> to vector<32x128xf32>
    %66 = arith.truncf %65 : vector<32x128xf32> to vector<32x128xbf16>
    %c8 = arith.constant 8 : index
    %c0_30 = arith.constant 0 : index
    %c0_31 = arith.constant 0 : index
    %67 = vector.load %arg3[%c8, %c0_30, %c0_31] : memref<9x128x256xbf16, #tpu.memory_space<vmem>>, vector<1x128x256xbf16>
    %68 = vector.shape_cast %67 : vector<1x128x256xbf16> to vector<128x256xbf16>
    %cst_32 = arith.constant dense<0.000000e+00> : vector<32x256xf32>
    %69 = tpu.matmul %66, %68, %cst_32 {dimension_numbers = #tpu.dot_dimension_numbers<[1], [0], [0], [1], [0, 0, 1, 1], [], []>} : vector<32x128xbf16>, vector<128x256xbf16>, vector<32x256xf32> -> vector<32x256xf32>
    %70 = arith.addf %64, %69 : vector<32x256xf32>
    %c0_33 = arith.constant 0 : index
    %c0_34 = arith.constant 0 : index
    %71 = vector.load %arg4[%c0_33, %c0_34] : memref<1x256xf32, #tpu.memory_space<vmem>>, vector<1x256xf32>
    %72 = vector.broadcast %71 : vector<1x256xf32> to vector<32x256xf32>
    %73 = arith.addf %70, %72 : vector<32x256xf32>
    %cst_35 = arith.constant 0.000000e+00 : f32
    %74 = vector.broadcast %cst_35 : f32 to vector<32x256xf32>
    %75 = arith.maximumf %73, %74 : vector<32x256xf32>
    %76 = arith.truncf %75 : vector<32x256xf32> to vector<32x256xbf16>
    %c0_36 = arith.constant 0 : index
    %c0_37 = arith.constant 0 : index
    %77 = vector.load %arg5[%c0_36, %c0_37] : memref<256x128xbf16, #tpu.memory_space<vmem>>, vector<256x128xbf16>
    %cst_38 = arith.constant dense<0.000000e+00> : vector<32x128xf32>
    %78 = tpu.matmul %76, %77, %cst_38 {dimension_numbers = #tpu.dot_dimension_numbers<[1], [0], [0], [1], [0, 0, 1, 1], [], []>} : vector<32x256xbf16>, vector<256x128xbf16>, vector<32x128xf32> -> vector<32x128xf32>
    %c0_39 = arith.constant 0 : index
    %c0_40 = arith.constant 0 : index
    %79 = vector.load %arg6[%c0_39, %c0_40] : memref<1x128xf32, #tpu.memory_space<vmem>>, vector<1x128xf32>
    %80 = vector.broadcast %79 : vector<1x128xf32> to vector<32x128xf32>
    %81 = arith.addf %78, %80 : vector<32x128xf32>
    %82 = vector.shape_cast %81 : vector<32x128xf32> to vector<1x32x128xf32>
    %c0_41 = arith.constant 0 : index
    %c0_42 = arith.constant 0 : index
    %c0_43 = arith.constant 0 : index
    %83 = vector.load %arg7[%c0_41, %c0_42, %c0_43] : memref<1x32x128xf32, #tpu.memory_space<vmem>>, vector<1x32x128xf32>
    tpu.vector_store %arg7[%c0_41, %c0_42, %c0_43], %82 {strides = array<i32>} : memref<1x32x128xf32, #tpu.memory_space<vmem>>, vector<1x32x128xf32>,
    return
  }
  func.func @transform_0(%arg0: i32, %arg1: i32) -> (i32, i32, i32) {
    %c0_i32 = arith.constant 0 : i32
    %c0_i32_0 = arith.constant 0 : i32
    %c0_i32_1 = arith.constant 0 : i32
    return %arg0, %c0_i32, %c0_i32_0 : i32, i32, i32
  }
  func.func @transform_1(%arg0: i32, %arg1: i32) -> (i32, i32, i32) {
    %c0_i32 = arith.constant 0 : i32
    %c0_i32_0 = arith.constant 0 : i32
    %c0_i32_1 = arith.constant 0 : i32
    %c0_i32_2 = arith.constant 0 : i32
    return %c0_i32, %c0_i32_0, %c0_i32_1 : i32, i32, i32
  }
  func.func @transform_2(%arg0: i32, %arg1: i32) -> (i32, i32) {
    %c0_i32 = arith.constant 0 : i32
    %c0_i32_0 = arith.constant 0 : i32
    %c0_i32_1 = arith.constant 0 : i32
    return %c0_i32, %c0_i32_0 : i32, i32
  }
  func.func @transform_3(%arg0: i32, %arg1: i32) -> (i32, i32) {
    %c0_i32 = arith.constant 0 : i32
    %c0_i32_0 = arith.constant 0 : i32
    %c0_i32_1 = arith.constant 0 : i32
    return %c0_i32, %c0_i32_0 : i32, i32
  }
  func.func @transform_4(%arg0: i32, %arg1: i32) -> (i32, i32) {
    %c0_i32 = arith.constant 0 : i32
    %c0_i32_0 = arith.constant 0 : i32
    %c0_i32_1 = arith.constant 0 : i32
    return %c0_i32, %c0_i32_0 : i32, i32
  }
  func.func @transform_5(%arg0: i32, %arg1: i32) -> (i32, i32, i32) {
    %c0_i32 = arith.constant 0 : i32
    %c0_i32_0 = arith.constant 0 : i32
    return %arg0, %arg1, %c0_i32 : i32, i32, i32
  }
}

</mosaic_0001>

<bundles_post_ra>
// kernel: _lambda_.6
= control target key start
LH: loop header
LB: loop body
LE: loop exit
PB: predicated region body
PF: predicated region fallthrough
CT: control target
= control target key end

     0   :  { %s414_s0 = inlined_call_operand.vmem [shape: f32[128,128], index: 0, kind: input, shape index: {}]   ;;  %s415_s1 = inlined_call_operand.vmem [shape: f32[128,128], index: 1, kind: input, shape index: {}]   ;;  %s416_s2 = inlined_call_operand.vmem [shape: f32[128,128], index: 2, kind: input, shape index: {}]   ;;  %s417_s3 = inlined_call_operand.vmem [shape: f32[128,128], index: 3, kind: input, shape index: {}]   ;;  %s418_s4 = inlined_call_operand.vmem [shape: f32[128,128], index: 4, kind: output, shape index: {}]  }
   0x1   :  { %v17_v0 = vld [vmem:[%s414_s0] sm:$0xff]  ;;  %v18_v5 = vld [vmem:[%s414_s0 + $0x8] sm:$0xff]  ;;  %v19_v11 = vld [vmem:[%s414_s0 + $0x10] sm:$0xff] }
   0x2   :  { %v33_v1 = vld [vmem:[%s415_s1] sm:$0xff]  ;;  %v34_v6 = vld [vmem:[%s415_s1 + $0x8] sm:$0xff]  ;;  %v35_v13 = vld [vmem:[%s415_s1 + $0x10] sm:$0xff] }
   0x3   :  { %v65_v2 = vld [vmem:[%s416_s2] sm:$0xff]  ;;  %v49_v3 = vmax.f32 %v17_v0, %v33_v1  ;;  %v50_v8 = vmax.f32 %v18_v5, %v34_v6  ;;  %v66_v9 = vld [vmem:[%s416_s2 + $0x8] sm:$0xff]  ;;  %v67_v14 = vld [vmem:[%s416_s2 + $0x10] sm:$0xff]  ;;  %v51_v17 = vmax.f32 %v19_v11, %v35_v13 }
   0x4   :  { %v81_v4 = vld [vmem:[%s417_s3] sm:$0xff]  ;;  %v82_v10 = vld [vmem:[%s417_s3 + $0x8] sm:$0xff]  ;;  %v83_v15 = vld [vmem:[%s417_s3 + $0x10] sm:$0xff] }
   0x5   :  { %v97_v7 = vmax.f32 %v65_v2, %v81_v4  ;;  %v98_v12 = vmax.f32 %v66_v9, %v82_v10  ;;  %v99_v18 = vmax.f32 %v67_v14, %v83_v15  ;;  %v20_v19 = vld [vmem:[%s414_s0 + $0x18] sm:$0xff]  ;;  %v21_v25 = vld [vmem:[%s414_s0 + $0x20] sm:$0xff]  ;;  %v22_v32 = vld [vmem:[%s414_s0 + $0x28] sm:$0xff] }
   0x6   :  { %v36_v20 = vld [vmem:[%s415_s1 + $0x18] sm:$0xff]  ;;  %v37_v26 = vld [vmem:[%s415_s1 + $0x20] sm:$0xff]  ;;  %v38_v34 = vld [vmem:[%s415_s1 + $0x28] sm:$0xff] }
   0x7   :  { %v113_v16 = vmax.f32 %v49_v3, %v97_v7  ;;  %v68_v21 = vld [vmem:[%s416_s2 + $0x18] sm:$0xff]  ;;  %v114_v22 = vmax.f32 %v50_v8, %v98_v12  ;;  %v52_v23 = vmax.f32 %v20_v19, %v36_v20  ;;  %v115_v27 = vmax.f32 %v51_v17, %v99_v18  ;;  %v69_v30 = vld [vmem:[%s416_s2 + $0x20] sm:$0xff]  ;;  %v70_v35 = vld [vmem:[%s416_s2 + $0x28] sm:$0xff] }
   0x8   :  { %v84_v24 = vld [vmem:[%s417_s3 + $0x18] sm:$0xff]  ;;  %v53_v29 = vmax.f32 %v21_v25, %v37_v26  ;;  %v85_v31 = vld [vmem:[%s417_s3 + $0x20] sm:$0xff]  ;;  %v86_v36 = vld [vmem:[%s417_s3 + $0x28] sm:$0xff]  ;;  %v54_v38 = vmax.f32 %v22_v32, %v38_v34 }
   0x9   :  { %129 = vst [vmem:[%s418_s4] sm:$0xff] %v113_v16  ;;  %v100_v28 = vmax.f32 %v68_v21, %v84_v24  ;;  %130 = vst [vmem:[%s418_s4 + $0x8] sm:$0xff] %v114_v22  ;;  %v101_v33 = vmax.f32 %v69_v30, %v85_v31  ;;  %v102_v39 = vmax.f32 %v70_v35, %v86_v36  ;;  %v23_v40 = vld [vmem:[%s414_s0 + $0x30] sm:$0xff]  ;;  %v24_v46 = vld [vmem:[%s414_s0 + $0x38] sm:$0xff] }
   0xa   :  { %131 = vst [vmem:[%s418_s4 + $0x10] sm:$0xff] %v115_v27  ;;  %v39_v41 = vld [vmem:[%s415_s1 + $0x30] sm:$0xff]  ;;  %v40_v47 = vld [vmem:[%s415_s1 + $0x38] sm:$0xff]  ;;  %v25_v53 = vld [vmem:[%s414_s0 + $0x40] sm:$0xff] }
   0xb   :  { %v116_v37 = vmax.f32 %v52_v23, %v100_v28  ;;  %v71_v42 = vld [vmem:[%s416_s2 + $0x30] sm:$0xff]  ;;  %v117_v43 = vmax.f32 %v53_v29, %v101_v33  ;;  %v55_v44 = vmax.f32 %v23_v40, %v39_v41  ;;  %v118_v48 = vmax.f32 %v54_v38, %v102_v39  ;;  %v72_v51 = vld [vmem:[%s416_s2 + $0x38] sm:$0xff]  ;;  %v41_v55 = vld [vmem:[%s415_s1 + $0x40] sm:$0xff] }
   0xc   :  { %v87_v45 = vld [vmem:[%s417_s3 + $0x30] sm:$0xff]  ;;  %v56_v50 = vmax.f32 %v24_v46, %v40_v47  ;;  %v88_v52 = vld [vmem:[%s417_s3 + $0x38] sm:$0xff]  ;;  %v73_v56 = vld [vmem:[%s416_s2 + $0x40] sm:$0xff]  ;;  %v57_v59 = vmax.f32 %v25_v53, %v41_v55 }
   0xd   :  { %132 = vst [vmem:[%s418_s4 + $0x18] sm:$0xff] %v116_v37  ;;  %v103_v49 = vmax.f32 %v71_v42, %v87_v45  ;;  %133 = vst [vmem:[%s418_s4 + $0x20] sm:$0xff] %v117_v43  ;;  %v104_v54 = vmax.f32 %v72_v51, %v88_v52  ;;  %v89_v57 = vld [vmem:[%s417_s3 + $0x40] sm:$0xff]  ;;  %v26_v61 = vld [vmem:[%s414_s0 + $0x48] sm:$0xff] }
   0xe   :  { %134 = vst [vmem:[%s418_s4 + $0x28] sm:$0xff] %v118_v48  ;;  %v105_v60 = vmax.f32 %v73_v56, %v89_v57  ;;  %v42_v62 = vld [vmem:[%s415_s1 + $0x48] sm:$0xff]  ;;  %v27_v3 = vld [vmem:[%s414_s0 + $0x50] sm:$0xff]  ;;  %v28_v10 = vld [vmem:[%s414_s0 + $0x58] sm:$0xff] }
   0xf   :  { %v119_v58 = vmax.f32 %v55_v44, %v103_v49  ;;  %v74_v63 = vld [vmem:[%s416_s2 + $0x48] sm:$0xff]  ;;  %v120_v0 = vmax.f32 %v56_v50, %v104_v54  ;;  %v58_v1 = vmax.f32 %v26_v61, %v42_v62  ;;  %v43_v4 = vld [vmem:[%s415_s1 + $0x50] sm:$0xff]  ;;  %v44_v12 = vld [vmem:[%s415_s1 + $0x58] sm:$0xff] }
  0x10   :  { %v90_v2 = vld [vmem:[%s417_s3 + $0x48] sm:$0xff]  ;;  %v121_v5 = vmax.f32 %v57_v59, %v105_v60  ;;  %v59_v7 = vmax.f32 %v27_v3, %v43_v4  ;;  %v75_v8 = vld [vmem:[%s416_s2 + $0x50] sm:$0xff]  ;;  %v76_v13 = vld [vmem:[%s416_s2 + $0x58] sm:$0xff]  ;;  %v60_v16 = vmax.f32 %v28_v10, %v44_v12 }
  0x11   :  { %135 = vst [vmem:[%s418_s4 + $0x30] sm:$0xff] %v119_v58  ;;  %v106_v6 = vmax.f32 %v74_v63, %v90_v2  ;;  %v91_v9 = vld [vmem:[%s417_s3 + $0x50] sm:$0xff]  ;;  %136 = vst [vmem:[%s418_s4 + $0x38] sm:$0xff] %v120_v0  ;;  %v92_v14 = vld [vmem:[%s417_s3 + $0x58] sm:$0xff] }
  0x12   :  { %v107_v11 = vmax.f32 %v75_v8, %v91_v9  ;;  %137 = vst [vmem:[%s418_s4 + $0x40] sm:$0xff] %v121_v5  ;;  %v108_v17 = vmax.f32 %v76_v13, %v92_v14  ;;  %v29_v18 = vld [vmem:[%s414_s0 + $0x60] sm:$0xff]  ;;  %v30_v24 = vld [vmem:[%s414_s0 + $0x68] sm:$0xff]  ;;  %v31_v31 = vld [vmem:[%s414_s0 + $0x70] sm:$0xff] }
  0x13   :  { %v122_v15 = vmax.f32 %v58_v1, %v106_v6  ;;  %v45_v19 = vld [vmem:[%s415_s1 + $0x60] sm:$0xff]  ;;  %v46_v25 = vld [vmem:[%s415_s1 + $0x68] sm:$0xff]  ;;  %v47_v33 = vld [vmem:[%s415_s1 + $0x70] sm:$0xff] }
  0x14   :  { %v77_v20 = vld [vmem:[%s416_s2 + $0x60] sm:$0xff]  ;;  %v123_v21 = vmax.f32 %v59_v7, %v107_v11  ;;  %v61_v22 = vmax.f32 %v29_v18, %v45_v19  ;;  %v124_v26 = vmax.f32 %v60_v16, %v108_v17  ;;  %v62_v28 = vmax.f32 %v30_v24, %v46_v25  ;;  %v78_v29 = vld [vmem:[%s416_s2 + $0x68] sm:$0xff]  ;;  %v79_v34 = vld [vmem:[%s416_s2 + $0x70] sm:$0xff] }
  0x15   :  { %v93_v23 = vld [vmem:[%s417_s3 + $0x60] sm:$0xff]  ;;  %138 = vst [vmem:[%s418_s4 + $0x48] sm:$0xff] %v122_v15  ;;  %v94_v30 = vld [vmem:[%s417_s3 + $0x68] sm:$0xff]  ;;  %v95_v35 = vld [vmem:[%s417_s3 + $0x70] sm:$0xff]  ;;  %v63_v37 = vmax.f32 %v31_v31, %v47_v33 }
  0x16   :  { %v109_v27 = vmax.f32 %v77_v20, %v93_v23  ;;  %139 = vst [vmem:[%s418_s4 + $0x50] sm:$0xff] %v123_v21  ;;  %v110_v32 = vmax.f32 %v78_v29, %v94_v30  ;;  %140 = vst [vmem:[%s418_s4 + $0x58] sm:$0xff] %v124_v26  ;;  %v111_v38 = vmax.f32 %v79_v34, %v95_v35  ;;  %v32_v39 = vld [vmem:[%s414_s0 + $0x78] sm:$0xff] }
  0x17   :  { %v48_v40 = vld [vmem:[%s415_s1 + $0x78] sm:$0xff] }
  0x18   :  { %v125_v36 = vmax.f32 %v61_v22, %v109_v27  ;;  %v80_v41 = vld [vmem:[%s416_s2 + $0x78] sm:$0xff]  ;;  %v126_v42 = vmax.f32 %v62_v28, %v110_v32  ;;  %v64_v43 = vmax.f32 %v32_v39, %v48_v40  ;;  %v127_v45 = vmax.f32 %v63_v37, %v111_v38 }
  0x19   :  { %v96_v44 = vld [vmem:[%s417_s3 + $0x78] sm:$0xff] }
  0x1a   :  { %141 = vst [vmem:[%s418_s4 + $0x60] sm:$0xff] %v125_v36  ;;  %v112_v46 = vmax.f32 %v80_v41, %v96_v44  ;;  %142 = vst [vmem:[%s418_s4 + $0x68] sm:$0xff] %v126_v42 }
  0x1b   :  { %143 = vst [vmem:[%s418_s4 + $0x70] sm:$0xff] %v127_v45 }
  0x1c   :  { %v128_v47 = vmax.f32 %v64_v43, %v112_v46 }
  0x1e   :  { %144 = vst [vmem:[%s418_s4 + $0x78] sm:$0xff] %v128_v47 }

// kernel: _lambda_.8
= control target key start
LH: loop header
LB: loop body
LE: loop exit
PB: predicated region body
PF: predicated region fallthrough
CT: control target
= control target key end

     0   :  { %s138_s0 = inlined_call_operand.vmem [shape: f32[32,128], index: 0, kind: input, shape index: {}]   ;;  %s139_s1 = inlined_call_operand.vmem [shape: f32[32,128], index: 1, kind: input, shape index: {}]   ;;  %s140_s2 = inlined_call_operand.vmem [shape: f32[32,128], index: 2, kind: input, shape index: {}]   ;;  %s141_s3 = inlined_call_operand.vmem [shape: f32[32,128], index: 3, kind: input, shape index: {}]   ;;  %s142_s4 = inlined_call_operand.vmem [shape: f32[32,128], index: 4, kind: output, shape index: {}]  }
   0x1   :  { %v17_v0 = vld [vmem:[%s138_s0] sm:$0xff]  ;;  %v18_v5 = vld [vmem:[%s138_s0 + $0x8] sm:$0xff]  ;;  %v19_v11 = vld [vmem:[%s138_s0 + $0x10] sm:$0xff] }
   0x2   :  { %v21_v1 = vld [vmem:[%s139_s1] sm:$0xff]  ;;  %v22_v6 = vld [vmem:[%s139_s1 + $0x8] sm:$0xff]  ;;  %v23_v13 = vld [vmem:[%s139_s1 + $0x10] sm:$0xff] }
   0x3   :  { %v29_v2 = vld [vmem:[%s140_s2] sm:$0xff]  ;;  %v25_v3 = vmax.f32 %v17_v0, %v21_v1  ;;  %v26_v8 = vmax.f32 %v18_v5, %v22_v6  ;;  %v30_v9 = vld [vmem:[%s140_s2 + $0x8] sm:$0xff]  ;;  %v31_v14 = vld [vmem:[%s140_s2 + $0x10] sm:$0xff]  ;;  %v27_v17 = vmax.f32 %v19_v11, %v23_v13 }
   0x4   :  { %v33_v4 = vld [vmem:[%s141_s3] sm:$0xff]  ;;  %v34_v10 = vld [vmem:[%s141_s3 + $0x8] sm:$0xff]  ;;  %v35_v15 = vld [vmem:[%s141_s3 + $0x10] sm:$0xff] }
   0x5   :  { %v37_v7 = vmax.f32 %v29_v2, %v33_v4  ;;  %v38_v12 = vmax.f32 %v30_v9, %v34_v10  ;;  %v39_v18 = vmax.f32 %v31_v14, %v35_v15  ;;  %v20_v19 = vld [vmem:[%s138_s0 + $0x18] sm:$0xff] }
   0x6   :  { %v24_v20 = vld [vmem:[%s139_s1 + $0x18] sm:$0xff] }
   0x7   :  { %v41_v16 = vmax.f32 %v25_v3, %v37_v7  ;;  %v32_v21 = vld [vmem:[%s140_s2 + $0x18] sm:$0xff]  ;;  %v42_v22 = vmax.f32 %v26_v8, %v38_v12  ;;  %v28_v23 = vmax.f32 %v20_v19, %v24_v20  ;;  %v43_v25 = vmax.f32 %v27_v17, %v39_v18 }
   0x8   :  { %v36_v24 = vld [vmem:[%s141_s3 + $0x18] sm:$0xff] }
   0x9   :  { %45 = vst [vmem:[%s142_s4] sm:$0xff] %v41_v16  ;;  %v40_v26 = vmax.f32 %v32_v21, %v36_v24  ;;  %46 = vst [vmem:[%s142_s4 + $0x8] sm:$0xff] %v42_v22 }
   0xa   :  { %47 = vst [vmem:[%s142_s4 + $0x10] sm:$0xff] %v43_v25 }
   0xb   :  { %v44_v27 = vmax.f32 %v28_v23, %v40_v26 }
   0xd   :  { %48 = vst [vmem:[%s142_s4 + $0x18] sm:$0xff] %v44_v27 }

// kernel: _lambda_.5
= control target key start
LH: loop header
LB: loop body
LE: loop exit
PB: predicated region body
PF: predicated region fallthrough
CT: control target
= control target key end

     0   :  { %s3201_s12 = smov 0   ;;  %s3203_s13 = smov 0   ;;  %s4271_s0 = inlined_call_operand.vmem [shape: f32[2,456,3], index: 0, kind: input, shape index: {}]   ;;  %s4272_s1 = inlined_call_operand.vmem [shape: bf16[9,3,128], index: 1, kind: input, shape index: {}]   ;;  %s4273_s2 = inlined_call_operand.vmem [shape: f32[1,128], index: 2, kind: input, shape index: {}]   ;;  %s4274_s3 = inlined_call_operand.vmem [shape: f32[2,384,128], index: 3, kind: output, shape index: {}]  }
   0x1   :  { %s3205_s14 = smov 0   ;;  %s3207_s15 = smov 0  }
   0x2   :  { %s3209_s16 = smov 0  }
   0x3 LB: > { %s22_s17 = sadd.s32 1, %s3170_s14  ;;  %s25_s18 = sadd.s32 1, %s3174_s15  ;;  %s3178_s16 = sphi %s3209_s16, %s13_s16   ;;  %s3174_s15 = sphi %s3207_s15, %s4329_s15   ;;  %s3170_s14 = sphi %s3205_s14, %s4328_s14   ;;  %s3166_s13 = sphi %s3203_s13, %s4327_s13   ;;  %s3162_s12 = sphi %s3201_s12, %s4326_s12  }
   0x4   : > { %p23_p0 = scmp.ge.s32.totalorder %s22_s17, 2  ;;  %p2572_p1 = scmp.ge.s32.totalorder %s3178_s16, 1 }
   0x5   : > { %p151_p2 = scmp.lt.s32.totalorder %s3178_s16, 5 }
   0x6   : > { %s4331_s17 = smov (%p23_p0, %s22_s17), 0  ;;  %s4333_s18 = smov (!%p23_p0, %s25_s18), %s3174_s15 }
   0x7   : > { %p152_p3 = pnand %p2572_p1, %p151_p2  ;;  %p27_p4 = scmp.ge.s32.totalorder %s4333_s18, 2 }
   0x9   : > { %s4335_s18 = smov (%p27_p4, %s4333_s18), 0  ;;  %155 = sbr.rel (%p152_p3) target bundleno = 450 (0x1c2), region = 32 }
   0xe   : > { %v2575_v0 = vld [vmem:[%s4272_s1 + $0x2] sm:$0x3]  ;;  %vm376_vm0 = vcmask 1040384   ;;  %vm377_vm1 = vcmask 1041408   ;;  %p179_p5 = scmp.lt.s32.totalorder %s3166_s13, 1  ;;  %v3180_v1 = vmov 65535  }
   0xf   : > { %v378_v2 = vsel %vm376_vm0, 4294967295, %v3180_v1  ;;  %v234_v4 = vld [vmem:[%s4272_s1] sm:$0x3]  ;;  %v2600_v5 = vld [vmem:[%s4272_s1 + $0x4] sm:$0x3]  ;;  %s195_s25 = smul.u32 192, %s3162_s12 }
  0x10   : > { %v3236_v3 = vsel %vm377_vm1, %v378_v2, 0  ;;  %s4337_s13 = smov (!%p179_p5, %s3166_s13), 1  ;;  %v2638_v9 = vld [vmem:[%s4272_s1 + $0x6] sm:$0x3]  ;;  %v2651_v10 = vld [vmem:[%s4272_s1 + $0x8] sm:$0x3] }
  0x11   : > { %v381_v6 = vand.u32 %v2575_v0, %v3236_v3  ;;  %v3249_v7 = vand.u32 %v3236_v3, %v234_v4  ;;  %v3252_v8 = vand.u32 %v2600_v5, %v3236_v3  ;;  %s3097_s26 = smul.u32 456, %s4337_s13  ;;  %vm238_vm2 = vsmask.f32 7424 }
  0x12   : > { %vm339_vm3 = vcmask 23552   ;;  %v3299_v23 = vand.u32 %v2638_v9, %v3236_v3  ;;  %v3317_v30 = vand.u32 %v2651_v10, %v3236_v3  ;;  %vm683_vm4 = vcmask 1046528   ;;  %s184_s23 = smul.u32 24, %s3162_s12 }
  0x13   : > { %3095 = vmatprep.subr.bf16.mxu1 %v381_v6  ;;  %2861 = vmatprep.subr.bf16.mxu0 %v381_v6  ;;  %s183_s29 = scalar_lea.vmem %s4271_s0, %s3097_s26  ;;  %s3098_s24 = smul.u32 48, %s4337_s13 }
  0x14   : > { %3096 = vmatpush3.bf16.msra.mxu1 %v381_v6  ;;  %2862 = vmatpush3.bf16.msra.mxu0 %v381_v6  ;;  %s3258_s30 = scalar_lea.vmem %s183_s29, %s195_s25  ;;  %p187_p6 = scmp.lt.s32.totalorder %s184_s23, 47 }
  0x15   : > { %2887 = vmatprep.subr.bf16.mxu1 %v3249_v7  ;;  %2913 = vmatprep.subr.bf16.mxu0 %v3252_v8  ;;  %v197_v11 = vld [vmem:[%s3258_s30] sm:$0xff]  ;;  %v198_v12 = vld [vmem:[%s3258_s30 + $0x8] sm:$0xff]  ;;  %v199_v13 = vld [vmem:[%s3258_s30 + $0x10] sm:$0xff] }
  0x16   : > { %v3272_v14 = vld [vmem:[%s3258_s30 + $0x18] sm:$0xff]  ;;  %v3274_v15 = vpack.c.bf16 %v198_v12, %v197_v11  ;;  %v3277_v16 = vld [vmem:[%s3258_s30 + $0x60] sm:$0xff]  ;;  %v3280_v17 = vld [vmem:[%s3258_s30 + $0x68] sm:$0xff]  ;;  %s4339_s23 = smov (!%p187_p6, %s184_s23), 47 }
  0x17   : > { %v3283_v18 = vpack.c.bf16 %v3272_v14, %v199_v13  ;;  %v3286_v19 = vld [vmem:[%s3258_s30 + $0x70] sm:$0xff]  ;;  %v3289_v20 = vld [vmem:[%s3258_s30 + $0x78] sm:$0xff]  ;;  %v3293_v21 = vpack.c.bf16 %v3280_v17, %v3277_v16  ;;  %v3296_v22 = vld [vmem:[%s3258_s30 + $0x20] sm:$0xff]  ;;  %s190_s12 = sadd.s32 %s3098_s24, %s4339_s23 }
  0x18   : > { %v240_v24 = vshrl.u32 %v3274_v15, 16  ;;  %v242_v25 = vshll.u32 %v3274_v15, 16  ;;  %v3305_v26 = vpack.c.bf16 %v3289_v20, %v3286_v19  ;;  %v3308_v27 = vld [vmem:[%s3258_s30 + $0x28] sm:$0xff]  ;;  %v3311_v28 = vld [vmem:[%s3258_s30 + $0x80] sm:$0xff]  ;;  %v3324_v35 = vld [vmem:[%s3258_s30 + $0x30] sm:$0xff]  ;;  %s2574_s26 = sshll.u32 %s190_s12, 3 }
  0x19   : > { %v3314_v29 = vld [vmem:[%s3258_s30 + $0x88] sm:$0xff]  ;;  %v247_v31 = vshll.u32 %v3283_v18, 16  ;;  %v251_v32 = vshrl.u32 %v3283_v18, 16  ;;  %v287_v33 = vshll.u32 %v3293_v21, 16  ;;  %v291_v34 = vshrl.u32 %v3293_v21, 16  ;;  %v3327_v36 = vld [vmem:[%s3258_s30 + $0x38] sm:$0xff]  ;;  %s4154_s29 = scalar_lea.vmem %s4274_s3, %s2574_s26 }
  0x1a   : > { %v244_v37 = vrot.slane %v242_v25, 1  ;;  %v295_v38 = vshll.u32 %v3305_v26, 16  ;;  %v299_v39 = vshrl.u32 %v3305_v26, 16  ;;  %v3333_v40 = vpack.c.bf16 %v3308_v27, %v3296_v22  ;;  %v3346_v45 = vld [vmem:[%s3258_s30 + $0x90] sm:$0xff]  ;;  %v3349_v46 = vld [vmem:[%s3258_s30 + $0x98] sm:$0xff]  ;;  %v3357_v55 = vld [vmem:[%s3258_s30 + $0x40] sm:$0xff] }
  0x1b   : > { %v249_v41 = vrot.slane %v247_v31, 1  ;;  %v3335_v42 = vrot.slane %v287_v33, 1  ;;  %v3339_v43 = vpack.c.bf16 %v3314_v29, %v3311_v28  ;;  %v3343_v44 = vpack.c.bf16 %v3327_v36, %v3324_v35  ;;  %v3360_v56 = vld [vmem:[%s3258_s30 + $0x48] sm:$0xff]  ;;  %v3368_v61 = vld [vmem:[%s3258_s30 + $0xa0] sm:$0xff]  ;;  %v3387_v10 = vld [vmem:[%s3258_s30 + $0x50] sm:$0xff] }
  0x1c   : > { %v245_v47 = vor.u32 %v244_v37, %v240_v24  ;;  %v297_v48 = vrot.slane %v295_v38, 1  ;;  %v255_v49 = vshll.u32 %v3333_v40, 16  ;;  %v259_v50 = vshrl.u32 %v3333_v40, 16  ;;  %v3371_v62 = vld [vmem:[%s3258_s30 + $0xa8] sm:$0xff]  ;;  %v3390_v11 = vld [vmem:[%s3258_s30 + $0x58] sm:$0xff]  ;;  %v3402_v31 = vld [vmem:[%s3258_s30 + $0xb0] sm:$0xff] }
  0x1d   : > { %v253_v51 = vor.u32 %v251_v32, %v249_v41  ;;  %v293_v52 = vor.u32 %v291_v34, %v3335_v42  ;;  %v303_v53 = vshll.u32 %v3339_v43, 16  ;;  %v263_v54 = vshll.u32 %v3343_v44, 16  ;;  %v3405_v32 = vld [vmem:[%s3258_s30 + $0xb8] sm:$0xff] }
  0x1e   : > { %v250_v57 = vsel %vm238_vm2, %v245_v47, %v249_v41  ;;  %v301_v58 = vor.u32 %v299_v39, %v297_v48  ;;  %v257_v59 = vrot.slane %v255_v49, 1  ;;  %v3365_v60 = vpack.c.bf16 %v3349_v46, %v3346_v45 }
  0x1f   : > { %2863 = vmatprep.mubr.msk.bf16.mxu0 %vm339_vm3, %v250_v57  ;;  %v3375_v63 = vsel %vm238_vm2, %v293_v52, %v297_v48  ;;  %v305_v0 = vrot.slane %v303_v53, 1  ;;  %v265_v1 = vrot.slane %v263_v54, 1  ;;  %v307_v2 = vshrl.u32 %v3339_v43, 16  ;;  %v221_v48 = vld [vmem:[%s3258_s30 + $0xc0] sm:$0x3] }
  0x20   : > { %2875 = vmatprep.mubr.msk.bf16.mxu1 %vm339_vm3, %v3375_v63  ;;  %v258_v4 = vsel %vm238_vm2, %v253_v51, %v257_v59  ;;  %v261_v5 = vor.u32 %v259_v50, %v257_v59  ;;  %v311_v6 = vshll.u32 %v3365_v60, 16  ;;  %v3384_v9 = vpack.c.bf16 %v3360_v56, %v3357_v55 }
  0x21   : > { %2864 = vmatmul.mubr.msk.bf16.vlgmr.msra.gmra.mxu0 %vm339_vm3, %v258_v4  ;;  %v3394_v12 = vsel %vm238_vm2, %v301_v58, %v305_v0  ;;  %v309_v13 = vor.u32 %v307_v2, %v305_v0  ;;  %v267_v24 = vshrl.u32 %v3343_v44, 16  ;;  %v3399_v25 = vpack.c.bf16 %v3371_v62, %v3368_v61 }
  0x22   : > { %2876 = vmatmul.mubr.msk.bf16.vlgmr.msra.gmra.mxu1 %vm339_vm3, %v3394_v12  ;;  %2914 = vmatpush3.bf16.msra.mxu0 %v3252_v8  ;;  %v266_v33 = vsel %vm238_vm2, %v261_v5, %v265_v1  ;;  %v313_v34 = vrot.slane %v311_v6, 1  ;;  %v271_v37 = vshll.u32 %v3384_v9, 16  ;;  %v315_v38 = vshrl.u32 %v3365_v60, 16 }
  0x23   : > { %2888 = vmatpush3.bf16.msra.mxu1 %v3249_v7  ;;  %2867 = vmatprep.mubr.msk.bf16.mxu0 %vm339_vm3, %v266_v33  ;;  %v269_v39 = vor.u32 %v267_v24, %v265_v1  ;;  %v319_v41 = vshll.u32 %v3399_v25, 16  ;;  %v3418_v47 = vpack.c.bf16 %v3390_v11, %v3387_v10  ;;  %v275_v8 = vshrl.u32 %v3384_v9, 16 }
  0x24   : > { %v3423_v49 = vsel %vm238_vm2, %v309_v13, %v313_v34  ;;  %v273_v50 = vrot.slane %v271_v37, 1  ;;  %v317_v51 = vor.u32 %v315_v38, %v313_v34  ;;  %v3427_v7 = vpack.c.bf16 %v3405_v32, %v3402_v31  ;;  %2939 = vmatprep.subr.bf16.mxu1 %v3299_v23  ;;  %2965 = vmatprep.subr.bf16.mxu0 %v3317_v30 }
  0x25   : > { %2879 = vmatprep.mubr.msk.bf16.mxu1 %vm339_vm3, %v3423_v49  ;;  %v321_v52 = vrot.slane %v319_v41, 1  ;;  %v279_v53 = vshll.u32 %v3418_v47, 16  ;;  %v323_v54 = vshrl.u32 %v3399_v25, 16  ;;  %v283_v57 = vshrl.u32 %v3418_v47, 16 }
  0x26   : > { %v3437_v58 = vsel %vm238_vm2, %v269_v39, %v273_v50  ;;  %v277_v59 = vor.u32 %v275_v8, %v273_v50  ;;  %v327_v0 = vshll.u32 %v3427_v7, 16  ;;  %v3440_v1 = vpack.c.bf16 %v221_v48, %v221_v48  ;;  %v2664_v39 = vld [vmem:[%s4272_s1 + $0xa] sm:$0x3] }
  0x27   : > { %v3443_v2 = vsel %vm238_vm2, %v317_v51, %v321_v52  ;;  %v281_v4 = vrot.slane %v279_v53, 1  ;;  %v325_v5 = vor.u32 %v323_v54, %v321_v52  ;;  %v331_v6 = vshrl.u32 %v3427_v7, 16  ;;  %v2702_v51 = vld [vmem:[%s4272_s1 + $0xc] sm:$0x3] }
  0x28   : > { %4280 = vst [vmem:[#allocation2_spill] sm:$0xff] %v3443_v2  ;;  %v329_v13 = vrot.slane %v327_v0, 1  ;;  %v335_v24 = vshll.u32 %v3440_v1, 16  ;;  %v684_v38 = vrot.slane %v3274_v15, 1  ;;  %v685_v48 = vrot.slane %v3283_v18, 1 }
  0x29   : > { %2868 = vmatmul.mubr.msk.bf16.gmra.mxu0 %vm339_vm3, %v3437_v58  ;;  %v3450_v33 = vsel %vm238_vm2, %v277_v59, %v281_v4  ;;  %v285_v37 = vor.u32 %v283_v57, %v281_v4  ;;  %v687_v50 = vrot.slane %v3333_v40, 1  ;;  %v4275_v52 = vrot.slane %v3343_v44, 1 }
  0x2a   : > { %2880 = vmatmul.mubr.msk.bf16.gmra.mxu1 %vm339_vm3, %v3443_v2  ;;  %2871 = vmatprep.mubr.msk.bf16.mxu0 %vm339_vm3, %v3450_v33  ;;  %v3457_v34 = vsel %vm238_vm2, %v325_v5, %v329_v13  ;;  %v3465_v41 = vor.u32 %v331_v6, %v329_v13  ;;  %v337_v8 = vrot.slane %v335_v24, 1  ;;  %v3478_v54 = vand.u32 %v2664_v39, %v3236_v3 }
  0x2b   : > { %4281 = vst [vmem:[#allocation3_spill] sm:$0xff] %v3457_v34  ;;  %2883 = vmatprep.mubr.msk.bf16.mxu1 %vm339_vm3, %v3457_v34  ;;  %v3475_v53 = vsel %vm238_vm2, %v285_v37, %v3335_v42  ;;  %v3481_v57 = vand.u32 %v2702_v51, %v3236_v3  ;;  %v686_v0 = vsel %vm683_vm4, %v684_v38, %v685_v48 }
  0x2c   : > { %4282 = vst [vmem:[#allocation4_spill] sm:$0xff] %v3465_v41  ;;  %v338_v59 = vsel %vm238_vm2, %v3465_v41, %v337_v8  ;;  %v688_v4 = vsel %vm683_vm4, %v685_v48, %v687_v50  ;;  %v690_v42 = vsel %vm683_vm4, %v687_v50, %v4275_v52  ;;  %v3493_v6 = vpack.c.bf16 %v3296_v22, %v3272_v14 }
  0x2d   : > { %v3497_v13 = vpack.c.bf16 %v3324_v35, %v3308_v27  ;;  %v3501_v24 = vpack.c.bf16 %v3357_v55, %v3327_v36  ;;  %v3507_v37 = vpack.c.bf16 %v3387_v10, %v3360_v56  ;;  %v3511_v38 = vpack.c.bf16 %v3277_v16, %v3390_v11 }
  0x2e   : > { %v3515_v14 = vpack.c.bf16 %v3286_v19, %v3280_v17  ;;  %v3519_v22 = vpack.c.bf16 %v3311_v28, %v3289_v20  ;;  %v1137_v27 = vshrl.u32 %v3493_v6, 16  ;;  %v1139_v35 = vshll.u32 %v3493_v6, 16 }
  0x2f   : > { %v1143_v36 = vshll.u32 %v3497_v13, 16  ;;  %v1147_v16 = vshrl.u32 %v3497_v13, 16  ;;  %v1150_v17 = vshll.u32 %v3501_v24, 16  ;;  %v1154_v19 = vshrl.u32 %v3501_v24, 16 }
  0x30   : > { %v1157_v20 = vshll.u32 %v3507_v37, 16  ;;  %v1161_v28 = vshrl.u32 %v3507_v37, 16  ;;  %v1141_v55 = vrot.slane %v1139_v35, 1  ;;  %v1164_v10 = vshll.u32 %v3511_v38, 16 }
  0x31   : > { %2872 = vmatmul.mubr.msk.bf16.gmra.mxu0 %vm339_vm3, %v3475_v53  ;;  %v1145_v56 = vrot.slane %v1143_v36, 1  ;;  %v1168_v11 = vshrl.u32 %v3511_v38, 16  ;;  %v1152_v39 = vrot.slane %v1150_v17, 1  ;;  %v1171_v48 = vshll.u32 %v3515_v14, 16 }
  0x32   : > { %2884 = vmatmul.mubr.msk.bf16.gmra.mxu1 %vm339_vm3, %v338_v59  ;;  %2915 = vmatprep.mubr.msk.bf16.mxu0 %vm339_vm3, %v686_v0  ;;  %v1159_v8 = vrot.slane %v1157_v20, 1  ;;  %v1142_v50 = vor.u32 %v1141_v55, %v1137_v27  ;;  %v1166_v59 = vrot.slane %v1164_v10, 1  ;;  %v1178_v0 = vshll.u32 %v3519_v22, 16 }
  0x33   : > { %2889 = vmatprep.mubr.msk.bf16.mxu1 %vm339_vm3, %v3274_v15  ;;  %v1175_v15 = vshrl.u32 %v3515_v14, 16  ;;  %v1149_v51 = vor.u32 %v1147_v16, %v1145_v56  ;;  %v1156_v52 = vor.u32 %v1154_v19, %v1152_v39  ;;  %v1173_v35 = vrot.slane %v1171_v48, 1 }
  0x34   : > { %v1163_v5 = vor.u32 %v1161_v28, %v1159_v8  ;;  %v3540_v36 = vpack.c.bf16 %v3346_v45, %v3314_v29  ;;  %v3543_v17 = vsel %vm238_vm2, %v1142_v50, %v1145_v56  ;;  %v1170_v34 = vor.u32 %v1168_v11, %v1166_v59  ;;  %v3557_v45 = vld [vmem:[%s3258_s30 + $0xc0] sm:$0xff] }
  0x35   : > { %v3546_v20 = vsel %vm238_vm2, %v1149_v51, %v1152_v39  ;;  %v1180_v27 = vrot.slane %v1178_v0, 1  ;;  %v3550_v16 = vsel %vm238_vm2, %v1156_v52, %v1159_v8  ;;  %v1177_v28 = vor.u32 %v1175_v15, %v1173_v35 }
  0x36   : > { %v3553_v19 = vsel %vm238_vm2, %v1163_v5, %v1166_v59  ;;  %v1182_v29 = vshrl.u32 %v3519_v22, 16  ;;  %v3563_v55 = vsel %vm238_vm2, %v1170_v34, %v1173_v35  ;;  %v3568_v52 = vpack.c.bf16 %v3368_v61, %v3349_v46 }
  0x37   : > { %v1189_v5 = vshrl.u32 %v3540_v36, 16  ;;  %v3580_v56 = vpack.c.bf16 %v3402_v31, %v3371_v62  ;;  %v4283_v10 = vrot.slane %v3384_v9, 1  ;;  %v4284_v11 = vrot.slane %v3343_v44, 1 }
  0x38   : > { %v1184_v34 = vor.u32 %v1182_v29, %v1180_v27  ;;  %v1196_v61 = vshrl.u32 %v3568_v52, 16  ;;  %v1432_v59 = vrot.slane %v3493_v6, 1  ;;  %v695_v0 = vrot.slane %v3293_v21, 1 }
  0x39   : > { %2916 = vmatmul.mubr.msk.bf16.vlgmr.msra.gmra.mxu0 %vm339_vm3, %v688_v4  ;;  %v1185_v4 = vshll.u32 %v3540_v36, 16  ;;  %v3595_v62 = vsel %vm683_vm4, %v4284_v11, %v4283_v10  ;;  %v1199_v31 = vshll.u32 %v3580_v56, 16  ;;  %v4285_v15 = vmov %v4283_v10 }
  0x3a   : > { %2890 = vmatmul.mubr.msk.bf16.vlgmr.msra.gmra.mxu1 %vm339_vm3, %v3283_v18  ;;  %2966 = vmatpush3.bf16.msra.mxu0 %v3317_v30  ;;  %v693_v18 = vrot.slane %v3418_v47, 1  ;;  %v3576_v30 = vsel %vm238_vm2, %v1177_v28, %v1180_v27  ;;  %v697_v29 = vrot.slane %v3305_v26, 1 }
  0x3b   : > { %2940 = vmatpush3.bf16.msra.mxu1 %v3299_v23  ;;  %2893 = vmatprep.mubr.msk.bf16.mxu1 %vm339_vm3, %v3333_v40  ;;  %v1187_v46 = vrot.slane %v1185_v4, 1  ;;  %v1192_v23 = vshll.u32 %v3568_v52, 16  ;;  %v3588_v40 = vpack.c.bf16 %v3557_v45, %v3405_v32  ;;  %v1201_v51 = vrot.slane %v1199_v31, 1 }
  0x3c   : > { %2919 = vmatprep.mubr.msk.bf16.mxu0 %vm339_vm3, %v690_v42  ;;  %2991 = vmatprep.subr.bf16.mxu1 %v3478_v54  ;;  %v1203_v42 = vshrl.u32 %v3580_v56, 16  ;;  %v3607_v50 = vsel %vm683_vm4, %v4285_v15, %v693_v18  ;;  %v3641_v11 = vsel %vm683_vm4, %v693_v18, %v695_v0  ;;  %v1437_v31 = vrot.slane %v3507_v37, 1 }
  0x3d   : > { %3017 = vmatprep.subr.bf16.mxu0 %v3481_v57  ;;  %v3601_v39 = vsel %vm238_vm2, %v1184_v34, %v1187_v46  ;;  %v1191_v8 = vor.u32 %v1189_v5, %v1187_v46  ;;  %v1194_v48 = vrot.slane %v1192_v23, 1  ;;  %v1206_v32 = vshll.u32 %v3588_v40, 16 }
  0x3e   : > { %v1205_v4 = vor.u32 %v1203_v42, %v1201_v51  ;;  %v1433_v5 = vrot.slane %v3497_v13, 1  ;;  %v1435_v34 = vrot.slane %v3501_v24, 1  ;;  %v1439_v42 = vrot.slane %v3511_v38, 1 }
  0x3f   : > { %v3612_v35 = vsel %vm238_vm2, %v1191_v8, %v1194_v48  ;;  %v1198_v27 = vor.u32 %v1196_v61, %v1194_v48  ;;  %v3614_v28 = vrot.slane %v1206_v32, 1  ;;  %v1441_v8 = vrot.slane %v3515_v14, 1 }
  0x40   : > { %v3635_v61 = vsel %vm683_vm4, %v1432_v59, %v1433_v5  ;;  %v3638_v10 = vsel %vm683_vm4, %v1433_v5, %v1435_v34  ;;  %v3647_v48 = vsel %vm683_vm4, %v695_v0, %v697_v29  ;;  %v1443_v32 = vrot.slane %v3519_v22, 1 }
  0x41   : > { %2920 = vmatmul.mubr.msk.bf16.gmra.mxu0 %vm339_vm3, %v3595_v62  ;;  %v3626_v46 = vsel %vm238_vm2, %v1198_v27, %v1201_v51  ;;  %v3632_v23 = vsel %vm238_vm2, %v1205_v4, %v3614_v28  ;;  %v1445_v15 = vrot.slane %v3540_v36, 1  ;;  %v1447_v51 = vrot.slane %v3568_v52, 1 }
  0x42   : > { %2894 = vmatmul.mubr.msk.bf16.gmra.mxu1 %vm339_vm3, %v3343_v44  ;;  %2923 = vmatprep.mubr.msk.bf16.mxu0 %vm339_vm3, %v3607_v50  ;;  %v3653_v59 = vsel %vm683_vm4, %v1435_v34, %v1437_v31  ;;  %v3656_v18 = vsel %vm683_vm4, %v1437_v31, %v1439_v42  ;;  %v3659_v27 = vsel %vm683_vm4, %v1439_v42, %v1441_v8  ;;  %v1449_v4 = vrot.slane %v3580_v56, 1 }
  0x43   : > { %2897 = vmatprep.mubr.msk.bf16.mxu1 %vm339_vm3, %v3384_v9  ;;  %v3663_v0 = vsel %vm683_vm4, %v1441_v8, %v1443_v32  ;;  %v3666_v5 = vsel %vm683_vm4, %v1443_v32, %v1445_v15  ;;  %v3669_v41 = vsel %vm683_vm4, %v1445_v15, %v1447_v51  ;;  %v4279_v34 = vrot.slane %v3588_v40, 1 }
  0x44   : > { %v3673_v2 = vsel %vm683_vm4, %v1447_v51, %v1449_v4  ;;  %v699_v42 = vrot.slane %v3339_v43, 1  ;;  %v701_v8 = vrot.slane %v3365_v60, 1  ;;  %v703_v51 = vrot.slane %v3399_v25, 1 }
  0x45   : > { %v3680_v31 = vsel %vm683_vm4, %v1449_v4, %v4279_v34  ;;  %v707_v34 = vrot.slane %v3440_v1, 1  ;;  %v2715_v1 = vld [vmem:[%s4272_s1 + $0xe] sm:$0x3] }
  0x46   : > { %v3691_v32 = vsel %vm683_vm4, %v697_v29, %v699_v42  ;;  %v3694_v15 = vsel %vm683_vm4, %v699_v42, %v701_v8  ;;  %v3706_v29 = vrot.slane %v3427_v7, 1  ;;  %v3709_v4 = vsel %vm683_vm4, %v701_v8, %v703_v51 }
  0x48   : > { %v3713_v42 = vsel %vm683_vm4, %v703_v51, %v3706_v29  ;;  %v708_v8 = vsel %vm683_vm4, %v3706_v29, %v707_v34  ;;  %v2728_v34 = vld [vmem:[%s4272_s1 + $0x10] sm:$0x3]  ;;  %v2010_v51 = vand.u32 %v2715_v1, %v3236_v3 }
  0x49   : > { %2924 = vmatmul.mubr.msk.bf16.gmra.mxu0 %vm339_vm3, %v3641_v11 }
  0x4a   : > { %2898 = vmatmul.mubr.msk.bf16.gmra.mxu1 %vm339_vm3, %v3418_v47  ;;  %2927 = vmatprep.mubr.msk.bf16.mxu0 %vm339_vm3, %v3647_v48 }
  0x4b   : > { %2901 = vmatprep.mubr.msk.bf16.mxu1 %vm339_vm3, %v3293_v21 }
  0x51   : > { %2928 = vmatmul.mubr.msk.bf16.gmra.mxu0 %vm339_vm3, %v3691_v32 }
  0x52   : > { %2902 = vmatmul.mubr.msk.bf16.gmra.mxu1 %vm339_vm3, %v3305_v26  ;;  %2931 = vmatprep.mubr.msk.bf16.mxu0 %vm339_vm3, %v3694_v15 }
  0x53   : > { %2905 = vmatprep.mubr.msk.bf16.mxu1 %vm339_vm3, %v3339_v43 }
  0x59   : > { %2932 = vmatmul.mubr.msk.bf16.gmra.mxu0 %vm339_vm3, %v3709_v4 }
  0x5a   : > { %2906 = vmatmul.mubr.msk.bf16.gmra.mxu1 %vm339_vm3, %v3365_v60  ;;  %2935 = vmatprep.mubr.msk.bf16.mxu0 %vm339_vm3, %v3713_v42 }
  0x5b   : > { %2909 = vmatprep.mubr.msk.bf16.mxu1 %vm339_vm3, %v3399_v25 }
  0x61   : > { %2936 = vmatmul.mubr.msk.bf16.gmra.mxu0 %vm339_vm3, %v708_v8 }
  0x62   : > { %2910 = vmatmul.mubr.msk.bf16.gmra.mxu1 %vm339_vm3, %v3427_v7  ;;  %2967 = vmatprep.mubr.msk.bf16.mxu0 %vm339_vm3, %v3543_v17  ;;  %v2242_v17 = vand.u32 %v2728_v34, %v3236_v3  ;;  %v2635_v3 = vld [vmem:[%s3258_s30 + $0xc8] sm:$0xff] }
  0x63   : > { %2941 = vmatprep.mubr.msk.bf16.mxu1 %vm339_vm3, %v3493_v6  ;;  %v1210_v6 = vshrl.u32 %v3588_v40, 16 }
  0x69   : > { %2968 = vmatmul.mubr.msk.bf16.vlgmr.msra.gmra.mxu0 %vm339_vm3, %v3546_v20 }
  0x6a   : > { %2942 = vmatmul.mubr.msk.bf16.vlgmr.msra.gmra.mxu1 %vm339_vm3, %v3497_v13  ;;  %3018 = vmatpush3.bf16.msra.mxu0 %v3481_v57 }
  0x6b   : > { %2992 = vmatpush3.bf16.msra.mxu1 %v3478_v54  ;;  %2945 = vmatprep.mubr.msk.bf16.mxu1 %vm339_vm3, %v3501_v24  ;;  %v2636_v54 = vld [vmem:[%s3258_s30 + $0xd0] sm:$0xff]  ;;  %v2637_v24 = vld [vmem:[%s3258_s30 + $0xd8] sm:$0x3] }
  0x6c   : > { %2971 = vmatprep.mubr.msk.bf16.mxu0 %vm339_vm3, %v3550_v16  ;;  %3043 = vmatprep.subr.bf16.mxu1 %v2010_v51  ;;  %v939_v57 = vpack.c.bf16 %v2636_v54, %v2635_v3 }
  0x6d   : > { %3069 = vmatprep.subr.bf16.mxu0 %v2242_v17 }
  0x6e   : > { %v1213_v13 = vshll.u32 %v939_v57, 16 }
  0x71   : > { %2972 = vmatmul.mubr.msk.bf16.gmra.mxu0 %vm339_vm3, %v3553_v19 }
  0x72   : > { %2946 = vmatmul.mubr.msk.bf16.gmra.mxu1 %vm339_vm3, %v3507_v37  ;;  %2975 = vmatprep.mubr.msk.bf16.mxu0 %vm339_vm3, %v3563_v55  ;;  %v1134_v37 = vpack.c.bf16 %v2637_v24, %v2637_v24 }
  0x73   : > { %2949 = vmatprep.mubr.msk.bf16.mxu1 %vm339_vm3, %v3511_v38  ;;  %v1212_v38 = vor.u32 %v1210_v6, %v3614_v28 }
  0x74   : > { %v1221_v20 = vshll.u32 %v1134_v37, 16 }
  0x76   : > { %v1223_v19 = vrot.slane %v1221_v20, 1 }
  0x79   : > { %2976 = vmatmul.mubr.msk.bf16.gmra.mxu0 %vm339_vm3, %v3576_v30  ;;  %v4288_v30 = vld [vmem:[#allocation4_spill] sm:$0xff] }
  0x7a   : > { %2950 = vmatmul.mubr.msk.bf16.gmra.mxu1 %vm339_vm3, %v3515_v14  ;;  %2979 = vmatprep.mubr.msk.bf16.mxu0 %vm339_vm3, %v3601_v39  ;;  %v1215_v14 = vrot.slane %v1213_v13, 1 }
  0x7b   : > { %2953 = vmatprep.mubr.msk.bf16.mxu1 %vm339_vm3, %v3519_v22  ;;  %v1217_v22 = vshrl.u32 %v939_v57, 16 }
  0x7c   : > { %v1216_v16 = vsel %vm238_vm2, %v1212_v38, %v1215_v14 }
  0x81   : > { %2980 = vmatmul.mubr.msk.bf16.gmra.mxu0 %vm339_vm3, %v3612_v35  ;;  %v4289_v35 = vld [vmem:[#allocation3_spill] sm:$0xff] }
  0x82   : > { %2954 = vmatmul.mubr.msk.bf16.gmra.mxu1 %vm339_vm3, %v3540_v36  ;;  %2983 = vmatprep.mubr.msk.bf16.mxu0 %vm339_vm3, %v3626_v46  ;;  %v1219_v36 = vor.u32 %v1217_v22, %v1215_v14 }
  0x83   : > { %2957 = vmatprep.mubr.msk.bf16.mxu1 %vm339_vm3, %v3568_v52 }
  0x84   : > { %v1224_v55 = vsel %vm238_vm2, %v1219_v36, %v1223_v19 }
  0x89   : > { %2984 = vmatmul.mubr.msk.bf16.gmra.mxu0 %vm339_vm3, %v3632_v23 }
  0x8a   : > { %2958 = vmatmul.mubr.msk.bf16.gmra.mxu1 %vm339_vm3, %v3580_v56  ;;  %2987 = vmatprep.mubr.msk.bf16.mxu0 %vm339_vm3, %v1216_v16 }
  0x8b   : > { %2961 = vmatprep.mubr.msk.bf16.mxu1 %vm339_vm3, %v3588_v40 }
  0x91   : > { %2988 = vmatmul.mubr.msk.bf16.gmra.mxu0 %vm339_vm3, %v1224_v55 }
  0x92   : > { %2962 = vmatmul.mubr.msk.bf16.gmra.mxu1 %vm339_vm3, %v939_v57  ;;  %3019 = vmatprep.mubr.msk.bf16.mxu0 %vm339_vm3, %v3343_v44 }
  0x93   : > { %2993 = vmatprep.mubr.msk.bf16.mxu1 %vm339_vm3, %v3635_v61 }
  0x99   : > { %3020 = vmatmul.mubr.msk.bf16.vlgmr.msra.gmra.mxu0 %vm339_vm3, %v3384_v9 }
  0x9a   : > { %2994 = vmatmul.mubr.msk.bf16.vlgmr.msra.gmra.mxu1 %vm339_vm3, %v3638_v10  ;;  %3070 = vmatpush3.bf16.msra.mxu0 %v2242_v17 }
  0x9b   : > { %3044 = vmatpush3.bf16.msra.mxu1 %v2010_v51  ;;  %2997 = vmatprep.mubr.msk.bf16.mxu1 %vm339_vm3, %v3653_v59 }
  0x9c   : > { %3023 = vmatprep.mubr.msk.bf16.mxu0 %vm339_vm3, %v3418_v47  ;;  %v2700_v47 = vld [vmem:[%s3258_s30 + $0xe8] sm:$0xff] }
  0xa1   : > { %3024 = vmatmul.mubr.msk.bf16.gmra.mxu0 %vm339_vm3, %v3293_v21  ;;  %v2698_v21 = vld [vmem:[%s3258_s30 + $0xd8] sm:$0xff] }
  0xa2   : > { %2998 = vmatmul.mubr.msk.bf16.gmra.mxu1 %vm339_vm3, %v3656_v18  ;;  %3027 = vmatprep.mubr.msk.bf16.mxu0 %vm339_vm3, %v3305_v26  ;;  %v1453_v26 = vrot.slane %v939_v57, 1  ;;  %v1686_v44 = vpack.c.bf16 %v2698_v21, %v2636_v54 }
  0xa3   : > { %3001 = vmatprep.mubr.msk.bf16.mxu1 %vm339_vm3, %v3659_v27 }
  0xa4   : > { %v2199_v46 = vrot.slane %v1686_v44, 1 }
  0xa9   : > { %3028 = vmatmul.mubr.msk.bf16.gmra.mxu0 %vm339_vm3, %v3339_v43  ;;  %v1685_v43 = vpack.c.bf16 %v2635_v3, %v3557_v45  ;;  %v1954_v45 = vshll.u32 %v1686_v44, 16 }
  0xaa   : > { %3002 = vmatmul.mubr.msk.bf16.gmra.mxu1 %vm339_vm3, %v3663_v0  ;;  %3031 = vmatprep.mubr.msk.bf16.mxu0 %vm339_vm3, %v3365_v60  ;;  %v4286_v60 = vrot.slane %v3588_v40, 1  ;;  %v1958_v40 = vshrl.u32 %v1686_v44, 16 }
  0xab   : > { %3005 = vmatprep.mubr.msk.bf16.mxu1 %vm339_vm3, %v3666_v5  ;;  %v1956_v28 = vrot.slane %v1954_v45, 1 }
  0xac   : > { %v1454_v9 = vsel %vm683_vm4, %v4286_v60, %v1453_v26 }
  0xad   : > { %v1960_v59 = vor.u32 %v1958_v40, %v1956_v28 }
  0xb1   : > { %3032 = vmatmul.mubr.msk.bf16.gmra.mxu0 %vm339_vm3, %v3399_v25  ;;  %v2699_v25 = vld [vmem:[%s3258_s30 + $0xe0] sm:$0xff] }
  0xb2   : > { %3006 = vmatmul.mubr.msk.bf16.gmra.mxu1 %vm339_vm3, %v3669_v41  ;;  %3035 = vmatprep.mubr.msk.bf16.mxu0 %vm339_vm3, %v3427_v7  ;;  %v1455_v7 = vrot.slane %v1134_v37, 1 }
  0xb3   : > { %3009 = vmatprep.mubr.msk.bf16.mxu1 %vm339_vm3, %v3673_v2  ;;  %v3839_v2 = vpack.c.bf16 %v2700_v47, %v2699_v25 }
  0xb4   : > { %v1456_v41 = vsel %vm683_vm4, %v1453_v26, %v1455_v7 }
  0xb5   : > { %v2201_v10 = vrot.slane %v3839_v2, 1 }
  0xb9   : > { %3036 = vmatmul.mubr.msk.bf16.gmra.mxu0 %vm339_vm3, %v1685_v43 }
  0xba   : > { %3010 = vmatmul.mubr.msk.bf16.gmra.mxu1 %vm339_vm3, %v3680_v31  ;;  %3039 = vmatprep.mubr.msk.bf16.mxu0 %vm339_vm3, %v1686_v44 }
  0xbb   : > { %3013 = vmatprep.mubr.msk.bf16.mxu1 %vm339_vm3, %v1454_v9 }
  0xc1   : > { %3040 = vmatmul.mubr.msk.bf16.gmra.mxu0 %vm339_vm3, %v3839_v2 }
  0xc2   : > { %3014 = vmatmul.mubr.msk.bf16.gmra.mxu1 %vm339_vm3, %v1456_v41  ;;  %3071 = vmatprep.mubr.msk.bf16.mxu0 %vm339_vm3, %v3595_v62  ;;  %v1961_v62 = vshll.u32 %v3839_v2, 16 }
  0xc3   : > { %3045 = vmatprep.mubr.msk.bf16.mxu1 %vm339_vm3, %v3437_v58  ;;  %v1947_v58 = vshll.u32 %v1685_v43, 16 }
  0xc4   : > { %v1963_v18 = vrot.slane %v1961_v62, 1 }
  0xc6   : > { %v1964_v8 = vsel %vm238_vm2, %v1960_v59, %v1963_v18 }
  0xc9   : > { %3072 = vmatmul.mubr.msk.bf16.vlgmr.msra.gmra.mxu0 %vm339_vm3, %v3607_v50 }
  0xca   : > { %3046 = vmatmul.mubr.msk.bf16.vlgmr.msra.gmra.mxu1 %vm339_vm3, %v3450_v33  ;;  %3075 = vmatprep.mubr.msk.bf16.mxu0 %vm339_vm3, %v3641_v11  ;;  %v4287_v33 = vld [vmem:[#allocation2_spill] sm:$0xff] }
  0xcb   : > { %3049 = vmatprep.mubr.msk.bf16.mxu1 %vm339_vm3, %v3475_v53  ;;  %v1949_v53 = vrot.slane %v1947_v58, 1 }
  0xcd   : > { %v1950_v56 = vsel %vm238_vm2, %v4288_v30, %v1949_v53 }
  0xd1   : > { %3076 = vmatmul.mubr.msk.bf16.gmra.mxu0 %vm339_vm3, %v3647_v48 }
  0xd2   : > { %3050 = vmatmul.mubr.msk.bf16.gmra.mxu1 %vm339_vm3, %v3375_v63  ;;  %3079 = vmatprep.mubr.msk.bf16.mxu0 %vm339_vm3, %v3691_v32  ;;  %v2197_v63 = vrot.slane %v1685_v43, 1 }
  0xd3   : > { %3053 = vmatprep.mubr.msk.bf16.mxu1 %vm339_vm3, %v3394_v12  ;;  %v1951_v12 = vshrl.u32 %v1685_v43, 16 }
  0xd4   : > { %v2198_v52 = vsel %vm683_vm4, %v3706_v29, %v2197_v63  ;;  %v2200_v5 = vsel %vm683_vm4, %v2197_v63, %v2199_v46  ;;  %v1965_v29 = vshrl.u32 %v3839_v2, 16 }
  0xd5   : > { %v1953_v61 = vor.u32 %v1951_v12, %v1949_v53 }
  0xd6   : > { %v1967_v3 = vor.u32 %v1965_v29, %v1963_v18 }
  0xd7   : > { %v1957_v32 = vsel %vm238_vm2, %v1953_v61, %v1956_v28 }
  0xd9   : > { %3080 = vmatmul.mubr.msk.bf16.gmra.mxu0 %vm339_vm3, %v3694_v15  ;;  %v2202_v15 = vsel %vm683_vm4, %v2199_v46, %v2201_v10 }
  0xda   : > { %3054 = vmatmul.mubr.msk.bf16.gmra.mxu1 %vm339_vm3, %v3423_v49  ;;  %3083 = vmatprep.mubr.msk.bf16.mxu0 %vm339_vm3, %v3709_v4  ;;  %v2701_v49 = vld [vmem:[%s3258_s30 + $0xf0] sm:$0x3] }
  0xdb   : > { %3057 = vmatprep.mubr.msk.bf16.mxu1 %vm339_vm3, %v4287_v33  ;;  %v1882_v11 = vpack.c.bf16 %v2701_v49, %v2701_v49 }
  0xdd   : > { %v1969_v4 = vshll.u32 %v1882_v11, 16  ;;  %v2203_v51 = vrot.slane %v1882_v11, 1 }
  0xdf   : > { %v1971_v54 = vrot.slane %v1969_v4, 1  ;;  %v2204_v24 = vsel %vm683_vm4, %v2201_v10, %v2203_v51 }
  0xe1   : > { %v2865_v39 = vpop.f32.mrf.mxu0  ;;  %3084 = vmatmul.mubr.msk.bf16.gmra.mxu0 %vm339_vm3, %v3713_v42  ;;  %v1972_v38 = vsel %vm238_vm2, %v1967_v3, %v1971_v54 }
  0xe2   : > { %v3881_v50 = vpop.f32.mrf.mxu1  ;;  %3058 = vmatmul.mubr.msk.bf16.gmra.mxu1 %vm339_vm3, %v4289_v35  ;;  %3087 = vmatprep.mubr.msk.bf16.mxu0 %vm339_vm3, %v2198_v52 }
  0xe3   : > { %v417_v23 = vpop.f32.mrf.mxu0  ;;  %3061 = vmatprep.mubr.msk.bf16.mxu1 %vm339_vm3, %v1950_v56 }
  0xe4   : > { %v3888_v48 = vpop.f32.mrf.mxu1 }
  0xe5   : > { %v2866_v27 = vpop.f32.mrf.mxu0 }
  0xe6   : > { %v3890_v0 = vpop.f32.mrf.mxu1 }
  0xe7   : > { %v420_v31 = vpop.f32.mrf.mxu0 }
  0xe8   : > { %v3896_v42 = vpop.f32.mrf.mxu1 }
  0xe9   : > { %v2869_v1 = vpop.f32.mrf.mxu0  ;;  %3088 = vmatmul.mubr.msk.bf16.gmra.mxu0 %vm339_vm3, %v2200_v5 }
  0xea   : > { %v3900_v34 = vpop.f32.mrf.mxu1  ;;  %3062 = vmatmul.mubr.msk.bf16.gmra.mxu1 %vm339_vm3, %v1957_v32  ;;  %3091 = vmatprep.mubr.msk.bf16.mxu0 %vm339_vm3, %v2202_v15 }
  0xeb   : > { %v433_v17 = vpop.f32.mrf.mxu0  ;;  %3065 = vmatprep.mubr.msk.bf16.mxu1 %vm339_vm3, %v1964_v8 }
  0xec   : > { %v3905_v57 = vpop.f32.mrf.mxu1 }
  0xed   : > { %v2870_v6 = vpop.f32.mrf.mxu0 }
  0xee   : > { %v3907_v13 = vpop.f32.mrf.mxu1 }
  0xef   : > { %v436_v37 = vpop.f32.mrf.mxu0 }
  0xf0   : > { %v3911_v14 = vpop.f32.mrf.mxu1 }
  0xf1   : > { %v2873_v22 = vpop.f32.mrf.mxu0  ;;  %3092 = vmatmul.mubr.msk.bf16.gmra.mxu0 %vm339_vm3, %v2204_v24 }
  0xf2   : > { %v3914_v20 = vpop.f32.mrf.mxu1  ;;  %3066 = vmatmul.mubr.msk.bf16.gmra.mxu1 %vm339_vm3, %v1972_v38 }
  0xf3   : > { %v449_v16 = vpop.f32.mrf.mxu0 }
  0xf4   : > { %v3917_v36 = vpop.f32.mrf.mxu1 }
  0xf5   : > { %v2874_v19 = vpop.f32.mrf.mxu0 }
  0xf6   : > { %v3919_v55 = vpop.f32.mrf.mxu1 }
  0xf7   : > { %v452_v21 = vpop.f32.mrf.mxu0 }
  0xf8   : > { %v3921_v26 = vpop.f32.mrf.mxu1 }
  0xf9   : > { %v2917_v43 = vpop.f32.mrf.mxu0 }
  0xfa   : > { %v2891_v44 = vpop.f32.mrf.mxu1 }
  0xfb   : > { %v582_v60 = vadd.f32 %v2891_v44, %v2865_v39  ;;  %v782_v9 = vpop.f32.mrf.mxu0 }
  0xfc   : > { %v573_v25 = vpop.f32.mrf.mxu1 }
  0xfd   : > { %v3923_v47 = vadd.f32 %v2917_v43, %v582_v60  ;;  %v574_v7 = vadd.f32 %v573_v25, %v417_v23  ;;  %v2918_v2 = vpop.f32.mrf.mxu0 }
  0xfe   : > { %v2892_v41 = vpop.f32.mrf.mxu1 }
  0xff   : > { %v3925_v58 = vadd.f32 %v782_v9, %v574_v7  ;;  %v585_v33 = vadd.f32 %v2892_v41, %v2866_v27  ;;  %v785_v63 = vpop.f32.mrf.mxu0 }
 0x100   : > { %v576_v53 = vpop.f32.mrf.mxu1 }
 0x101   : > { %v3927_v45 = vadd.f32 %v2918_v2, %v585_v33  ;;  %v577_v52 = vadd.f32 %v576_v53, %v420_v31  ;;  %v2921_v12 = vpop.f32.mrf.mxu0 }
 0x102   : > { %v2895_v30 = vpop.f32.mrf.mxu1 }
 0x103   : > { %v3929_v56 = vadd.f32 %v785_v63, %v577_v52  ;;  %v598_v40 = vadd.f32 %v2895_v30, %v2869_v1  ;;  %v798_v62 = vpop.f32.mrf.mxu0 }
 0x104   : > { %v589_v49 = vpop.f32.mrf.mxu1 }
 0x105   : > { %v3931_v39 = vadd.f32 %v2921_v12, %v598_v40  ;;  %v590_v35 = vadd.f32 %v589_v49, %v433_v17  ;;  %v2922_v28 = vpop.f32.mrf.mxu0 }
 0x106   : > { %v2896_v46 = vpop.f32.mrf.mxu1 }
 0x107   : > { %v3933_v23 = vadd.f32 %v798_v62, %v590_v35  ;;  %v601_v61 = vadd.f32 %v2896_v46, %v2870_v6  ;;  %v801_v10 = vpop.f32.mrf.mxu0 }
 0x108   : > { %v592_v11 = vpop.f32.mrf.mxu1 }
 0x109   : > { %v3935_v59 = vadd.f32 %v2922_v28, %v601_v61  ;;  %v593_v18 = vadd.f32 %v592_v11, %v436_v37  ;;  %v2925_v27 = vpop.f32.mrf.mxu0 }
 0x10a   : > { %v2899_v5 = vpop.f32.mrf.mxu1 }
 0x10b   : > { %v3937_v31 = vadd.f32 %v801_v10, %v593_v18  ;;  %v614_v32 = vadd.f32 %v2899_v5, %v2873_v22  ;;  %v814_v15 = vpop.f32.mrf.mxu0 }
 0x10c   : > { %v605_v29 = vpop.f32.mrf.mxu1 }
 0x10d   : > { %v3939_v4 = vadd.f32 %v2925_v27, %v614_v32  ;;  %v606_v8 = vadd.f32 %v605_v29, %v449_v16  ;;  %v2926_v1 = vpop.f32.mrf.mxu0 }
 0x10e   : > { %v2900_v51 = vpop.f32.mrf.mxu1 }
 0x10f   : > { %v3941_v17 = vadd.f32 %v814_v15, %v606_v8  ;;  %v617_v3 = vadd.f32 %v2900_v51, %v2874_v19  ;;  %v817_v54 = vpop.f32.mrf.mxu0 }
 0x110   : > { %v608_v6 = vpop.f32.mrf.mxu1 }
 0x111   : > { %v3943_v24 = vadd.f32 %v2926_v1, %v617_v3  ;;  %v609_v37 = vadd.f32 %v608_v6, %v452_v21  ;;  %v2929_v38 = vpop.f32.mrf.mxu0 }
 0x112   : > { %v2903_v43 = vpop.f32.mrf.mxu1 }
 0x113   : > { %v3945_v44 = vadd.f32 %v817_v54, %v609_v37  ;;  %v630_v22 = vadd.f32 %v2903_v43, %v3881_v50  ;;  %v830_v60 = vpop.f32.mrf.mxu0 }
 0x114   : > { %v621_v9 = vpop.f32.mrf.mxu1 }
 0x115   : > { %v3948_v25 = vadd.f32 %v2929_v38, %v630_v22  ;;  %v622_v16 = vadd.f32 %v621_v9, %v3888_v48  ;;  %v2930_v7 = vpop.f32.mrf.mxu0 }
 0x116   : > { %v2904_v2 = vpop.f32.mrf.mxu1 }
 0x117   : > { %v3951_v19 = vadd.f32 %v830_v60, %v622_v16  ;;  %v633_v41 = vadd.f32 %v2904_v2, %v3890_v0  ;;  %v833_v33 = vpop.f32.mrf.mxu0 }
 0x118   : > { %v624_v21 = vpop.f32.mrf.mxu1 }
 0x119   : > { %v3954_v63 = vadd.f32 %v2930_v7, %v633_v41  ;;  %v625_v53 = vadd.f32 %v624_v21, %v3896_v42  ;;  %v2933_v52 = vpop.f32.mrf.mxu0 }
 0x11a   : > { %v2907_v50 = vpop.f32.mrf.mxu1 }
 0x11b   : > { %v3957_v12 = vadd.f32 %v833_v33, %v625_v53  ;;  %v646_v30 = vadd.f32 %v2907_v50, %v3900_v34  ;;  %v846_v40 = vpop.f32.mrf.mxu0 }
 0x11c   : > { %v637_v48 = vpop.f32.mrf.mxu1 }
 0x11d   : > { %v3960_v62 = vadd.f32 %v2933_v52, %v646_v30  ;;  %v638_v49 = vadd.f32 %v637_v48, %v3905_v57  ;;  %v2934_v35 = vpop.f32.mrf.mxu0 }
 0x11e   : > { %v2908_v0 = vpop.f32.mrf.mxu1 }
 0x11f   : > { %v3963_v28 = vadd.f32 %v846_v40, %v638_v49  ;;  %v649_v46 = vadd.f32 %v2908_v0, %v3907_v13  ;;  %v849_v61 = vpop.f32.mrf.mxu0 }
 0x120   : > { %v640_v42 = vpop.f32.mrf.mxu1 }
 0x121   : > { %v3966_v10 = vadd.f32 %v2934_v35, %v649_v46  ;;  %v641_v11 = vadd.f32 %v640_v42, %v3911_v14  ;;  %v2937_v18 = vpop.f32.mrf.mxu0 }
 0x122   : > { %v2911_v34 = vpop.f32.mrf.mxu1 }
 0x123   : > { %v3969_v27 = vadd.f32 %v849_v61, %v641_v11  ;;  %v662_v5 = vadd.f32 %v2911_v34, %v3914_v20  ;;  %v862_v32 = vpop.f32.mrf.mxu0 }
 0x124   : > { %v653_v57 = vpop.f32.mrf.mxu1 }
 0x125   : > { %v3972_v15 = vadd.f32 %v2937_v18, %v662_v5  ;;  %v654_v29 = vadd.f32 %v653_v57, %v3917_v36  ;;  %v2938_v8 = vpop.f32.mrf.mxu0 }
 0x126   : > { %v2912_v13 = vpop.f32.mrf.mxu1 }
 0x127   : > { %v3975_v1 = vadd.f32 %v862_v32, %v654_v29  ;;  %v665_v51 = vadd.f32 %v2912_v13, %v3919_v55  ;;  %v865_v3 = vpop.f32.mrf.mxu0 }
 0x128   : > { %v656_v14 = vpop.f32.mrf.mxu1 }
 0x129   : > { %v3978_v54 = vadd.f32 %v2938_v8, %v665_v51  ;;  %v657_v6 = vadd.f32 %v656_v14, %v3921_v26  ;;  %v2969_v37 = vpop.f32.mrf.mxu0 }
 0x12a   : > { %v2943_v20 = vpop.f32.mrf.mxu1 }
 0x12b   : > { %v3981_v38 = vadd.f32 %v865_v3, %v657_v6  ;;  %v1112_v43 = vadd.f32 %v2943_v20, %v3923_v47  ;;  %v1298_v22 = vpop.f32.mrf.mxu0 }
 0x12c   : > { %v1015_v36 = vpop.f32.mrf.mxu1 }
 0x12d   : > { %v3984_v60 = vadd.f32 %v2969_v37, %v1112_v43  ;;  %v1110_v9 = vadd.f32 %v1015_v36, %v3925_v58  ;;  %v2970_v16 = vpop.f32.mrf.mxu0 }
 0x12e   : > { %v2944_v55 = vpop.f32.mrf.mxu1 }
 0x12f   : > { %v3987_v7 = vadd.f32 %v1298_v22, %v1110_v9  ;;  %v1113_v2 = vadd.f32 %v2944_v55, %v3927_v45  ;;  %v1301_v41 = vpop.f32.mrf.mxu0 }
 0x130   : > { %v1018_v26 = vpop.f32.mrf.mxu1 }
 0x131   : > { %v3990_v33 = vadd.f32 %v2970_v16, %v1113_v2  ;;  %v1111_v21 = vadd.f32 %v1018_v26, %v3929_v56  ;;  %v2973_v53 = vpop.f32.mrf.mxu0 }
 0x132   : > { %v2947_v47 = vpop.f32.mrf.mxu1 }
 0x133   : > { %v3993_v52 = vadd.f32 %v1301_v41, %v1111_v21  ;;  %v1116_v50 = vadd.f32 %v2947_v47, %v3931_v39  ;;  %v1314_v30 = vpop.f32.mrf.mxu0 }
 0x134   : > { %v1031_v58 = vpop.f32.mrf.mxu1 }
 0x135   : > { %v3996_v40 = vadd.f32 %v2973_v53, %v1116_v50  ;;  %v1114_v48 = vadd.f32 %v1031_v58, %v3933_v23  ;;  %v2974_v49 = vpop.f32.mrf.mxu0 }
 0x136   : > { %v2948_v45 = vpop.f32.mrf.mxu1 }
 0x137   : > { %v3999_v35 = vadd.f32 %v1314_v30, %v1114_v48  ;;  %v1117_v0 = vadd.f32 %v2948_v45, %v3935_v59  ;;  %v1317_v46 = vpop.f32.mrf.mxu0 }
 0x138   : > { %v1034_v56 = vpop.f32.mrf.mxu1 }
 0x139   : > { %v4002_v61 = vadd.f32 %v2974_v49, %v1117_v0  ;;  %v1115_v42 = vadd.f32 %v1034_v56, %v3937_v31  ;;  %v2977_v11 = vpop.f32.mrf.mxu0 }
 0x13a   : > { %v2951_v39 = vpop.f32.mrf.mxu1 }
 0x13b   : > { %v4005_v18 = vadd.f32 %v1317_v46, %v1115_v42  ;;  %v1120_v34 = vadd.f32 %v2951_v39, %v3939_v4  ;;  %v1330_v5 = vpop.f32.mrf.mxu0 }
 0x13c   : > { %v1047_v23 = vpop.f32.mrf.mxu1 }
 0x13d   : > { %v4008_v32 = vadd.f32 %v2977_v11, %v1120_v34  ;;  %v1118_v57 = vadd.f32 %v1047_v23, %v3941_v17  ;;  %v2978_v29 = vpop.f32.mrf.mxu0 }
 0x13e   : > { %v2952_v59 = vpop.f32.mrf.mxu1 }
 0x13f   : > { %v4011_v8 = vadd.f32 %v1330_v5, %v1118_v57  ;;  %v1121_v13 = vadd.f32 %v2952_v59, %v3943_v24  ;;  %v1333_v51 = vpop.f32.mrf.mxu0 }
 0x140   : > { %v1050_v31 = vpop.f32.mrf.mxu1 }
 0x141   : > { %v4014_v3 = vadd.f32 %v2978_v29, %v1121_v13  ;;  %v1119_v14 = vadd.f32 %v1050_v31, %v3945_v44  ;;  %v2981_v6 = vpop.f32.mrf.mxu0 }
 0x142   : > { %v2955_v4 = vpop.f32.mrf.mxu1 }
 0x143   : > { %v4017_v37 = vadd.f32 %v1333_v51, %v1119_v14  ;;  %v1124_v20 = vadd.f32 %v2955_v4, %v3948_v25  ;;  %v1346_v43 = vpop.f32.mrf.mxu0 }
 0x144   : > { %v1063_v17 = vpop.f32.mrf.mxu1 }
 0x145   : > { %v4020_v22 = vadd.f32 %v2981_v6, %v1124_v20  ;;  %v1122_v36 = vadd.f32 %v1063_v17, %v3951_v19  ;;  %v2982_v9 = vpop.f32.mrf.mxu0 }
 0x146   : > { %v2956_v24 = vpop.f32.mrf.mxu1 }
 0x147   : > { %v4023_v16 = vadd.f32 %v1346_v43, %v1122_v36  ;;  %v1125_v55 = vadd.f32 %v2956_v24, %v3954_v63  ;;  %v1349_v2 = vpop.f32.mrf.mxu0 }
 0x148   : > { %v1066_v44 = vpop.f32.mrf.mxu1 }
 0x149   : > { %v4026_v41 = vadd.f32 %v2982_v9, %v1125_v55  ;;  %v1123_v26 = vadd.f32 %v1066_v44, %v3957_v12  ;;  %v2985_v21 = vpop.f32.mrf.mxu0 }
 0x14a   : > { %v2959_v25 = vpop.f32.mrf.mxu1 }
 0x14b   : > { %v4029_v53 = vadd.f32 %v1349_v2, %v1123_v26  ;;  %v1128_v47 = vadd.f32 %v2959_v25, %v3960_v62  ;;  %v1362_v50 = vpop.f32.mrf.mxu0 }
 0x14c   : > { %v1079_v19 = vpop.f32.mrf.mxu1 }
 0x14d   : > { %v4032_v30 = vadd.f32 %v2985_v21, %v1128_v47  ;;  %v1126_v58 = vadd.f32 %v1079_v19, %v3963_v28  ;;  %v2986_v48 = vpop.f32.mrf.mxu0 }
 0x14e   : > { %v2960_v63 = vpop.f32.mrf.mxu1 }
 0x14f   : > { %v4035_v49 = vadd.f32 %v1362_v50, %v1126_v58  ;;  %v1129_v45 = vadd.f32 %v2960_v63, %v3966_v10  ;;  %v1365_v0 = vpop.f32.mrf.mxu0 }
 0x150   : > { %v1082_v12 = vpop.f32.mrf.mxu1 }
 0x151   : > { %v4038_v46 = vadd.f32 %v2986_v48, %v1129_v45  ;;  %v1127_v56 = vadd.f32 %v1082_v12, %v3969_v27  ;;  %v2989_v42 = vpop.f32.mrf.mxu0 }
 0x152   : > { %v2963_v62 = vpop.f32.mrf.mxu1 }
 0x153   : > { %4290 = vst [vmem:[#allocation2_spill] sm:$0xff] %v4038_v46  ;;  %v4041_v11 = vadd.f32 %v1365_v0, %v1127_v56  ;;  %v1132_v39 = vadd.f32 %v2963_v62, %v3972_v15  ;;  %v1378_v34 = vpop.f32.mrf.mxu0 }
 0x154   : > { %v1095_v28 = vpop.f32.mrf.mxu1 }
 0x155   : > { %4291 = vst [vmem:[#allocation4_spill] sm:$0xff] %v4041_v11  ;;  %v4044_v5 = vadd.f32 %v2989_v42, %v1132_v39  ;;  %v1130_v23 = vadd.f32 %v1095_v28, %v3975_v1  ;;  %v2990_v57 = vpop.f32.mrf.mxu0 }
 0x156   : > { %v2964_v10 = vpop.f32.mrf.mxu1 }
 0x157   : > { %4292 = vst [vmem:[#allocation3_spill] sm:$0xff] %v4044_v5  ;;  %v4047_v29 = vadd.f32 %v1378_v34, %v1130_v23  ;;  %v1133_v59 = vadd.f32 %v2964_v10, %v3978_v54  ;;  %v1381_v13 = vpop.f32.mrf.mxu0 }
 0x158   : > { %v1098_v27 = vpop.f32.mrf.mxu1 }
 0x159   : > { %4293 = vst [vmem:[#allocation5_spill] sm:$0xff] %v4047_v29  ;;  %v4050_v51 = vadd.f32 %v2990_v57, %v1133_v59  ;;  %v1131_v31 = vadd.f32 %v1098_v27, %v3981_v38  ;;  %v3021_v14 = vpop.f32.mrf.mxu0 }
 0x15a   : > { %v2995_v15 = vpop.f32.mrf.mxu1 }
 0x15b   : > { %4294 = vst [vmem:[#allocation6_spill] sm:$0xff] %v4050_v51  ;;  %v4053_v6 = vadd.f32 %v1381_v13, %v1131_v31  ;;  %v1763_v4 = vpop.f32.mrf.mxu0  ;;  %v1627_v11 = vadd.f32 %v2995_v15, %v3984_v60 }
 0x15c   : > { %v1530_v20 = vpop.f32.mrf.mxu1 }
 0x15d   : > { %4295 = vst [vmem:[#allocation7_spill] sm:$0xff] %v4053_v6  ;;  %v3022_v43 = vpop.f32.mrf.mxu0 }
 0x15e   : > { %v2996_v1 = vpop.f32.mrf.mxu1 }
 0x15f   : > { %v4055_v17 = vpop.f32.mrf.mxu0 }
 0x160   : > { %v1533_v36 = vpop.f32.mrf.mxu1 }
 0x161   : > { %v4057_v9 = vpop.f32.mrf.mxu0  ;;  %v1626_v60 = vadd.f32 %v1533_v36, %v3993_v52 }
 0x162   : > { %v2999_v54 = vpop.f32.mrf.mxu1 }
 0x163   : > { %v4059_v24 = vpop.f32.mrf.mxu0  ;;  %v1859_v52 = vadd.f32 %v4055_v17, %v1626_v60 }
 0x164   : > { %v1546_v55 = vpop.f32.mrf.mxu1 }
 0x165   : > { %v4061_v2 = vpop.f32.mrf.mxu0 }
 0x166   : > { %v4063_v38 = vpop.f32.mrf.mxu1 }
 0x167   : > { %v4065_v44 = vpop.f32.mrf.mxu0 }
 0x168   : > { %v4067_v26 = vpop.f32.mrf.mxu1 }
 0x169   : > { %v4069_v21 = vpop.f32.mrf.mxu0 }
 0x16a   : > { %v4071_v25 = vpop.f32.mrf.mxu1 }
 0x16b   : > { %v4073_v47 = vpop.f32.mrf.mxu0 }
 0x16c   : > { %v4075_v50 = vpop.f32.mrf.mxu1 }
 0x16d   : > { %v4077_v19 = vpop.f32.mrf.mxu0 }
 0x16e   : > { %v4079_v58 = vpop.f32.mrf.mxu1 }
 0x16f   : > { %v4081_v48 = vpop.f32.mrf.mxu0 }
 0x170   : > { %v4083_v63 = vpop.f32.mrf.mxu1 }
 0x171   : > { %v4085_v45 = vpop.f32.mrf.mxu0 }
 0x172   : > { %v4087_v0 = vpop.f32.mrf.mxu1 }
 0x173   : > { %v4089_v12 = vpop.f32.mrf.mxu0 }
 0x174   : > { %v4091_v56 = vpop.f32.mrf.mxu1 }
 0x175   : > { %v4093_v42 = vpop.f32.mrf.mxu0 }
 0x176   : > { %v4095_v62 = vpop.f32.mrf.mxu1 }
 0x177   : > { %v4097_v39 = vpop.f32.mrf.mxu0 }
 0x178   : > { %v4099_v34 = vpop.f32.mrf.mxu1 }
 0x179   : > { %v4101_v28 = vpop.f32.mrf.mxu0 }
 0x17a   : > { %v4103_v23 = vpop.f32.mrf.mxu1 }
 0x17b   : > { %v4105_v57 = vpop.f32.mrf.mxu0 }
 0x17c   : > { %4296 = vst [vmem:[#allocation8_spill] sm:$0xff] %v4105_v57  ;;  %v4107_v10 = vpop.f32.mrf.mxu1 }
 0x17d   : > { %v4109_v59 = vpop.f32.mrf.mxu0 }
 0x17e   : > { %4297 = vst [vmem:[#allocation9_spill] sm:$0xff] %v4109_v59  ;;  %v4111_v13 = vpop.f32.mrf.mxu1 }
 0x17f   : > { %4298 = vst [vmem:[#allocation10_spill] sm:$0xff] %v4111_v13  ;;  %v4114_v27 = vpop.f32.mrf.mxu0  ;;  %v1628_v13 = vadd.f32 %v2996_v1, %v3990_v33  ;;  %v1629_v1 = vadd.f32 %v1546_v55, %v3999_v35 }
 0x180   : > { %4299 = vst [vmem:[#allocation11_spill] sm:$0xff] %v4114_v27  ;;  %v4116_v31 = vpop.f32.mrf.mxu1  ;;  %v1625_v27 = vadd.f32 %v1530_v20, %v3987_v7  ;;  %v4143_v7 = vld [vmem:[%s4273_s2] ss:$0 sm:$0xff] }
 0x181   : > { %4300 = vst [vmem:[#allocation12_spill] sm:$0xff] %v4116_v31  ;;  %v4118_v6 = vpop.f32.mrf.mxu0 }
 0x182   : > { %4301 = vst [vmem:[#allocation13_spill] sm:$0xff] %v4118_v6  ;;  %v4120_v51 = vpop.f32.mrf.mxu1 }
 0x183   : > { %4302 = vst [vmem:[#allocation14_spill] sm:$0xff] %v4120_v51  ;;  %v4122_v29 = vpop.f32.mrf.mxu0  ;;  %v1860_v51 = vadd.f32 %v3021_v14, %v1627_v11 }
 0x184   : > { %4303 = vst [vmem:[#allocation15_spill] sm:$0xff] %v4122_v29  ;;  %v4124_v5 = vpop.f32.mrf.mxu1 }
 0x185   : > { %4304 = vst [vmem:[#allocation16_spill] sm:$0xff] %v4124_v5  ;;  %v4127_v57 = vpop.f32.mrf.mxu0  ;;  %v1858_v5 = vadd.f32 %v1763_v4, %v1625_v27  ;;  %v1632_v27 = vadd.f32 %v4063_v38, %v4002_v61 }
 0x186   : > { %4305 = vst [vmem:[#allocation17_spill] sm:$0xff] %v4127_v57  ;;  %v4130_v59 = vpop.f32.mrf.mxu1 }
 0x187   : > { %4306 = vst [vmem:[#allocation18_spill] sm:$0xff] %v4130_v59  ;;  %v4133_v31 = vpop.f32.mrf.mxu0  ;;  %v1631_v59 = vadd.f32 %v2999_v54, %v3996_v40 }
 0x188   : > { %4307 = vst [vmem:[#allocation19_spill] sm:$0xff] %v4133_v31  ;;  %v4135_v6 = vpop.f32.mrf.mxu1  ;;  %v1861_v31 = vadd.f32 %v3022_v43, %v1628_v13 }
 0x189   : > { %v3073_v29 = vpop.f32.mrf.mxu0  ;;  %v1864_v54 = vadd.f32 %v4057_v9, %v1631_v59  ;;  %v1630_v9 = vadd.f32 %v4067_v26, %v4005_v18 }
 0x18a   : > { %v3047_v46 = vpop.f32.mrf.mxu1 }
 0x18b   : > { %v2143_v15 = vadd.f32 %v3047_v46, %v1860_v51  ;;  %v2278_v57 = vpop.f32.mrf.mxu0 }
 0x18c   : > { %v2046_v20 = vpop.f32.mrf.mxu1 }
 0x18d   : > { %v2375_v11 = vadd.f32 %v3073_v29, %v2143_v15  ;;  %v2141_v33 = vadd.f32 %v2046_v20, %v1858_v5  ;;  %v3074_v14 = vpop.f32.mrf.mxu0  ;;  %v1865_v15 = vadd.f32 %v4061_v2, %v1632_v27  ;;  %v1635_v20 = vadd.f32 %v4071_v25, %v4008_v32 }
 0x18e   : > { %v3048_v4 = vpop.f32.mrf.mxu1 }
 0x18f   : > { %v2406_v46 = vadd.f32 %v4143_v7, %v2375_v11  ;;  %v2373_v51 = vadd.f32 %v2278_v57, %v2141_v33  ;;  %v2144_v40 = vadd.f32 %v3048_v4, %v1861_v31  ;;  %v2281_v36 = vpop.f32.mrf.mxu0  ;;  %v1862_v57 = vadd.f32 %v4059_v24, %v1629_v1 }
 0x190   : > { %v2049_v35 = vpop.f32.mrf.mxu1  ;;  %v1863_v1 = vadd.f32 %v4065_v44, %v1630_v9  ;;  %v1633_v4 = vadd.f32 %v4075_v50, %v4011_v8  ;;  %v1639_v9 = vadd.f32 %v4087_v0, %v4020_v22 }
 0x191   : > { %v2430_v5 = vmax.f32 %v2406_v46, 0.0  ;;  %v2404_v29 = vadd.f32 %v4143_v7, %v2373_v51  ;;  %v2376_v43 = vadd.f32 %v3074_v14, %v2144_v40  ;;  %v2142_v17 = vadd.f32 %v2049_v35, %v1859_v52  ;;  %v3077_v55 = vpop.f32.mrf.mxu0 }
 0x192   : > { %v3051_v61 = vpop.f32.mrf.mxu1  ;;  %v1868_v40 = vadd.f32 %v4069_v21, %v1635_v20 }
 0x193   : > { %2454 = vst [vmem:[%s4154_s29 + $0x10] sm:$0xff] %v2430_v5  ;;  %v2428_v38 = vmax.f32 %v2404_v29, 0.0  ;;  %v2407_v59 = vadd.f32 %v4143_v7, %v2376_v43  ;;  %v2374_v13 = vadd.f32 %v2281_v36, %v2142_v17  ;;  %v2147_v31 = vadd.f32 %v3051_v61, %v1864_v54  ;;  %v2294_v60 = vpop.f32.mrf.mxu0 }
 0x194   : > { %v2062_v11 = vpop.f32.mrf.mxu1  ;;  %v1636_v36 = vadd.f32 %v4079_v58, %v4014_v3  ;;  %v1866_v5 = vadd.f32 %v4073_v47, %v1633_v4  ;;  %v1634_v29 = vadd.f32 %v4083_v63, %v4017_v37 }
 0x195   : > { %2452 = vst [vmem:[%s4154_s29] sm:$0xff] %v2428_v38  ;;  %v2431_v24 = vmax.f32 %v2407_v59, 0.0  ;;  %v2405_v33 = vadd.f32 %v4143_v7, %v2374_v13  ;;  %v2379_v18 = vadd.f32 %v3077_v55, %v2147_v31  ;;  %v2145_v26 = vadd.f32 %v2062_v11, %v1862_v57  ;;  %v3078_v14 = vpop.f32.mrf.mxu0 }
 0x196   : > { %v3052_v52 = vpop.f32.mrf.mxu1  ;;  %v1869_v57 = vadd.f32 %v4077_v19, %v1636_v36  ;;  %v1867_v13 = vadd.f32 %v4081_v48, %v1634_v29  ;;  %v1637_v31 = vadd.f32 %v4091_v56, %v4023_v16  ;;  %v1872_v11 = vadd.f32 %v4085_v45, %v1639_v9 }
 0x197   : > { %2455 = vst [vmem:[%s4154_s29 + $0x18] sm:$0xff] %v2431_v24  ;;  %v2429_v2 = vmax.f32 %v2405_v33, 0.0  ;;  %v2410_v46 = vadd.f32 %v4143_v7, %v2379_v18  ;;  %v2377_v32 = vadd.f32 %v2294_v60, %v2145_v26  ;;  %v2148_v25 = vadd.f32 %v3052_v52, %v1865_v15  ;;  %v2297_v51 = vpop.f32.mrf.mxu0 }
 0x198   : > { %v2065_v54 = vpop.f32.mrf.mxu1  ;;  %v1640_v24 = vadd.f32 %v4095_v62, %v4026_v41 }
 0x199   : > { %2453 = vst [vmem:[%s4154_s29 + $0x8] sm:$0xff] %v2429_v2  ;;  %v2434_v44 = vmax.f32 %v2410_v46, 0.0  ;;  %v2408_v27 = vadd.f32 %v4143_v7, %v2377_v32  ;;  %v2380_v8 = vadd.f32 %v3078_v14, %v2148_v25  ;;  %v2146_v50 = vadd.f32 %v2065_v54, %v1863_v1  ;;  %v3081_v35 = vpop.f32.mrf.mxu0 }
 0x19a   : > { %v3055_v43 = vpop.f32.mrf.mxu1  ;;  %v1870_v14 = vadd.f32 %v4089_v12, %v1637_v31  ;;  %v1638_v1 = vadd.f32 %v4099_v34, %v4029_v53  ;;  %v1873_v46 = vadd.f32 %v4093_v42, %v1640_v24  ;;  %v1643_v32 = vadd.f32 %v4103_v23, %v4032_v30  ;;  %v4314_v31 = vld [vmem:[#allocation3_spill] sm:$0xff] }
 0x19b   : > { %2458 = vst [vmem:[%s4154_s29 + $0x30] sm:$0xff] %v2434_v44  ;;  %v2432_v21 = vmax.f32 %v2408_v27, 0.0  ;;  %v2411_v17 = vadd.f32 %v4143_v7, %v2380_v8  ;;  %v2378_v3 = vadd.f32 %v2297_v51, %v2146_v50  ;;  %v2151_v58 = vadd.f32 %v3055_v43, %v1868_v40  ;;  %v2310_v55 = vpop.f32.mrf.mxu0 }
 0x19c   : > { %v2078_v61 = vpop.f32.mrf.mxu1  ;;  %v1871_v36 = vadd.f32 %v4097_v39, %v1638_v1  ;;  %v1641_v54 = vadd.f32 %v4107_v10, %v4035_v49  ;;  %v1876_v50 = vadd.f32 %v4101_v28, %v1643_v32 }
 0x19d   : > { %2456 = vst [vmem:[%s4154_s29 + $0x20] sm:$0xff] %v2432_v21  ;;  %v2435_v47 = vmax.f32 %v2411_v17, 0.0  ;;  %v2409_v38 = vadd.f32 %v4143_v7, %v2378_v3  ;;  %v2383_v37 = vadd.f32 %v3081_v35, %v2151_v58  ;;  %v2149_v63 = vadd.f32 %v2078_v61, %v1866_v5  ;;  %v3082_v59 = vpop.f32.mrf.mxu0  ;;  %v4308_v35 = vld [vmem:[#allocation2_spill] sm:$0xff]  ;;  %v4310_v3 = vld [vmem:[#allocation8_spill] sm:$0xff] }
 0x19e   : > { %v3056_v60 = vpop.f32.mrf.mxu1  ;;  %v4309_v5 = vld [vmem:[#allocation10_spill] sm:$0xff]  ;;  %v1874_v58 = vadd.f32 %v4310_v3, %v1641_v54 }
 0x19f   : > { %2459 = vst [vmem:[%s4154_s29 + $0x38] sm:$0xff] %v2435_v47  ;;  %v2433_v19 = vmax.f32 %v2409_v38, 0.0  ;;  %v2414_v15 = vadd.f32 %v4143_v7, %v2383_v37  ;;  %v2381_v22 = vadd.f32 %v2310_v55, %v2149_v63  ;;  %v2152_v0 = vadd.f32 %v3056_v60, %v1869_v57  ;;  %v2313_v20 = vpop.f32.mrf.mxu0  ;;  %v4311_v55 = vld [vmem:[#allocation4_spill] sm:$0xff]  ;;  %v4315_v60 = vld [vmem:[#allocation14_spill] sm:$0xff] }
 0x1a0   : > { %v2081_v33 = vpop.f32.mrf.mxu1  ;;  %v1644_v29 = vadd.f32 %v4309_v5, %v4308_v35  ;;  %v4312_v57 = vld [vmem:[#allocation12_spill] sm:$0xff]  ;;  %v4324_v5 = vld [vmem:[#allocation17_spill] sm:$0xff] }
 0x1a1   : > { %2457 = vst [vmem:[%s4154_s29 + $0x28] sm:$0xff] %v2433_v19  ;;  %v2438_v48 = vmax.f32 %v2414_v15, 0.0  ;;  %v2412_v18 = vadd.f32 %v4143_v7, %v2381_v22  ;;  %v2384_v16 = vadd.f32 %v3082_v59, %v2152_v0  ;;  %v2150_v56 = vadd.f32 %v2081_v33, %v1867_v13  ;;  %v3085_v26 = vpop.f32.mrf.mxu0  ;;  %v4313_v59 = vld [vmem:[#allocation9_spill] sm:$0xff]  ;;  %v4316_v33 = vld [vmem:[#allocation11_spill] sm:$0xff] }
 0x1a2   : > { %v3059_v4 = vpop.f32.mrf.mxu1  ;;  %v1642_v9 = vadd.f32 %v4312_v57, %v4311_v55  ;;  %v1877_v13 = vadd.f32 %v4313_v59, %v1644_v29  ;;  %v1647_v19 = vadd.f32 %v4315_v60, %v4314_v31 }
 0x1a3   : > { %2462 = vst [vmem:[%s4154_s29 + $0x50] sm:$0xff] %v2438_v48  ;;  %v2436_v45 = vmax.f32 %v2412_v18, 0.0  ;;  %v2415_v52 = vadd.f32 %v4143_v7, %v2384_v16  ;;  %v2382_v41 = vadd.f32 %v2313_v20, %v2150_v56  ;;  %v2155_v62 = vadd.f32 %v3059_v4, %v1872_v11  ;;  %v2326_v2 = vpop.f32.mrf.mxu0  ;;  %v4317_v18 = vld [vmem:[#allocation5_spill] sm:$0xff]  ;;  %v4318_v16 = vld [vmem:[#allocation16_spill] sm:$0xff] }
 0x1a4   : > { %v2094_v25 = vpop.f32.mrf.mxu1  ;;  %v1875_v48 = vadd.f32 %v4316_v33, %v1642_v9  ;;  %v1645_v56 = vadd.f32 %v4318_v16, %v4317_v18 }
 0x1a5   : > { %2460 = vst [vmem:[%s4154_s29 + $0x40] sm:$0xff] %v2436_v45  ;;  %v2439_v12 = vmax.f32 %v2415_v52, 0.0  ;;  %v2413_v51 = vadd.f32 %v4143_v7, %v2382_v41  ;;  %v2387_v53 = vadd.f32 %v3085_v26, %v2155_v62  ;;  %v2153_v34 = vadd.f32 %v2094_v25, %v1870_v14  ;;  %v3086_v40 = vpop.f32.mrf.mxu0  ;;  %v4319_v41 = vld [vmem:[#allocation13_spill] sm:$0xff] }
 0x1a6   : > { %v3060_v44 = vpop.f32.mrf.mxu1  ;;  %v1880_v62 = vadd.f32 %v4319_v41, %v1647_v19 }
 0x1a7   : > { %2463 = vst [vmem:[%s4154_s29 + $0x58] sm:$0xff] %v2439_v12  ;;  %v2437_v42 = vmax.f32 %v2413_v51, 0.0  ;;  %v2418_v27 = vadd.f32 %v4143_v7, %v2387_v53  ;;  %v2385_v30 = vadd.f32 %v2326_v2, %v2153_v34  ;;  %v2156_v23 = vadd.f32 %v3060_v44, %v1873_v46  ;;  %v2329_v8 = vpop.f32.mrf.mxu0  ;;  %v4320_v2 = vld [vmem:[#allocation6_spill] sm:$0xff]  ;;  %v4323_v44 = vld [vmem:[#allocation7_spill] sm:$0xff] }
 0x1a8   : > { %v2097_v43 = vpop.f32.mrf.mxu1  ;;  %v4321_v46 = vld [vmem:[#allocation18_spill] sm:$0xff] }
 0x1a9   : > { %2461 = vst [vmem:[%s4154_s29 + $0x48] sm:$0xff] %v2437_v42  ;;  %v2442_v39 = vmax.f32 %v2418_v27, 0.0  ;;  %v2416_v21 = vadd.f32 %v4143_v7, %v2385_v30  ;;  %v2388_v49 = vadd.f32 %v3086_v40, %v2156_v23  ;;  %v2154_v10 = vadd.f32 %v2097_v43, %v1871_v36  ;;  %v3089_v17 = vpop.f32.mrf.mxu0  ;;  %v4322_v36 = vld [vmem:[#allocation15_spill] sm:$0xff] }
 0x1aa   : > { %v3063_v61 = vpop.f32.mrf.mxu1  ;;  %v1648_v32 = vadd.f32 %v4321_v46, %v4320_v2  ;;  %v1878_v54 = vadd.f32 %v4322_v36, %v1645_v56  ;;  %v1646_v42 = vadd.f32 %v4135_v6, %v4323_v44  ;;  %v4325_v6 = vld [vmem:[#allocation19_spill] sm:$0xff] }
 0x1ab   : > { %2466 = vst [vmem:[%s4154_s29 + $0x70] sm:$0xff] %v2442_v39  ;;  %v2440_v28 = vmax.f32 %v2416_v21, 0.0  ;;  %v2419_v47 = vadd.f32 %v4143_v7, %v2388_v49  ;;  %v2386_v38 = vadd.f32 %v2329_v8, %v2154_v10  ;;  %v2159_v37 = vadd.f32 %v3063_v61, %v1876_v50  ;;  %v2342_v63 = vpop.f32.mrf.mxu0 }
 0x1ac   : > { %v2110_v15 = vpop.f32.mrf.mxu1  ;;  %v1881_v29 = vadd.f32 %v4324_v5, %v1648_v32 }
 0x1ad   : > { %2464 = vst [vmem:[%s4154_s29 + $0x60] sm:$0xff] %v2440_v28  ;;  %v2443_v22 = vmax.f32 %v2419_v47, 0.0  ;;  %v2417_v0 = vadd.f32 %v4143_v7, %v2386_v38  ;;  %v2391_v20 = vadd.f32 %v3089_v17, %v2159_v37  ;;  %v2157_v11 = vadd.f32 %v2110_v15, %v1874_v58  ;;  %v3090_v24 = vpop.f32.mrf.mxu0 }
 0x1ae   : > { %v3064_v26 = vpop.f32.mrf.mxu1  ;;  %v1879_v17 = vadd.f32 %v4325_v6, %v1646_v42 }
 0x1af   : > { %2467 = vst [vmem:[%s4154_s29 + $0x78] sm:$0xff] %v2443_v22  ;;  %v2441_v14 = vmax.f32 %v2417_v0, 0.0  ;;  %v2422_v1 = vadd.f32 %v4143_v7, %v2391_v20  ;;  %v2389_v4 = vadd.f32 %v2342_v63, %v2157_v11  ;;  %v2160_v45 = vadd.f32 %v3064_v26, %v1877_v13  ;;  %v2345_v52 = vpop.f32.mrf.mxu0 }
 0x1b0   : > { %v2113_v25 = vpop.f32.mrf.mxu1 }
 0x1b1   : > { %2465 = vst [vmem:[%s4154_s29 + $0x68] sm:$0xff] %v2441_v14  ;;  %v2446_v12 = vmax.f32 %v2422_v1, 0.0  ;;  %v2420_v51 = vadd.f32 %v4143_v7, %v2389_v4  ;;  %v2392_v53 = vadd.f32 %v3090_v24, %v2160_v45  ;;  %v2158_v34 = vadd.f32 %v2113_v25, %v1875_v48  ;;  %v3093_v40 = vpop.f32.mrf.mxu0 }
 0x1b2   : > { %v3067_v27 = vpop.f32.mrf.mxu1 }
 0x1b3   : > { %2470 = vst [vmem:[%s4154_s29 + $0x90] sm:$0xff] %v2446_v12  ;;  %v2444_v30 = vmax.f32 %v2420_v51, 0.0  ;;  %v2423_v23 = vadd.f32 %v4143_v7, %v2392_v53  ;;  %v2390_v8 = vadd.f32 %v2345_v52, %v2158_v34  ;;  %v2163_v50 = vadd.f32 %v3067_v27, %v1880_v62  ;;  %v2358_v35 = vpop.f32.mrf.mxu0 }
 0x1b4   : > { %v2126_v43 = vpop.f32.mrf.mxu1 }
 0x1b5   : > { %2468 = vst [vmem:[%s4154_s29 + $0x80] sm:$0xff] %v2444_v30  ;;  %v2447_v39 = vmax.f32 %v2423_v23, 0.0  ;;  %v2421_v21 = vadd.f32 %v4143_v7, %v2390_v8  ;;  %v2395_v49 = vadd.f32 %v3093_v40, %v2163_v50  ;;  %v2161_v10 = vadd.f32 %v2126_v43, %v1878_v54  ;;  %v3094_v58 = vpop.f32.mrf.mxu0 }
 0x1b6   : > { %v3068_v3 = vpop.f32.mrf.mxu1 }
 0x1b7   : > { %2471 = vst [vmem:[%s4154_s29 + $0x98] sm:$0xff] %v2447_v39  ;;  %v2445_v55 = vmax.f32 %v2421_v21, 0.0  ;;  %v2426_v57 = vadd.f32 %v4143_v7, %v2395_v49  ;;  %v2393_v9 = vadd.f32 %v2358_v35, %v2161_v10  ;;  %v2164_v61 = vadd.f32 %v3068_v3, %v1881_v29  ;;  %v2361_v59 = vpop.f32.mrf.mxu0 }
 0x1b8   : > { %v2129_v28 = vpop.f32.mrf.mxu1 }
 0x1b9   : > { %2469 = vst [vmem:[%s4154_s29 + $0x88] sm:$0xff] %v2445_v55  ;;  %v2450_v47 = vmax.f32 %v2426_v57, 0.0  ;;  %v2424_v38 = vadd.f32 %v4143_v7, %v2393_v9  ;;  %v2396_v37 = vadd.f32 %v3094_v58, %v2164_v61  ;;  %v2162_v63 = vadd.f32 %v2129_v28, %v1879_v17 }
 0x1bb   : > { %2474 = vst [vmem:[%s4154_s29 + $0xb0] sm:$0xff] %v2450_v47  ;;  %v2448_v13 = vmax.f32 %v2424_v38, 0.0  ;;  %v2427_v31 = vadd.f32 %v4143_v7, %v2396_v37  ;;  %v2394_v60 = vadd.f32 %v2361_v59, %v2162_v63 }
 0x1bd   : > { %2472 = vst [vmem:[%s4154_s29 + $0xa0] sm:$0xff] %v2448_v13  ;;  %v2451_v19 = vmax.f32 %v2427_v31, 0.0  ;;  %v2425_v15 = vadd.f32 %v4143_v7, %v2394_v60 }
 0x1bf   : > { %2475 = vst [vmem:[%s4154_s29 + $0xb8] sm:$0xff] %v2451_v19  ;;  %v2449_v22 = vmax.f32 %v2425_v15, 0.0 }
 0x1c1   : > { %2473 = vst [vmem:[%s4154_s29 + $0xa8] sm:$0xff] %v2449_v22 }
 0x1c2 PF: > { %s13_s16 = sadd.s32 1, %s3178_s16   ;;  %s4326_s12 = smov %s3170_s14 }
 0x1c3   : > { %p10_p7 = scmp.ge.s32.totalorder %s13_s16, 6   ;;  %s4327_s13 = smov %s3174_s15 }
 0x1c4   : > { %s4328_s14 = smov %s4331_s17  ;;  %s4329_s15 = smov %s4335_s18 }
 0x1c5   :  { %12 = sbr.rel (!%p10_p7) target bundleno = 3 (0x3), region = 73 }

// kernel: _lambda_.7
= control target key start
LH: loop header
LB: loop body
LE: loop exit
PB: predicated region body
PF: predicated region fallthrough
CT: control target
= control target key end

     0   :  { %s3159_s12 = smov 0   ;;  %s3161_s13 = smov 0   ;;  %s3799_s0 = inlined_call_operand.vmem [shape: f32[2,176,128], index: 0, kind: input, shape index: {}]   ;;  %s3800_s1 = inlined_call_operand.vmem [shape: bf16[9,128,128], index: 1, kind: input, shape index: {}]   ;;  %s3801_s2 = inlined_call_operand.vmem [shape: f32[1,128], index: 2, kind: input, shape index: {}]   ;;  %s3802_s3 = inlined_call_operand.vmem [shape: f32[2,128,128], index: 3, kind: output, shape index: {}]  }
   0x1   :  { %s3163_s14 = smov 0  }
   0x2 LB: > { %s25_s15 = sadd.s32 1, %s3133_s13  ;;  %p2328_p0 = scmp.ge.s32.totalorder %s3137_s14, 1  ;;  %s3137_s14 = sphi %s3163_s14, %s13_s14   ;;  %s3133_s13 = sphi %s3161_s13, %s3836_s13   ;;  %s3129_s12 = sphi %s3159_s12, %s3835_s12  }
   0x3   : > { %p27_p1 = scmp.ge.s32.totalorder %s25_s15, 2  ;;  %p151_p2 = scmp.lt.s32.totalorder %s3137_s14, 3 }
   0x5   : > { %s3838_s15 = smov (%p27_p1, %s25_s15), 0  ;;  %p152_p3 = pnand %p2328_p0, %p151_p2 }
   0x7   : > { %155 = sbr.rel (%p152_p3) target bundleno = 388 (0x184), region = 32 }
   0xc   : > { %v3043_v0 = vld [vmem:[%s3800_s1 + $0x78] sm:$0xff]   ;;  %p179_p4 = scmp.lt.s32.totalorder %s3129_s12, 1  ;;  %v3045_v2 = vld [vmem:[%s3800_s1 + $0x70] sm:$0xff]   ;;  %v3047_v4 = vld [vmem:[%s3800_s1 + $0x68] sm:$0xff]   ;;  %vm256_vm0 = vsmask.f32 7424 }
   0xd   : > { %v3044_v1 = vld [vmem:[%s3800_s1 + $0x38] sm:$0xff]   ;;  %2714 = vmatprep.subr.bf16.mxu0 %v3043_v0  ;;  %v3046_v3 = vld [vmem:[%s3800_s1 + $0x30] sm:$0xff]   ;;  %v3048_v5 = vld [vmem:[%s3800_s1 + $0x28] sm:$0xff]   ;;  %vm649_vm1 = vcmask 1046528  }
   0xe   : > { %2746 = vmatprep.subr.bf16.mxu1 %v3044_v1  ;;  %2715 = vmatpush3.bf16.msra.mxu0 %v3043_v0  ;;  %s3840_s12 = smov (!%p179_p4, %s3129_s12), 1  ;;  %v3049_v6 = vld [vmem:[%s3800_s1 + $0x60] sm:$0xff]   ;;  %v3051_v8 = vld [vmem:[%s3800_s1 + $0x58] sm:$0xff]   ;;  %v3053_v10 = vld [vmem:[%s3800_s1 + $0x50] sm:$0xff]  }
   0xf   : > { %2747 = vmatpush3.bf16.msra.mxu1 %v3044_v1  ;;  %2716 = vmatprep.subr.bf16.mxu0 %v3045_v2  ;;  %v3050_v7 = vld [vmem:[%s3800_s1 + $0x20] sm:$0xff]   ;;  %s3018_s5 = smul.u32 176, %s3840_s12  ;;  %v3052_v9 = vld [vmem:[%s3800_s1 + $0x18] sm:$0xff]   ;;  %v3054_v11 = vld [vmem:[%s3800_s1 + $0x10] sm:$0xff]   ;;  %s2569_s30 = sshll.u32 %s3840_s12, 7 }
  0x10   : > { %2748 = vmatprep.subr.bf16.mxu1 %v3046_v3  ;;  %v3055_v23 = vld [vmem:[%s3800_s1 + $0x48] sm:$0xff]   ;;  %v3057_v28 = vld [vmem:[%s3800_s1 + $0x40] sm:$0xff]   ;;  %v3059_v46 = vld [vmem:[%s3800_s1 + $0xb8] sm:$0xff]  }
  0x11   : > { %s3213_s16 = scalar_lea.vmem %s3799_s0, %s3018_s5  ;;  %v3056_v24 = vld [vmem:[%s3800_s1 + $0x8] sm:$0xff]   ;;  %v3058_v36 = vld [vmem:[%s3800_s1] sm:$0xff]   ;;  %v3060_v49 = vld [vmem:[%s3800_s1 + $0xf8] sm:$0xff]   ;;  %s3750_s5 = scalar_lea.vmem %s3802_s3, %s2569_s30 }
  0x12   : > { %2717 = vmatpush3.bf16.msra.mxu0 %v3045_v2  ;;  %v197_v12 = vld [vmem:[%s3213_s16] sm:$0xff]  ;;  %v198_v13 = vld [vmem:[%s3213_s16 + $0x8] sm:$0xff]  ;;  %v199_v14 = vld [vmem:[%s3213_s16 + $0x10] sm:$0xff] }
  0x13   : > { %2749 = vmatpush3.bf16.msra.mxu1 %v3046_v3  ;;  %2718 = vmatprep.subr.bf16.mxu0 %v3047_v4  ;;  %v200_v15 = vld [vmem:[%s3213_s16 + $0x18] sm:$0xff]  ;;  %v3225_v16 = vpack.c.bf16 %v198_v13, %v197_v12  ;;  %v201_v17 = vld [vmem:[%s3213_s16 + $0x20] sm:$0xff]  ;;  %v202_v18 = vld [vmem:[%s3213_s16 + $0x28] sm:$0xff] }
  0x14   : > { %2750 = vmatprep.subr.bf16.mxu1 %v3048_v5  ;;  %v3229_v19 = vpack.c.bf16 %v200_v15, %v199_v14  ;;  %v3231_v20 = vpack.c.bf16 %v202_v18, %v201_v17  ;;  %v203_v30 = vld [vmem:[%s3213_s16 + $0x30] sm:$0xff]  ;;  %v204_v33 = vld [vmem:[%s3213_s16 + $0x38] sm:$0xff]  ;;  %v205_v34 = vld [vmem:[%s3213_s16 + $0x40] sm:$0xff] }
  0x15   : > { %v258_v21 = vshrl.u32 %v3225_v16, 16  ;;  %v260_v22 = vshll.u32 %v3225_v16, 16  ;;  %2762 = vmatprep.mubr.bf16.mxu1 %v3225_v16  ;;  %v206_v35 = vld [vmem:[%s3213_s16 + $0x48] sm:$0xff]  ;;  %v3255_v37 = vpack.c.bf16 %v204_v33, %v203_v30  ;;  %v207_v47 = vld [vmem:[%s3213_s16 + $0x50] sm:$0xff]  ;;  %v208_v48 = vld [vmem:[%s3213_s16 + $0x58] sm:$0xff] }
  0x16   : > { %2719 = vmatpush3.bf16.msra.mxu0 %v3047_v4  ;;  %v265_v25 = vshll.u32 %v3229_v19, 16  ;;  %v273_v27 = vshll.u32 %v3231_v20, 16  ;;  %v269_v32 = vshrl.u32 %v3229_v19, 16  ;;  %v277_v40 = vshrl.u32 %v3231_v20, 16  ;;  %v3061_v53 = vld [vmem:[%s3800_s1 + $0xb0] sm:$0xff]   ;;  %v209_v55 = vld [vmem:[%s3213_s16 + $0x60] sm:$0xff] }
  0x17   : > { %2751 = vmatpush3.bf16.msra.mxu1 %v3048_v5  ;;  %2720 = vmatprep.subr.bf16.mxu0 %v3049_v6  ;;  %v262_v26 = vrot.slane %v260_v22, 1  ;;  %v281_v42 = vshll.u32 %v3255_v37, 16  ;;  %v3260_v43 = vpack.c.bf16 %v206_v35, %v205_v34  ;;  %v3274_v52 = vpack.c.bf16 %v208_v48, %v207_v47  ;;  %v210_v56 = vld [vmem:[%s3213_s16 + $0x68] sm:$0xff]  ;;  %v3062_v58 = vld [vmem:[%s3800_s1 + $0xf0] sm:$0xff]   ;;  %v212_v63 = vld [vmem:[%s3213_s16 + $0x78] sm:$0xff] }
  0x18   : > { %2752 = vmatprep.subr.bf16.mxu1 %v3050_v7  ;;  %v267_v29 = vrot.slane %v265_v25, 1  ;;  %v275_v39 = vrot.slane %v273_v27, 1  ;;  %v285_v54 = vshrl.u32 %v3255_v37, 16  ;;  %v211_v62 = vld [vmem:[%s3213_s16 + $0x70] sm:$0xff]  ;;  %v3294_v1 = vpack.c.bf16 %v210_v56, %v209_v55  ;;  %v3063_v2 = vld [vmem:[%s3800_s1 + $0xa8] sm:$0xff]   ;;  %v3065_v4 = vld [vmem:[%s3800_s1 + $0xa0] sm:$0xff]  }
  0x19   : > { %v263_v31 = vor.u32 %v262_v26, %v258_v21  ;;  %v283_v50 = vrot.slane %v281_v42, 1  ;;  %v289_v51 = vshll.u32 %v3260_v43, 16  ;;  %v293_v60 = vshrl.u32 %v3260_v43, 16  ;;  %v3064_v3 = vld [vmem:[%s3800_s1 + $0xe8] sm:$0xff]   ;;  %v213_v12 = vld [vmem:[%s3213_s16 + $0x80] sm:$0x3] }
  0x1a   : > { %2721 = vmatpush3.bf16.msra.mxu0 %v3049_v6  ;;  %v1065_v41 = vor.u32 %v269_v32, %v267_v29  ;;  %v1737_v45 = vor.u32 %v277_v40, %v275_v39  ;;  %v297_v61 = vshll.u32 %v3274_v52, 16  ;;  %v309_v14 = vshrl.u32 %v3294_v1, 16  ;;  %v3067_v22 = vld [vmem:[%s3800_s1 + $0x98] sm:$0xff]   ;;  %v3070_v30 = vld [vmem:[%s3800_s1 + $0xd0] sm:$0xff]   ;;  %v2402_v32 = vld [vmem:[%s3213_s16 + $0x80] sm:$0xff] }
  0x1b   : > { %2753 = vmatpush3.bf16.msra.mxu1 %v3050_v7  ;;  %2722 = vmatprep.subr.bf16.mxu0 %v3051_v8  ;;  %v268_v38 = vsel %vm256_vm0, %v263_v31, %v267_v29  ;;  %v291_v59 = vrot.slane %v289_v51, 1  ;;  %v287_v0 = vor.u32 %v285_v54, %v283_v50  ;;  %v3307_v7 = vpack.c.bf16 %v212_v63, %v211_v62  ;;  %v3069_v29 = vld [vmem:[%s3800_s1 + $0x90] sm:$0xff]   ;;  %v2403_v35 = vld [vmem:[%s3213_s16 + $0x88] sm:$0xff]  ;;  %v3075_v51 = vld [vmem:[%s3800_s1 + $0x138] sm:$0xff]  }
  0x1c   : > { %2754 = vmatprep.subr.bf16.mxu1 %v3052_v9  ;;  %2730 = vmatprep.mubr.bf16.mxu0 %v268_v38  ;;  %v3263_v44 = vsel %vm256_vm0, %v1065_v41, %v275_v39  ;;  %v3283_v57 = vsel %vm256_vm0, %v1737_v45, %v283_v50  ;;  %v299_v6 = vrot.slane %v297_v61, 1  ;;  %v3325_v21 = vpack.c.bf16 %v213_v12, %v213_v12  ;;  %v3072_v39 = vld [vmem:[%s3800_s1 + $0xc8] sm:$0xff]   ;;  %v3077_v56 = vld [vmem:[%s3800_s1 + $0x130] sm:$0xff]  }
  0x1d   : > { %v295_v5 = vor.u32 %v293_v60, %v291_v59  ;;  %v313_v15 = vshll.u32 %v3307_v7, 16  ;;  %v317_v27 = vshrl.u32 %v3307_v7, 16  ;;  %v3356_v38 = vpack.c.bf16 %v2403_v35, %v2402_v32  ;;  %v2404_v61 = vld [vmem:[%s3213_s16 + $0x90] sm:$0x3]  ;;  %v3079_v62 = vld [vmem:[%s3800_s1 + $0x128] sm:$0xff]  }
  0x1e   : > { %2723 = vmatpush3.bf16.msra.mxu0 %v3051_v8  ;;  %v3310_v8 = vsel %vm256_vm0, %v287_v0, %v291_v59  ;;  %v650_v40 = vrot.slane %v3225_v16, 1  ;;  %v651_v41 = vrot.slane %v3229_v19, 1  ;;  %v3074_v16 = vld [vmem:[%s3800_s1 + $0xc0] sm:$0xff]   ;;  %v653_v50 = vrot.slane %v3231_v20, 1  ;;  %v3080_v0 = vld [vmem:[%s3800_s1 + $0x168] sm:$0xff]   ;;  %v3086_v32 = vld [vmem:[%s3800_s1 + $0x150] sm:$0xff]  }
  0x1f   : > { %2755 = vmatpush3.bf16.msra.mxu1 %v3052_v9  ;;  %2724 = vmatprep.subr.bf16.mxu0 %v3053_v10  ;;  %v3066_v9 = vld [vmem:[%s3800_s1 + $0xe0] sm:$0xff]   ;;  %v3320_v13 = vsel %vm256_vm0, %v295_v5, %v299_v6  ;;  %v315_v25 = vrot.slane %v313_v15, 1  ;;  %v1115_v42 = vshll.u32 %v3356_v38, 16  ;;  %v655_v54 = vrot.slane %v3255_v37, 1  ;;  %v3083_v15 = vld [vmem:[%s3800_s1 + $0x118] sm:$0xff]  }
  0x20   : > { %2756 = vmatprep.subr.bf16.mxu1 %v3054_v11  ;;  %v652_v48 = vsel %vm649_vm1, %v650_v40, %v651_v41  ;;  %v3388_v55 = vsel %vm649_vm1, %v651_v41, %v653_v50  ;;  %v1119_v59 = vshrl.u32 %v3356_v38, 16  ;;  %v657_v60 = vrot.slane %v3260_v43, 1 }
  0x21   : > { %v319_v33 = vor.u32 %v317_v27, %v315_v25  ;;  %v1117_v47 = vrot.slane %v1115_v42, 1  ;;  %v3407_v63 = vpack.c.bf16 %v2404_v61, %v2404_v61  ;;  %v665_v41 = vrot.slane %v3325_v21, 1  ;;  %v3094_v61 = vld [vmem:[%s3800_s1 + $0x1f0] sm:$0xff]  }
  0x22   : > { %2725 = vmatpush3.bf16.msra.mxu0 %v3053_v10  ;;  %v301_v10 = vshrl.u32 %v3274_v52, 16  ;;  %v3417_v5 = vsel %vm649_vm1, %v655_v54, %v657_v60 }
  0x23   : > { %2757 = vmatpush3.bf16.msra.mxu1 %v3054_v11  ;;  %2726 = vmatprep.subr.bf16.mxu0 %v3055_v23  ;;  %v305_v11 = vshll.u32 %v3294_v1, 16 }
  0x24   : > { %2758 = vmatprep.subr.bf16.mxu1 %v3056_v24  ;;  %v303_v17 = vor.u32 %v301_v10, %v299_v6  ;;  %v3081_v6 = vld [vmem:[%s3800_s1 + $0x120] sm:$0xff]  }
  0x25   : > { %v307_v18 = vrot.slane %v305_v11, 1  ;;  %v3082_v10 = vld [vmem:[%s3800_s1 + $0x160] sm:$0xff]  }
  0x26   : > { %2727 = vmatpush3.bf16.msra.mxu0 %v3055_v23  ;;  %v3068_v23 = vld [vmem:[%s3800_s1 + $0xd8] sm:$0xff]  }
  0x27   : > { %2759 = vmatpush3.bf16.msra.mxu1 %v3056_v24  ;;  %2728 = vmatprep.subr.bf16.mxu0 %v3057_v28  ;;  %v311_v24 = vor.u32 %v309_v14, %v307_v18  ;;  %v3336_v26 = vsel %vm256_vm0, %v303_v17, %v307_v18  ;;  %v661_v14 = vrot.slane %v3294_v1, 1  ;;  %v3084_v17 = vld [vmem:[%s3800_s1 + $0x158] sm:$0xff]   ;;  %v2491_v18 = vld [vmem:[%s3213_s16 + $0x90] sm:$0xff] }
  0x28   : > { %2760 = vmatprep.subr.bf16.mxu1 %v3058_v36 }
  0x29   : > { %v3348_v31 = vsel %vm256_vm0, %v311_v24, %v315_v25  ;;  %v2493_v24 = vld [vmem:[%s3213_s16 + $0xa0] sm:$0x3] }
  0x2a   : > { %2729 = vmatpush3.bf16.msra.mxu0 %v3057_v28  ;;  %v321_v28 = vshll.u32 %v3325_v21, 16  ;;  %v3088_v21 = vld [vmem:[%s3800_s1 + $0x148] sm:$0xff]  }
  0x2b   : > { %2761 = vmatpush3.bf16.msra.mxu1 %v3058_v36  ;;  %2778 = vmatprep.subr.bf16.mxu0 %v3059_v46  ;;  %v3071_v36 = vld [vmem:[%s3800_s1 + $0x88] sm:$0xff]  }
  0x2c   : > { %2810 = vmatprep.subr.bf16.mxu1 %v3060_v49  ;;  %v323_v34 = vrot.slane %v321_v28, 1  ;;  %v1713_v28 = vpack.c.bf16 %v2493_v24, %v2493_v24 }
  0x2d   : > { %2731 = vmatmul.mubr.bf16.vlgmr.msra.gmra.mxu0 %v3263_v44 }
  0x2e   : > { %2763 = vmatmul.mubr.bf16.vlgmr.msra.gmra.mxu1 %v3229_v19  ;;  %2779 = vmatpush3.bf16.msra.mxu0 %v3059_v46  ;;  %v324_v45 = vsel %vm256_vm0, %v319_v33, %v323_v34  ;;  %v3073_v46 = vld [vmem:[%s3800_s1 + $0x80] sm:$0xff]   ;;  %v1795_v35 = vshll.u32 %v1713_v28, 16  ;;  %v2009_v40 = vrot.slane %v1713_v28, 1 }
  0x2f   : > { %2811 = vmatpush3.bf16.msra.mxu1 %v3060_v49  ;;  %2780 = vmatprep.subr.bf16.mxu0 %v3061_v53  ;;  %v3375_v49 = vsel %vm256_vm0, %v319_v33, %v1117_v47 }
  0x30   : > { %2812 = vmatprep.subr.bf16.mxu1 %v3062_v58  ;;  %2734 = vmatprep.mubr.bf16.mxu0 %v3283_v57 }
  0x31   : > { %2766 = vmatprep.mubr.bf16.mxu1 %v3231_v20 }
  0x32   : > { %2781 = vmatpush3.bf16.msra.mxu0 %v3061_v53  ;;  %v3076_v53 = vld [vmem:[%s3800_s1 + $0x178] sm:$0xff]  }
  0x33   : > { %2813 = vmatpush3.bf16.msra.mxu1 %v3062_v58  ;;  %2782 = vmatprep.subr.bf16.mxu0 %v3063_v2  ;;  %v3078_v58 = vld [vmem:[%s3800_s1 + $0x170] sm:$0xff]  }
  0x34   : > { %2814 = vmatprep.subr.bf16.mxu1 %v3064_v3 }
  0x35   : > { %2735 = vmatmul.mubr.bf16.gmra.mxu0 %v3310_v8 }
  0x36   : > { %2767 = vmatmul.mubr.bf16.gmra.mxu1 %v3255_v37  ;;  %2783 = vmatpush3.bf16.msra.mxu0 %v3063_v2  ;;  %v659_v2 = vrot.slane %v3274_v52, 1 }
  0x37   : > { %2815 = vmatpush3.bf16.msra.mxu1 %v3064_v3  ;;  %2784 = vmatprep.subr.bf16.mxu0 %v3065_v4  ;;  %v1121_v3 = vor.u32 %v1119_v59, %v1117_v47  ;;  %v3087_v47 = vld [vmem:[%s3800_s1 + $0x108] sm:$0xff]   ;;  %v3092_v59 = vld [vmem:[%s3800_s1 + $0x1f8] sm:$0xff]  }
  0x38   : > { %2816 = vmatprep.subr.bf16.mxu1 %v3066_v9  ;;  %2738 = vmatprep.mubr.bf16.mxu0 %v3320_v13  ;;  %v3427_v11 = vsel %vm649_vm1, %v657_v60, %v659_v2  ;;  %v3449_v25 = vsel %vm649_vm1, %v659_v2, %v661_v14  ;;  %v3093_v60 = vld [vmem:[%s3800_s1 + $0x1b0] sm:$0xff]   ;;  %v3099_v2 = vld [vmem:[%s3800_s1 + $0x198] sm:$0xff]  }
  0x39   : > { %2770 = vmatprep.mubr.bf16.mxu1 %v3260_v43 }
  0x3a   : > { %2785 = vmatpush3.bf16.msra.mxu0 %v3065_v4  ;;  %v1123_v4 = vshll.u32 %v3407_v63, 16 }
  0x3b   : > { %2817 = vmatpush3.bf16.msra.mxu1 %v3066_v9  ;;  %2786 = vmatprep.subr.bf16.mxu0 %v3067_v22 }
  0x3c   : > { %2818 = vmatprep.subr.bf16.mxu1 %v3068_v23  ;;  %v1125_v9 = vrot.slane %v1123_v4, 1  ;;  %v3101_v4 = vld [vmem:[%s3800_s1 + $0x190] sm:$0xff]  }
  0x3d   : > { %2739 = vmatmul.mubr.bf16.gmra.mxu0 %v3336_v26 }
  0x3e   : > { %2771 = vmatmul.mubr.bf16.gmra.mxu1 %v3274_v52  ;;  %2787 = vmatpush3.bf16.msra.mxu0 %v3067_v22  ;;  %v3430_v12 = vsel %vm256_vm0, %v1121_v3, %v1125_v9  ;;  %v3444_v22 = vrot.slane %v3307_v7, 1 }
  0x3f   : > { %2819 = vmatpush3.bf16.msra.mxu1 %v3068_v23  ;;  %2788 = vmatprep.subr.bf16.mxu0 %v3069_v29  ;;  %v2492_v23 = vld [vmem:[%s3213_s16 + $0x98] sm:$0xff] }
  0x40   : > { %2820 = vmatprep.subr.bf16.mxu1 %v3070_v30  ;;  %2742 = vmatprep.mubr.bf16.mxu0 %v3348_v31  ;;  %v3451_v27 = vpack.c.bf16 %v2492_v23, %v2491_v18  ;;  %v3106_v18 = vld [vmem:[%s3800_s1 + $0x1c0] sm:$0xff]  }
  0x41   : > { %2774 = vmatprep.mubr.bf16.mxu1 %v3294_v1 }
  0x42   : > { %2789 = vmatpush3.bf16.msra.mxu0 %v3069_v29  ;;  %v3085_v29 = vld [vmem:[%s3800_s1 + $0x110] sm:$0xff]   ;;  %v1787_v33 = vshll.u32 %v3451_v27, 16  ;;  %v1791_v34 = vshrl.u32 %v3451_v27, 16 }
  0x43   : > { %2821 = vmatpush3.bf16.msra.mxu1 %v3070_v30  ;;  %2790 = vmatprep.subr.bf16.mxu0 %v3071_v36  ;;  %v3457_v30 = vrot.slane %v3356_v38, 1 }
  0x44   : > { %2822 = vmatprep.subr.bf16.mxu1 %v3072_v39  ;;  %v1789_v42 = vrot.slane %v1787_v33, 1 }
  0x45   : > { %2743 = vmatmul.mubr.bf16.gmra.mxu0 %v324_v45  ;;  %v1797_v45 = vrot.slane %v1795_v35, 1  ;;  %v3553_v9 = vsel %vm649_vm1, %v3444_v22, %v3457_v30 }
  0x46   : > { %2775 = vmatmul.mubr.bf16.gmra.mxu1 %v3307_v7  ;;  %2791 = vmatpush3.bf16.msra.mxu0 %v3071_v36  ;;  %v2007_v36 = vrot.slane %v3451_v27, 1 }
  0x47   : > { %2823 = vmatpush3.bf16.msra.mxu1 %v3072_v39  ;;  %2792 = vmatprep.subr.bf16.mxu0 %v3073_v46  ;;  %v3468_v39 = vsel %vm649_vm1, %v661_v14, %v3444_v22  ;;  %v3103_v14 = vld [vmem:[%s3800_s1 + $0x188] sm:$0xff]  }
  0x48   : > { %2824 = vmatprep.subr.bf16.mxu1 %v3074_v16  ;;  %2794 = vmatprep.mubr.bf16.mxu0 %v652_v48  ;;  %v3487_v48 = vsel %vm256_vm0, %v1121_v3, %v1789_v42  ;;  %v3100_v3 = vld [vmem:[%s3800_s1 + $0x1d8] sm:$0xff]  }
  0x49   : > { %2826 = vmatprep.mubr.bf16.mxu1 %v3229_v19  ;;  %v3398_v19 = vsel %vm649_vm1, %v653_v50, %v655_v54  ;;  %v1793_v50 = vor.u32 %v1791_v34, %v1789_v42  ;;  %v3089_v54 = vld [vmem:[%s3800_s1 + $0x100] sm:$0xff]  }
  0x4a   : > { %2793 = vmatpush3.bf16.msra.mxu0 %v3073_v46  ;;  %v3474_v46 = vsel %vm649_vm1, %v3457_v30, %v2007_v36 }
  0x4b   : > { %2825 = vmatpush3.bf16.msra.mxu1 %v3074_v16  ;;  %2842 = vmatprep.subr.bf16.mxu0 %v3075_v51  ;;  %v3480_v16 = vsel %vm649_vm1, %v2007_v36, %v2009_v40 }
  0x4c   : > { %2874 = vmatprep.subr.bf16.mxu1 %v3076_v53 }
  0x4d   : > { %2795 = vmatmul.mubr.bf16.vlgmr.msra.gmra.mxu0 %v3388_v55 }
  0x4e   : > { %2827 = vmatmul.mubr.bf16.vlgmr.msra.gmra.mxu1 %v3231_v20  ;;  %2843 = vmatpush3.bf16.msra.mxu0 %v3075_v51  ;;  %v666_v51 = vsel %vm649_vm1, %v3444_v22, %v665_v41  ;;  %v3107_v22 = vld [vmem:[%s3800_s1 + $0x238] sm:$0xff]  }
  0x4f   : > { %2875 = vmatpush3.bf16.msra.mxu1 %v3076_v53  ;;  %2844 = vmatprep.subr.bf16.mxu0 %v3077_v56  ;;  %v3493_v53 = vsel %vm256_vm0, %v1793_v50, %v1797_v45 }
  0x50   : > { %2876 = vmatprep.subr.bf16.mxu1 %v3078_v58  ;;  %2798 = vmatprep.mubr.bf16.mxu0 %v3398_v19 }
  0x51   : > { %2830 = vmatprep.mubr.bf16.mxu1 %v3255_v37 }
  0x52   : > { %2845 = vmatpush3.bf16.msra.mxu0 %v3077_v56  ;;  %v3090_v56 = vld [vmem:[%s3800_s1 + $0x140] sm:$0xff]  }
  0x53   : > { %2877 = vmatpush3.bf16.msra.mxu1 %v3078_v58  ;;  %2846 = vmatprep.subr.bf16.mxu0 %v3079_v62  ;;  %v3091_v58 = vld [vmem:[%s3800_s1 + $0x1b8] sm:$0xff]  }
  0x54   : > { %2878 = vmatprep.subr.bf16.mxu1 %v3080_v0 }
  0x55   : > { %2799 = vmatmul.mubr.bf16.gmra.mxu0 %v3417_v5 }
  0x56   : > { %2831 = vmatmul.mubr.bf16.gmra.mxu1 %v3260_v43  ;;  %2847 = vmatpush3.bf16.msra.mxu0 %v3079_v62  ;;  %v3097_v62 = vld [vmem:[%s3800_s1 + $0x1a0] sm:$0xff]  }
  0x57   : > { %2879 = vmatpush3.bf16.msra.mxu1 %v3080_v0  ;;  %2848 = vmatprep.subr.bf16.mxu0 %v3081_v6  ;;  %v3098_v0 = vld [vmem:[%s3800_s1 + $0x1e0] sm:$0xff]  }
  0x58   : > { %2880 = vmatprep.subr.bf16.mxu1 %v3082_v10  ;;  %2802 = vmatprep.mubr.bf16.mxu0 %v3427_v11 }
  0x59   : > { %2834 = vmatprep.mubr.bf16.mxu1 %v3274_v52 }
  0x5a   : > { %2849 = vmatpush3.bf16.msra.mxu0 %v3081_v6  ;;  %v3102_v6 = vld [vmem:[%s3800_s1 + $0x1d0] sm:$0xff]  }
  0x5b   : > { %2881 = vmatpush3.bf16.msra.mxu1 %v3082_v10  ;;  %2850 = vmatprep.subr.bf16.mxu0 %v3083_v15  ;;  %v1337_v10 = vrot.slane %v3407_v63, 1  ;;  %v3105_v63 = vld [vmem:[%s3800_s1 + $0x180] sm:$0xff]  }
  0x5c   : > { %2882 = vmatprep.subr.bf16.mxu1 %v3084_v17 }
  0x5d   : > { %2803 = vmatmul.mubr.bf16.gmra.mxu0 %v3449_v25 }
  0x5e   : > { %2835 = vmatmul.mubr.bf16.gmra.mxu1 %v3294_v1  ;;  %2851 = vmatpush3.bf16.msra.mxu0 %v3083_v15  ;;  %v3104_v15 = vld [vmem:[%s3800_s1 + $0x1c8] sm:$0xff]  }
  0x5f   : > { %2883 = vmatpush3.bf16.msra.mxu1 %v3084_v17  ;;  %2852 = vmatprep.subr.bf16.mxu0 %v3085_v29  ;;  %v1338_v17 = vsel %vm649_vm1, %v3457_v30, %v1337_v10 }
  0x60   : > { %2884 = vmatprep.subr.bf16.mxu1 %v3086_v32  ;;  %2806 = vmatprep.mubr.bf16.mxu0 %v3468_v39 }
  0x61   : > { %2838 = vmatprep.mubr.bf16.mxu1 %v3307_v7 }
  0x62   : > { %2853 = vmatpush3.bf16.msra.mxu0 %v3085_v29 }
  0x63   : > { %2885 = vmatpush3.bf16.msra.mxu1 %v3086_v32  ;;  %2854 = vmatprep.subr.bf16.mxu0 %v3087_v47 }
  0x64   : > { %2886 = vmatprep.subr.bf16.mxu1 %v3088_v21 }
  0x65   : > { %2807 = vmatmul.mubr.bf16.gmra.mxu0 %v666_v51 }
  0x66   : > { %2839 = vmatmul.mubr.bf16.gmra.mxu1 %v3356_v38  ;;  %2855 = vmatpush3.bf16.msra.mxu0 %v3087_v47 }
  0x67   : > { %2887 = vmatpush3.bf16.msra.mxu1 %v3088_v21  ;;  %2856 = vmatprep.subr.bf16.mxu0 %v3089_v54 }
  0x68   : > { %2888 = vmatprep.subr.bf16.mxu1 %v3090_v56  ;;  %2858 = vmatprep.mubr.bf16.mxu0 %v3263_v44  ;;  %v3095_v44 = vld [vmem:[%s3800_s1 + $0x1a8] sm:$0xff]  }
  0x69   : > { %2890 = vmatprep.mubr.bf16.mxu1 %v3388_v55  ;;  %v3096_v55 = vld [vmem:[%s3800_s1 + $0x1e8] sm:$0xff]  }
  0x6a   : > { %2857 = vmatpush3.bf16.msra.mxu0 %v3089_v54 }
  0x6b   : > { %2889 = vmatpush3.bf16.msra.mxu1 %v3090_v56  ;;  %2906 = vmatprep.subr.bf16.mxu0 %v3091_v58 }
  0x6c   : > { %2938 = vmatprep.subr.bf16.mxu1 %v3092_v59 }
  0x6d   : > { %2859 = vmatmul.mubr.bf16.vlgmr.msra.gmra.mxu0 %v3283_v57 }
  0x6e   : > { %2891 = vmatmul.mubr.bf16.vlgmr.msra.gmra.mxu1 %v3398_v19  ;;  %2907 = vmatpush3.bf16.msra.mxu0 %v3091_v58 }
  0x6f   : > { %2939 = vmatpush3.bf16.msra.mxu1 %v3092_v59  ;;  %2908 = vmatprep.subr.bf16.mxu0 %v3093_v60 }
  0x70   : > { %2940 = vmatprep.subr.bf16.mxu1 %v3094_v61  ;;  %2862 = vmatprep.mubr.bf16.mxu0 %v3310_v8 }
  0x71   : > { %2894 = vmatprep.mubr.bf16.mxu1 %v3417_v5 }
  0x72   : > { %2909 = vmatpush3.bf16.msra.mxu0 %v3093_v60 }
  0x73   : > { %2941 = vmatpush3.bf16.msra.mxu1 %v3094_v61  ;;  %2910 = vmatprep.subr.bf16.mxu0 %v3095_v44 }
  0x74   : > { %2942 = vmatprep.subr.bf16.mxu1 %v3096_v55 }
  0x75   : > { %2863 = vmatmul.mubr.bf16.gmra.mxu0 %v3320_v13 }
  0x76   : > { %2895 = vmatmul.mubr.bf16.gmra.mxu1 %v3427_v11  ;;  %2911 = vmatpush3.bf16.msra.mxu0 %v3095_v44 }
  0x77   : > { %2943 = vmatpush3.bf16.msra.mxu1 %v3096_v55  ;;  %2912 = vmatprep.subr.bf16.mxu0 %v3097_v62 }
  0x78   : > { %2944 = vmatprep.subr.bf16.mxu1 %v3098_v0  ;;  %2866 = vmatprep.mubr.bf16.mxu0 %v3336_v26 }
  0x79   : > { %2898 = vmatprep.mubr.bf16.mxu1 %v3449_v25 }
  0x7a   : > { %2913 = vmatpush3.bf16.msra.mxu0 %v3097_v62 }
  0x7b   : > { %2945 = vmatpush3.bf16.msra.mxu1 %v3098_v0  ;;  %2914 = vmatprep.subr.bf16.mxu0 %v3099_v2 }
  0x7c   : > { %2946 = vmatprep.subr.bf16.mxu1 %v3100_v3 }
  0x7d   : > { %2867 = vmatmul.mubr.bf16.gmra.mxu0 %v3348_v31 }
  0x7e   : > { %2899 = vmatmul.mubr.bf16.gmra.mxu1 %v3468_v39  ;;  %2915 = vmatpush3.bf16.msra.mxu0 %v3099_v2 }
  0x7f   : > { %2947 = vmatpush3.bf16.msra.mxu1 %v3100_v3  ;;  %2916 = vmatprep.subr.bf16.mxu0 %v3101_v4 }
  0x80   : > { %2948 = vmatprep.subr.bf16.mxu1 %v3102_v6  ;;  %2870 = vmatprep.mubr.bf16.mxu0 %v3375_v49 }
  0x81   : > { %2902 = vmatprep.mubr.bf16.mxu1 %v3553_v9 }
  0x82   : > { %2917 = vmatpush3.bf16.msra.mxu0 %v3101_v4 }
  0x83   : > { %2949 = vmatpush3.bf16.msra.mxu1 %v3102_v6  ;;  %2918 = vmatprep.subr.bf16.mxu0 %v3103_v14 }
  0x84   : > { %2950 = vmatprep.subr.bf16.mxu1 %v3104_v15 }
  0x85   : > { %2871 = vmatmul.mubr.bf16.gmra.mxu0 %v3430_v12  ;;  %v3108_v12 = vld [vmem:[%s3800_s1 + $0x230] sm:$0xff]  }
  0x86   : > { %2903 = vmatmul.mubr.bf16.gmra.mxu1 %v1338_v17  ;;  %2919 = vmatpush3.bf16.msra.mxu0 %v3103_v14 }
  0x87   : > { %2951 = vmatpush3.bf16.msra.mxu1 %v3104_v15  ;;  %2920 = vmatprep.subr.bf16.mxu0 %v3105_v63 }
  0x88   : > { %2952 = vmatprep.subr.bf16.mxu1 %v3106_v18  ;;  %2922 = vmatprep.mubr.bf16.mxu0 %v3231_v20  ;;  %v3109_v20 = vld [vmem:[%s3800_s1 + $0x228] sm:$0xff]  }
  0x89   : > { %2954 = vmatprep.mubr.bf16.mxu1 %v3283_v57  ;;  %v3113_v57 = vld [vmem:[%s3800_s1 + $0x208] sm:$0xff]  }
  0x8a   : > { %2921 = vmatpush3.bf16.msra.mxu0 %v3105_v63 }
  0x8b   : > { %2953 = vmatpush3.bf16.msra.mxu1 %v3106_v18  ;;  %2970 = vmatprep.subr.bf16.mxu0 %v3107_v22 }
  0x8c   : > { %3002 = vmatprep.subr.bf16.mxu1 %v3107_v22 }
  0x8d   : > { %2923 = vmatmul.mubr.bf16.vlgmr.msra.gmra.mxu0 %v3255_v37  ;;  %v3110_v37 = vld [vmem:[%s3800_s1 + $0x220] sm:$0xff]  }
  0x8e   : > { %2955 = vmatmul.mubr.bf16.vlgmr.msra.gmra.mxu1 %v3310_v8  ;;  %2971 = vmatpush3.bf16.msra.mxu0 %v3107_v22 }
  0x8f   : > { %3010 = vmatpush3.bf16.msra.mxu1 %v3107_v22  ;;  %2972 = vmatprep.subr.bf16.mxu0 %v3108_v12 }
  0x90   : > { %3003 = vmatprep.subr.bf16.mxu1 %v3108_v12  ;;  %2926 = vmatprep.mubr.bf16.mxu0 %v3260_v43  ;;  %v3111_v43 = vld [vmem:[%s3800_s1 + $0x218] sm:$0xff]  }
  0x91   : > { %2958 = vmatprep.mubr.bf16.mxu1 %v3320_v13 }
  0x92   : > { %2973 = vmatpush3.bf16.msra.mxu0 %v3108_v12 }
  0x93   : > { %3011 = vmatpush3.bf16.msra.mxu1 %v3108_v12  ;;  %2974 = vmatprep.subr.bf16.mxu0 %v3109_v20 }
  0x94   : > { %3004 = vmatprep.subr.bf16.mxu1 %v3109_v20 }
  0x95   : > { %2927 = vmatmul.mubr.bf16.gmra.mxu0 %v3274_v52  ;;  %v3112_v52 = vld [vmem:[%s3800_s1 + $0x210] sm:$0xff]  }
  0x96   : > { %2959 = vmatmul.mubr.bf16.gmra.mxu1 %v3336_v26  ;;  %2975 = vmatpush3.bf16.msra.mxu0 %v3109_v20 }
  0x97   : > { %3012 = vmatpush3.bf16.msra.mxu1 %v3109_v20  ;;  %2976 = vmatprep.subr.bf16.mxu0 %v3110_v37 }
  0x98   : > { %3005 = vmatprep.subr.bf16.mxu1 %v3110_v37  ;;  %2930 = vmatprep.mubr.bf16.mxu0 %v3294_v1  ;;  %v3114_v1 = vld [vmem:[%s3800_s1 + $0x200] sm:$0xff]  }
  0x99   : > { %2962 = vmatprep.mubr.bf16.mxu1 %v3348_v31 }
  0x9a   : > { %2977 = vmatpush3.bf16.msra.mxu0 %v3110_v37 }
  0x9b   : > { %3013 = vmatpush3.bf16.msra.mxu1 %v3110_v37  ;;  %2978 = vmatprep.subr.bf16.mxu0 %v3111_v43 }
  0x9c   : > { %3006 = vmatprep.subr.bf16.mxu1 %v3111_v43 }
  0x9d   : > { %2931 = vmatmul.mubr.bf16.gmra.mxu0 %v3307_v7 }
  0x9e   : > { %2963 = vmatmul.mubr.bf16.gmra.mxu1 %v3375_v49  ;;  %2979 = vmatpush3.bf16.msra.mxu0 %v3111_v43 }
  0x9f   : > { %3014 = vmatpush3.bf16.msra.mxu1 %v3111_v43  ;;  %2980 = vmatprep.subr.bf16.mxu0 %v3112_v52 }
  0xa0   : > { %3007 = vmatprep.subr.bf16.mxu1 %v3112_v52  ;;  %2934 = vmatprep.mubr.bf16.mxu0 %v3356_v38 }
  0xa1   : > { %2966 = vmatprep.mubr.bf16.mxu1 %v3487_v48 }
  0xa2   : > { %2981 = vmatpush3.bf16.msra.mxu0 %v3112_v52 }
  0xa3   : > { %3015 = vmatpush3.bf16.msra.mxu1 %v3112_v52  ;;  %2982 = vmatprep.subr.bf16.mxu0 %v3113_v57 }
  0xa4   : > { %3008 = vmatprep.subr.bf16.mxu1 %v3113_v57 }
  0xa5   : > { %2935 = vmatmul.mubr.bf16.gmra.mxu0 %v3451_v27 }
  0xa6   : > { %2967 = vmatmul.mubr.bf16.gmra.mxu1 %v3493_v53  ;;  %2983 = vmatpush3.bf16.msra.mxu0 %v3113_v57 }
  0xa7   : > { %3016 = vmatpush3.bf16.msra.mxu1 %v3113_v57  ;;  %2984 = vmatprep.subr.bf16.mxu0 %v3114_v1 }
  0xa8   : > { %3009 = vmatprep.subr.bf16.mxu1 %v3114_v1  ;;  %2986 = vmatprep.mubr.bf16.mxu0 %v3398_v19 }
  0xa9   : > { %2994 = vmatprep.mubr.bf16.mxu1 %v3468_v39 }
  0xaa   : > { %2985 = vmatpush3.bf16.msra.mxu0 %v3114_v1 }
  0xab   : > { %3017 = vmatpush3.bf16.msra.mxu1 %v3114_v1 }
  0xad   : > { %2987 = vmatmul.mubr.bf16.vlgmr.msra.gmra.mxu0 %v3417_v5 }
  0xae   : > { %2995 = vmatmul.mubr.bf16.vlgmr.msra.gmra.mxu1 %v3553_v9  ;;  %2990 = vmatprep.mubr.bf16.mxu0 %v3427_v11 }
  0xaf   : > { %2998 = vmatprep.mubr.bf16.mxu1 %v3474_v46 }
  0xb5   : > { %2991 = vmatmul.mubr.bf16.gmra.mxu0 %v3449_v25 }
  0xb6   : > { %2999 = vmatmul.mubr.bf16.gmra.mxu1 %v3480_v16 }
  0xed   : > { %v2732_v7 = vpop.f32.mrf.mxu0 }
  0xee   : > { %v2764_v8 = vpop.f32.mrf.mxu1 }
  0xef   : > { %v569_v13 = vadd.f32 %v2764_v8, %v2732_v7  ;;  %v415_v26 = vpop.f32.mrf.mxu0 }
  0xf0   : > { %v560_v31 = vpop.f32.mrf.mxu1 }
  0xf1   : > { %v561_v38 = vadd.f32 %v560_v31, %v415_v26  ;;  %v2733_v49 = vpop.f32.mrf.mxu0 }
  0xf2   : > { %v2765_v19 = vpop.f32.mrf.mxu1 }
  0xf3   : > { %v572_v23 = vadd.f32 %v2765_v19, %v2733_v49  ;;  %v418_v5 = vpop.f32.mrf.mxu0 }
  0xf4   : > { %v563_v24 = vpop.f32.mrf.mxu1 }
  0xf5   : > { %v564_v27 = vadd.f32 %v563_v24, %v418_v5  ;;  %v2736_v28 = vpop.f32.mrf.mxu0 }
  0xf6   : > { %v2768_v11 = vpop.f32.mrf.mxu1 }
  0xf7   : > { %v585_v29 = vadd.f32 %v2768_v11, %v2736_v28  ;;  %v431_v30 = vpop.f32.mrf.mxu0 }
  0xf8   : > { %v576_v32 = vpop.f32.mrf.mxu1 }
  0xf9   : > { %v577_v25 = vadd.f32 %v576_v32, %v431_v30  ;;  %v2737_v33 = vpop.f32.mrf.mxu0 }
  0xfa   : > { %v2769_v34 = vpop.f32.mrf.mxu1 }
  0xfb   : > { %v588_v35 = vadd.f32 %v2769_v34, %v2737_v33  ;;  %v434_v36 = vpop.f32.mrf.mxu0 }
  0xfc   : > { %v579_v39 = vpop.f32.mrf.mxu1 }
  0xfd   : > { %v580_v40 = vadd.f32 %v579_v39, %v434_v36  ;;  %v2740_v41 = vpop.f32.mrf.mxu0 }
  0xfe   : > { %v2772_v42 = vpop.f32.mrf.mxu1 }
  0xff   : > { %v601_v45 = vadd.f32 %v2772_v42, %v2740_v41  ;;  %v447_v46 = vpop.f32.mrf.mxu0 }
 0x100   : > { %v592_v47 = vpop.f32.mrf.mxu1 }
 0x101   : > { %v593_v16 = vadd.f32 %v592_v47, %v447_v46  ;;  %v2741_v21 = vpop.f32.mrf.mxu0 }
 0x102   : > { %v2773_v48 = vpop.f32.mrf.mxu1 }
 0x103   : > { %v604_v50 = vadd.f32 %v2773_v48, %v2741_v21  ;;  %v450_v51 = vpop.f32.mrf.mxu0 }
 0x104   : > { %v595_v53 = vpop.f32.mrf.mxu1 }
 0x105   : > { %v596_v54 = vadd.f32 %v595_v53, %v450_v51  ;;  %v2744_v56 = vpop.f32.mrf.mxu0 }
 0x106   : > { %v2776_v58 = vpop.f32.mrf.mxu1 }
 0x107   : > { %v617_v59 = vadd.f32 %v2776_v58, %v2744_v56  ;;  %v463_v60 = vpop.f32.mrf.mxu0 }
 0x108   : > { %v608_v61 = vpop.f32.mrf.mxu1 }
 0x109   : > { %v609_v44 = vadd.f32 %v608_v61, %v463_v60  ;;  %v2745_v55 = vpop.f32.mrf.mxu0 }
 0x10a   : > { %v2777_v62 = vpop.f32.mrf.mxu1 }
 0x10b   : > { %v620_v0 = vadd.f32 %v2777_v62, %v2745_v55  ;;  %v466_v2 = vpop.f32.mrf.mxu0 }
 0x10c   : > { %v611_v3 = vpop.f32.mrf.mxu1 }
 0x10d   : > { %v612_v4 = vadd.f32 %v611_v3, %v466_v2  ;;  %v2796_v6 = vpop.f32.mrf.mxu0 }
 0x10e   : > { %v822_v9 = vadd.f32 %v2796_v6, %v569_v13  ;;  %v2828_v10 = vpop.f32.mrf.mxu1 }
 0x10f   : > { %v757_v14 = vpop.f32.mrf.mxu0 }
 0x110   : > { %v3621_v15 = vadd.f32 %v2828_v10, %v822_v9  ;;  %v820_v17 = vadd.f32 %v757_v14, %v561_v38  ;;  %v962_v63 = vpop.f32.mrf.mxu1 }
 0x111   : > { %v2797_v18 = vpop.f32.mrf.mxu0 }
 0x112   : > { %v3623_v22 = vadd.f32 %v962_v63, %v820_v17  ;;  %v823_v12 = vadd.f32 %v2797_v18, %v572_v23  ;;  %v2829_v20 = vpop.f32.mrf.mxu1 }
 0x113   : > { %v760_v37 = vpop.f32.mrf.mxu0 }
 0x114   : > { %v3625_v43 = vadd.f32 %v2829_v20, %v823_v12  ;;  %v821_v52 = vadd.f32 %v760_v37, %v564_v27  ;;  %v965_v57 = vpop.f32.mrf.mxu1 }
 0x115   : > { %v2800_v1 = vpop.f32.mrf.mxu0 }
 0x116   : > { %v3627_v7 = vadd.f32 %v965_v57, %v821_v52  ;;  %v826_v8 = vadd.f32 %v2800_v1, %v585_v29  ;;  %v2832_v13 = vpop.f32.mrf.mxu1 }
 0x117   : > { %v773_v26 = vpop.f32.mrf.mxu0 }
 0x118   : > { %v3629_v31 = vadd.f32 %v2832_v13, %v826_v8  ;;  %v824_v38 = vadd.f32 %v773_v26, %v577_v25  ;;  %v978_v49 = vpop.f32.mrf.mxu1 }
 0x119   : > { %v2801_v19 = vpop.f32.mrf.mxu0 }
 0x11a   : > { %v3631_v5 = vadd.f32 %v978_v49, %v824_v38  ;;  %v827_v23 = vadd.f32 %v2801_v19, %v588_v35  ;;  %v2833_v24 = vpop.f32.mrf.mxu1 }
 0x11b   : > { %v776_v28 = vpop.f32.mrf.mxu0 }
 0x11c   : > { %v3633_v11 = vadd.f32 %v2833_v24, %v827_v23  ;;  %v825_v27 = vadd.f32 %v776_v28, %v580_v40  ;;  %v981_v30 = vpop.f32.mrf.mxu1 }
 0x11d   : > { %v2804_v32 = vpop.f32.mrf.mxu0 }
 0x11e   : > { %v3635_v33 = vadd.f32 %v981_v30, %v825_v27  ;;  %v830_v29 = vadd.f32 %v2804_v32, %v601_v45  ;;  %v2836_v34 = vpop.f32.mrf.mxu1 }
 0x11f   : > { %v789_v36 = vpop.f32.mrf.mxu0 }
 0x120   : > { %v3637_v39 = vadd.f32 %v2836_v34, %v830_v29  ;;  %v828_v25 = vadd.f32 %v789_v36, %v593_v16  ;;  %v994_v41 = vpop.f32.mrf.mxu1 }
 0x121   : > { %v2805_v42 = vpop.f32.mrf.mxu0 }
 0x122   : > { %v3639_v46 = vadd.f32 %v994_v41, %v828_v25  ;;  %v831_v35 = vadd.f32 %v2805_v42, %v604_v50  ;;  %v2837_v47 = vpop.f32.mrf.mxu1 }
 0x123   : > { %v792_v21 = vpop.f32.mrf.mxu0 }
 0x124   : > { %v3641_v48 = vadd.f32 %v2837_v47, %v831_v35  ;;  %v829_v40 = vadd.f32 %v792_v21, %v596_v54  ;;  %v997_v51 = vpop.f32.mrf.mxu1 }
 0x125   : > { %v2808_v53 = vpop.f32.mrf.mxu0 }
 0x126   : > { %v3643_v56 = vadd.f32 %v997_v51, %v829_v40  ;;  %v834_v45 = vadd.f32 %v2808_v53, %v617_v59  ;;  %v2840_v58 = vpop.f32.mrf.mxu1 }
 0x127   : > { %v805_v60 = vpop.f32.mrf.mxu0 }
 0x128   : > { %v3645_v61 = vadd.f32 %v2840_v58, %v834_v45  ;;  %v832_v16 = vadd.f32 %v805_v60, %v609_v44  ;;  %v1010_v55 = vpop.f32.mrf.mxu1 }
 0x129   : > { %v2809_v62 = vpop.f32.mrf.mxu0 }
 0x12a   : > { %v3647_v2 = vadd.f32 %v1010_v55, %v832_v16  ;;  %v835_v50 = vadd.f32 %v2809_v62, %v620_v0  ;;  %v2841_v3 = vpop.f32.mrf.mxu1 }
 0x12b   : > { %v808_v6 = vpop.f32.mrf.mxu0 }
 0x12c   : > { %v3649_v9 = vadd.f32 %v2841_v3, %v835_v50  ;;  %v833_v54 = vadd.f32 %v808_v6, %v612_v4  ;;  %v1013_v10 = vpop.f32.mrf.mxu1 }
 0x12d   : > { %v2860_v14 = vpop.f32.mrf.mxu0 }
 0x12e   : > { %v3651_v17 = vadd.f32 %v1013_v10, %v833_v54  ;;  %v3653_v59 = vpop.f32.mrf.mxu1 }
 0x12f   : > { %v1217_v63 = vpop.f32.mrf.mxu0 }
 0x130   : > { %v1429_v18 = vpop.f32.mrf.mxu1 }
 0x131   : > { %v2861_v12 = vpop.f32.mrf.mxu0 }
 0x132   : > { %v2893_v44 = vpop.f32.mrf.mxu1 }
 0x133   : > { %v1220_v20 = vpop.f32.mrf.mxu0 }
 0x134   : > { %v1432_v37 = vpop.f32.mrf.mxu1 }
 0x135   : > { %v2864_v52 = vpop.f32.mrf.mxu0 }
 0x136   : > { %v2896_v57 = vpop.f32.mrf.mxu1 }
 0x137   : > { %v1233_v0 = vpop.f32.mrf.mxu0 }
 0x138   : > { %v1445_v1 = vpop.f32.mrf.mxu1 }
 0x139   : > { %v2865_v8 = vpop.f32.mrf.mxu0 }
 0x13a   : > { %v2897_v13 = vpop.f32.mrf.mxu1 }
 0x13b   : > { %v1236_v26 = vpop.f32.mrf.mxu0 }
 0x13c   : > { %v3655_v4 = vpop.f32.mrf.mxu1 }
 0x13d   : > { %v2868_v38 = vpop.f32.mrf.mxu0 }
 0x13e   : > { %v2900_v49 = vpop.f32.mrf.mxu1 }
 0x13f   : > { %v1249_v19 = vpop.f32.mrf.mxu0 }
 0x140   : > { %v3657_v23 = vpop.f32.mrf.mxu1 }
 0x141   : > { %v2869_v24 = vpop.f32.mrf.mxu0 }
 0x142   : > { %v3659_v28 = vpop.f32.mrf.mxu1 }
 0x143   : > { %v1252_v27 = vpop.f32.mrf.mxu0 }
 0x144   : > { %v3661_v30 = vpop.f32.mrf.mxu1 }
 0x145   : > { %3803 = vst [vmem:[#allocation2_spill] sm:$0xff] %v3661_v30  ;;  %v2872_v32 = vpop.f32.mrf.mxu0 }
 0x146   : > { %v3663_v29 = vpop.f32.mrf.mxu1 }
 0x147   : > { %3804 = vst [vmem:[#allocation3_spill] sm:$0xff] %v3663_v29  ;;  %v1265_v34 = vpop.f32.mrf.mxu0  ;;  %v1290_v29 = vadd.f32 %v2868_v38, %v3637_v39  ;;  %v1291_v39 = vadd.f32 %v2869_v24, %v3641_v48 }
 0x148   : > { %v3665_v36 = vpop.f32.mrf.mxu1 }
 0x149   : > { %3805 = vst [vmem:[#allocation4_spill] sm:$0xff] %v3665_v36  ;;  %v2873_v25 = vpop.f32.mrf.mxu0 }
 0x14a   : > { %v3667_v41 = vpop.f32.mrf.mxu1 }
 0x14b   : > { %3806 = vst [vmem:[#allocation5_spill] sm:$0xff] %v3667_v41  ;;  %v1268_v42 = vpop.f32.mrf.mxu0  ;;  %v1283_v41 = vadd.f32 %v2861_v12, %v3625_v43 }
 0x14c   : > { %v3669_v35 = vpop.f32.mrf.mxu1 }
 0x14d   : > { %3807 = vst [vmem:[#allocation6_spill] sm:$0xff] %v3669_v35  ;;  %v2924_v47 = vpop.f32.mrf.mxu0  ;;  %v1495_v43 = vadd.f32 %v2893_v44, %v1283_v41 }
 0x14e   : > { %v3671_v21 = vpop.f32.mrf.mxu1 }
 0x14f   : > { %3808 = vst [vmem:[#allocation7_spill] sm:$0xff] %v3671_v21  ;;  %v1634_v40 = vpop.f32.mrf.mxu0 }
 0x150   : > { %v3673_v51 = vpop.f32.mrf.mxu1 }
 0x151   : > { %3809 = vst [vmem:[#allocation8_spill] sm:$0xff] %v3673_v51  ;;  %v2925_v53 = vpop.f32.mrf.mxu0 }
 0x152   : > { %v3675_v45 = vpop.f32.mrf.mxu1 }
 0x153   : > { %3810 = vst [vmem:[#allocation9_spill] sm:$0xff] %v3675_v45  ;;  %v1637_v58 = vpop.f32.mrf.mxu0 }
 0x154   : > { %v3677_v60 = vpop.f32.mrf.mxu1 }
 0x155   : > { %3811 = vst [vmem:[#allocation10_spill] sm:$0xff] %v3677_v60  ;;  %v2928_v16 = vpop.f32.mrf.mxu0  ;;  %v1282_v60 = vadd.f32 %v2860_v14, %v3621_v15  ;;  %v1288_v14 = vadd.f32 %v1249_v19, %v3639_v46  ;;  %v1295_v46 = vadd.f32 %v2873_v25, %v3649_v9  ;;  %v3819_v9 = vld [vmem:[#allocation2_spill] sm:$0xff]  ;;  %v3822_v25 = vld [vmem:[#allocation5_spill] sm:$0xff] }
 0x156   : > { %v3679_v55 = vpop.f32.mrf.mxu1 }
 0x157   : > { %3812 = vst [vmem:[#allocation11_spill] sm:$0xff] %v3679_v55  ;;  %v1650_v62 = vpop.f32.mrf.mxu0  ;;  %v1280_v55 = vadd.f32 %v1217_v63, %v3623_v22  ;;  %v1494_v15 = vadd.f32 %v3653_v59, %v1282_v60  ;;  %v1294_v59 = vadd.f32 %v2872_v32, %v3645_v61  ;;  %v3820_v32 = vld [vmem:[#allocation3_spill] sm:$0xff]  ;;  %v1507_v41 = vadd.f32 %v3822_v25, %v1295_v46 }
 0x158   : > { %v3681_v50 = vpop.f32.mrf.mxu1 }
 0x159   : > { %3813 = vst [vmem:[#allocation12_spill] sm:$0xff] %v3681_v50  ;;  %v3683_v3 = vpop.f32.mrf.mxu0  ;;  %v1492_v22 = vadd.f32 %v1429_v18, %v1280_v55  ;;  %v1292_v18 = vadd.f32 %v1265_v34, %v3647_v2  ;;  %v1699_v44 = vadd.f32 %v2924_v47, %v1494_v15  ;;  %v1503_v2 = vadd.f32 %v3659_v28, %v1291_v39 }
 0x15a   : > { %3814 = vst [vmem:[#allocation13_spill] sm:$0xff] %v3683_v3  ;;  %v3685_v6 = vpop.f32.mrf.mxu1  ;;  %v1281_v3 = vadd.f32 %v1220_v20, %v3627_v7  ;;  %v3826_v55 = vld [vmem:[#allocation9_spill] sm:$0xff] }
 0x15b   : > { %3815 = vst [vmem:[#allocation14_spill] sm:$0xff] %v3685_v6  ;;  %v3687_v54 = vpop.f32.mrf.mxu0  ;;  %v1286_v6 = vadd.f32 %v2864_v52, %v3629_v31  ;;  %v1502_v52 = vadd.f32 %v2900_v49, %v1290_v29  ;;  %v3821_v29 = vld [vmem:[#allocation4_spill] sm:$0xff] }
 0x15c   : > { %3816 = vst [vmem:[#allocation15_spill] sm:$0xff] %v3687_v54  ;;  %v3689_v10 = vpop.f32.mrf.mxu1  ;;  %v1284_v54 = vadd.f32 %v1233_v0, %v3631_v5  ;;  %v1493_v63 = vadd.f32 %v1432_v37, %v1281_v3  ;;  %v1285_v5 = vadd.f32 %v1236_v26, %v3635_v33  ;;  %v1289_v0 = vadd.f32 %v1252_v27, %v3643_v56  ;;  %v3827_v3 = vld [vmem:[#allocation10_spill] sm:$0xff] }
 0x15d   : > { %3817 = vst [vmem:[#allocation16_spill] sm:$0xff] %v3689_v10  ;;  %v2932_v51 = vpop.f32.mrf.mxu0  ;;  %v1287_v10 = vadd.f32 %v2865_v8, %v3633_v11  ;;  %v1498_v31 = vadd.f32 %v2896_v57, %v1286_v6  ;;  %v1500_v33 = vadd.f32 %v3657_v23, %v1288_v14  ;;  %v1293_v57 = vadd.f32 %v1268_v42, %v3651_v17 }
 0x15e   : > { %v2964_v35 = vpop.f32.mrf.mxu1  ;;  %v1496_v12 = vadd.f32 %v1445_v1, %v1284_v54  ;;  %v1697_v1 = vadd.f32 %v1634_v40, %v1492_v22  ;;  %v1497_v48 = vadd.f32 %v3655_v4, %v1285_v5  ;;  %v1700_v56 = vadd.f32 %v2925_v53, %v1495_v43  ;;  %v3823_v4 = vld [vmem:[#allocation7_spill] sm:$0xff]  ;;  %v3824_v40 = vld [vmem:[#allocation6_spill] sm:$0xff]  ;;  %v3825_v53 = vld [vmem:[#allocation8_spill] sm:$0xff] }
 0x15f   : > { %v1666_v45 = vpop.f32.mrf.mxu0  ;;  %v1499_v11 = vadd.f32 %v2897_v13, %v1287_v10  ;;  %v1707_v13 = vadd.f32 %v2932_v51, %v1502_v52  ;;  %v1698_v38 = vadd.f32 %v1637_v58, %v1493_v63  ;;  %v1703_v49 = vadd.f32 %v2928_v16, %v1498_v31  ;;  %v3828_v54 = vld [vmem:[#allocation11_spill] sm:$0xff] }
 0x160   : > { %v3691_v21 = vpop.f32.mrf.mxu1  ;;  %v1501_v19 = vadd.f32 %v3819_v9, %v1289_v0  ;;  %v1701_v24 = vadd.f32 %v1650_v62, %v1496_v12  ;;  %v1705_v27 = vadd.f32 %v1666_v45, %v1500_v33  ;;  %v1506_v17 = vadd.f32 %v3820_v32, %v1294_v59  ;;  %v3735_v45 = vld [vmem:[%s3801_s2] ss:$0 sm:$0xff]  ;;  %v3829_v43 = vld [vmem:[#allocation12_spill] sm:$0xff] }
 0x161   : > { %3818 = vst [vmem:[#allocation17_spill] sm:$0xff] %v3691_v21  ;;  %v2933_v50 = vpop.f32.mrf.mxu0  ;;  %v1504_v34 = vadd.f32 %v3821_v29, %v1292_v18  ;;  %v1954_v42 = vadd.f32 %v3823_v4, %v1699_v44  ;;  %v1505_v51 = vadd.f32 %v3824_v40, %v1293_v57  ;;  %v1952_v28 = vadd.f32 %v3825_v53, %v1697_v1  ;;  %v3831_v5 = vld [vmem:[#allocation13_spill] sm:$0xff] }
 0x162   : > { %v3699_v36 = vpop.f32.mrf.mxu1  ;;  %v1962_v58 = vadd.f32 %v2964_v35, %v1707_v13  ;;  %v1708_v60 = vadd.f32 %v2933_v50, %v1503_v2  ;;  %v1955_v62 = vadd.f32 %v3826_v55, %v1700_v56  ;;  %v1953_v6 = vadd.f32 %v3827_v3, %v1698_v38 }
 0x163   : > { %v1669_v21 = vpop.f32.mrf.mxu0  ;;  %v1958_v10 = vadd.f32 %v3828_v54, %v1703_v49  ;;  %v1956_v14 = vadd.f32 %v3829_v43, %v1701_v24  ;;  %v1704_v52 = vadd.f32 %v3831_v5, %v1499_v11  ;;  %v3832_v46 = vld [vmem:[#allocation15_spill] sm:$0xff] }
 0x164   : > { %v3703_v30 = vpop.f32.mrf.mxu1  ;;  %v1706_v50 = vadd.f32 %v1669_v21, %v1501_v19  ;;  %v1702_v44 = vadd.f32 %v3832_v46, %v1497_v48  ;;  %v1963_v33 = vadd.f32 %v3699_v36, %v1708_v60 }
 0x165   : > { %v2936_v7 = vpop.f32.mrf.mxu0 }
 0x166   : > { %v3708_v20 = vpop.f32.mrf.mxu1  ;;  %v1711_v39 = vadd.f32 %v2936_v7, %v1506_v17  ;;  %v1961_v48 = vadd.f32 %v3703_v30, %v1706_v50 }
 0x167   : > { %v1682_v8 = vpop.f32.mrf.mxu0 }
 0x168   : > { %v3715_v37 = vpop.f32.mrf.mxu1  ;;  %v3830_v63 = vld [vmem:[#allocation17_spill] sm:$0xff]  ;;  %v1709_v11 = vadd.f32 %v1682_v8, %v1504_v34  ;;  %v1966_v19 = vadd.f32 %v3708_v20, %v1711_v39 }
 0x169   : > { %v2937_v26 = vpop.f32.mrf.mxu0  ;;  %v1960_v35 = vadd.f32 %v3830_v63, %v1705_v27 }
 0x16a   : > { %v3720_v61 = vpop.f32.mrf.mxu1  ;;  %v1712_v17 = vadd.f32 %v2937_v26, %v1507_v41  ;;  %v1964_v4 = vadd.f32 %v3715_v37, %v1709_v11 }
 0x16b   : > { %v1685_v23 = vpop.f32.mrf.mxu0 }
 0x16c   : > { %v3728_v47 = vpop.f32.mrf.mxu1  ;;  %v1967_v54 = vadd.f32 %v3720_v61, %v1712_v17 }
 0x16d   : > { %v2988_v16 = vpop.f32.mrf.mxu0 }
 0x16e   : > { %v2166_v15 = vadd.f32 %v2988_v16, %v1954_v42  ;;  %v2996_v22 = vpop.f32.mrf.mxu1  ;;  %v3833_v16 = vld [vmem:[#allocation14_spill] sm:$0xff] }
 0x16f   : > { %v2174_v31 = vadd.f32 %v2996_v22, %v1962_v58  ;;  %v2101_v12 = vpop.f32.mrf.mxu0  ;;  %v1959_v55 = vadd.f32 %v3833_v16, %v1704_v52  ;;  %v3834_v22 = vld [vmem:[#allocation16_spill] sm:$0xff] }
 0x170   : > { %v2189_v0 = vadd.f32 %v3735_v45, %v2166_v15  ;;  %v2164_v59 = vadd.f32 %v2101_v12, %v1952_v28  ;;  %v2133_v18 = vpop.f32.mrf.mxu1  ;;  %v1710_v28 = vadd.f32 %v1685_v23, %v1505_v51  ;;  %v1957_v43 = vadd.f32 %v3834_v22, %v1702_v44 }
 0x171   : > { %v2197_v21 = vadd.f32 %v3735_v45, %v2174_v31  ;;  %v2172_v57 = vadd.f32 %v2133_v18, %v1960_v35  ;;  %v2989_v1 = vpop.f32.mrf.mxu0 }
 0x172   : > { %v2205_v7 = vmax.f32 %v2189_v0, 0.0  ;;  %v2187_v13 = vadd.f32 %v3735_v45, %v2164_v59  ;;  %v2167_v56 = vadd.f32 %v2989_v1, %v1955_v62  ;;  %v2997_v38 = vpop.f32.mrf.mxu1 }
 0x173   : > { %v2213_v36 = vmax.f32 %v2197_v21, 0.0  ;;  %v2195_v49 = vadd.f32 %v3735_v45, %v2172_v57  ;;  %v2175_v2 = vadd.f32 %v2997_v38, %v1963_v33  ;;  %v2104_v9 = vpop.f32.mrf.mxu0 }
 0x174   : > { %2221 = vst [vmem:[%s3750_s5 + $0x10] sm:$0xff] %v2205_v7  ;;  %v2203_v24 = vmax.f32 %v2187_v13, 0.0  ;;  %v2190_v8 = vadd.f32 %v3735_v45, %v2167_v56  ;;  %v2165_v27 = vadd.f32 %v2104_v9, %v1953_v6  ;;  %v2136_v32 = vpop.f32.mrf.mxu1 }
 0x175   : > { %2229 = vst [vmem:[%s3750_s5 + $0x50] sm:$0xff] %v2213_v36  ;;  %v2211_v29 = vmax.f32 %v2195_v49, 0.0  ;;  %v2198_v30 = vadd.f32 %v3735_v45, %v2175_v2  ;;  %v2173_v34 = vadd.f32 %v2136_v32, %v1961_v48  ;;  %v2992_v25 = vpop.f32.mrf.mxu0 }
 0x176   : > { %2219 = vst [vmem:[%s3750_s5] sm:$0xff] %v2203_v24  ;;  %v2206_v42 = vmax.f32 %v2190_v8, 0.0  ;;  %v2188_v20 = vadd.f32 %v3735_v45, %v2165_v27  ;;  %v2170_v40 = vadd.f32 %v2992_v25, %v1958_v10  ;;  %v3000_v53 = vpop.f32.mrf.mxu1 }
 0x177   : > { %2227 = vst [vmem:[%s3750_s5 + $0x40] sm:$0xff] %v2211_v29  ;;  %v2214_v58 = vmax.f32 %v2198_v30, 0.0  ;;  %v2196_v26 = vadd.f32 %v3735_v45, %v2173_v34  ;;  %v2178_v41 = vadd.f32 %v3000_v53, %v1966_v19  ;;  %v2117_v60 = vpop.f32.mrf.mxu0 }
 0x178   : > { %2222 = vst [vmem:[%s3750_s5 + $0x18] sm:$0xff] %v2206_v42  ;;  %v2204_v62 = vmax.f32 %v2188_v20, 0.0  ;;  %v2193_v37 = vadd.f32 %v3735_v45, %v2170_v40  ;;  %v2168_v3 = vadd.f32 %v2117_v60, %v1956_v14  ;;  %v2149_v6 = vpop.f32.mrf.mxu1  ;;  %v1965_v14 = vadd.f32 %v3728_v47, %v1710_v28 }
 0x179   : > { %2230 = vst [vmem:[%s3750_s5 + $0x58] sm:$0xff] %v2214_v58  ;;  %v2212_v23 = vmax.f32 %v2196_v26, 0.0  ;;  %v2201_v51 = vadd.f32 %v3735_v45, %v2178_v41  ;;  %v2176_v10 = vadd.f32 %v2149_v6, %v1964_v4  ;;  %v2993_v15 = vpop.f32.mrf.mxu0 }
 0x17a   : > { %2220 = vst [vmem:[%s3750_s5 + $0x8] sm:$0xff] %v2204_v62  ;;  %v2209_v63 = vmax.f32 %v2193_v37, 0.0  ;;  %v2191_v35 = vadd.f32 %v3735_v45, %v2168_v3  ;;  %v2171_v50 = vadd.f32 %v2993_v15, %v1959_v55  ;;  %v3001_v31 = vpop.f32.mrf.mxu1 }
 0x17b   : > { %2228 = vst [vmem:[%s3750_s5 + $0x48] sm:$0xff] %v2212_v23  ;;  %v2217_v61 = vmax.f32 %v2201_v51, 0.0  ;;  %v2199_v12 = vadd.f32 %v3735_v45, %v2176_v10  ;;  %v2179_v5 = vadd.f32 %v3001_v31, %v1967_v54  ;;  %v2120_v52 = vpop.f32.mrf.mxu0 }
 0x17c   : > { %2225 = vst [vmem:[%s3750_s5 + $0x30] sm:$0xff] %v2209_v63  ;;  %v2207_v39 = vmax.f32 %v2191_v35, 0.0  ;;  %v2194_v0 = vadd.f32 %v3735_v45, %v2171_v50  ;;  %v2169_v59 = vadd.f32 %v2120_v52, %v1957_v43  ;;  %v2152_v18 = vpop.f32.mrf.mxu1 }
 0x17d   : > { %2233 = vst [vmem:[%s3750_s5 + $0x70] sm:$0xff] %v2217_v61  ;;  %v2215_v46 = vmax.f32 %v2199_v12, 0.0  ;;  %v2202_v47 = vadd.f32 %v3735_v45, %v2179_v5  ;;  %v2177_v44 = vadd.f32 %v2152_v18, %v1965_v14 }
 0x17e   : > { %2223 = vst [vmem:[%s3750_s5 + $0x20] sm:$0xff] %v2207_v39  ;;  %v2210_v33 = vmax.f32 %v2194_v0, 0.0  ;;  %v2192_v21 = vadd.f32 %v3735_v45, %v2169_v59 }
 0x17f   : > { %2231 = vst [vmem:[%s3750_s5 + $0x60] sm:$0xff] %v2215_v46  ;;  %v2218_v57 = vmax.f32 %v2202_v47, 0.0  ;;  %v2200_v1 = vadd.f32 %v3735_v45, %v2177_v44 }
 0x180   : > { %2226 = vst [vmem:[%s3750_s5 + $0x38] sm:$0xff] %v2210_v33  ;;  %v2208_v11 = vmax.f32 %v2192_v21, 0.0 }
 0x181   : > { %2234 = vst [vmem:[%s3750_s5 + $0x78] sm:$0xff] %v2218_v57  ;;  %v2216_v7 = vmax.f32 %v2200_v1, 0.0 }
 0x182   : > { %2224 = vst [vmem:[%s3750_s5 + $0x28] sm:$0xff] %v2208_v11 }
 0x183   : > { %2232 = vst [vmem:[%s3750_s5 + $0x68] sm:$0xff] %v2216_v7 }
 0x184 PF: > { %s13_s14 = sadd.s32 1, %s3137_s14   ;;  %s3835_s12 = smov %s3133_s13 }
 0x185   : > { %p10_p5 = scmp.ge.s32.totalorder %s13_s14, 4   ;;  %s3836_s13 = smov %s3838_s15 }
 0x187   :  { %12 = sbr.rel (!%p10_p5) target bundleno = 2 (0x2), region = 73 }

// kernel: _lambda_.9
= control target key start
LH: loop header
LB: loop body
LE: loop exit
PB: predicated region body
PF: predicated region fallthrough
CT: control target
= control target key end

     0   :  { %s2742_s18 = smov 0   ;;  %s2744_s19 = smov 0   ;;  %s3406_s0 = inlined_call_operand.vmem [shape: f32[2,56,128], index: 0, kind: input, shape index: {}]   ;;  %s3407_s1 = inlined_call_operand.vmem [shape: bf16[9,128,256], index: 1, kind: input, shape index: {}]   ;;  %s3408_s2 = inlined_call_operand.vmem [shape: f32[1,256], index: 2, kind: input, shape index: {}]   ;;  %s3409_s3 = inlined_call_operand.vmem [shape: bf16[256,128], index: 3, kind: input, shape index: {}]   ;;  %s3410_s4 = inlined_call_operand.vmem [shape: f32[1,128], index: 4, kind: input, shape index: {}]   ;;  %s3411_s5 = inlined_call_operand.vmem [shape: f32[2,32,128], index: 5, kind: output, shape index: {}]  }
   0x1   :  { %s2746_s20 = smov 0  }
   0x2 LB: > { %s27_s21 = sadd.s32 1, %s2705_s19  ;;  %p2095_p0 = scmp.ge.s32.totalorder %s2709_s20, 1  ;;  %s2709_s20 = sphi %s2746_s20, %s15_s20   ;;  %s2705_s19 = sphi %s2744_s19, %s3427_s19   ;;  %s2701_s18 = sphi %s2742_s18, %s3426_s18  }
   0x3   : > { %p29_p1 = scmp.ge.s32.totalorder %s27_s21, 2  ;;  %p201_p2 = scmp.lt.s32.totalorder %s2709_s20, 3 }
   0x5   : > { %s3429_s21 = smov (%p29_p1, %s27_s21), 0  ;;  %p202_p3 = pnand %p2095_p0, %p201_p2 }
   0x7   : > { %205 = sbr.rel (%p202_p3) target bundleno = 594 (0x252), region = 40 }
   0xc   : > { %v2455_v0 = vld [vmem:[%s3407_s1 + $0xf4] ss:$8 sps:$4 sm:$0xff]   ;;  %v2711_v2 = vmov 0   ;;  %v2459_v3 = vld [vmem:[%s3407_s1 + $0xf0] ss:$8 sps:$4 sm:$0xff]   ;;  %p233_p4 = scmp.lt.s32.totalorder %s2701_s18, 1 }
   0xd   : > { %v2457_v1 = vld [vmem:[%s3407_s1 + $0x74] ss:$8 sps:$4 sm:$0xff]   ;;  %427 = vmatprep.mubr.bf16.mxu0 %v2711_v2  ;;  %560 = vmatprep.mubr.bf16.mxu1 %v2711_v2  ;;  %v2460_v4 = vld [vmem:[%s3407_s1 + $0x70] ss:$8 sps:$4 sm:$0xff]   ;;  %v2461_v5 = vld [vmem:[%s3407_s1 + $0xe4] ss:$8 sps:$4 sm:$0xff]  }
   0xe   : > { %395 = vmatprep.subr.bf16.mxu0 %v2455_v0  ;;  %528 = vmatprep.subr.bf16.mxu1 %v2457_v1  ;;  %v2463_v6 = vld [vmem:[%s3407_s1 + $0x64] ss:$8 sps:$4 sm:$0xff]   ;;  %v2465_v7 = vld [vmem:[%s3407_s1 + $0xe0] ss:$8 sps:$4 sm:$0xff]   ;;  %v2467_v9 = vld [vmem:[%s3407_s1 + $0xd4] ss:$8 sps:$4 sm:$0xff]  }
   0xf   : > { %396 = vmatpush1.bf16.msra.mxu0 %v2459_v3  ;;  %529 = vmatpush1.bf16.msra.mxu1 %v2460_v4  ;;  %v2466_v8 = vld [vmem:[%s3407_s1 + $0x60] ss:$8 sps:$4 sm:$0xff]   ;;  %v2469_v10 = vld [vmem:[%s3407_s1 + $0x54] ss:$8 sps:$4 sm:$0xff]   ;;  %v2471_v11 = vld [vmem:[%s3407_s1 + $0xd0] ss:$8 sps:$4 sm:$0xff]  }
  0x10   : > { %397 = vmatprep.subr.bf16.mxu0 %v2461_v5  ;;  %530 = vmatprep.subr.bf16.mxu1 %v2463_v6  ;;  %v2472_v12 = vld [vmem:[%s3407_s1 + $0x50] ss:$8 sps:$4 sm:$0xff]   ;;  %v2473_v13 = vld [vmem:[%s3407_s1 + $0xc4] ss:$8 sps:$4 sm:$0xff]   ;;  %s3431_s18 = smov (!%p233_p4, %s2701_s18), 1  ;;  %vm601_vm1 = vcmask 1046528  }
  0x11   : > { %v2475_v14 = vld [vmem:[%s3407_s1 + $0x44] ss:$8 sps:$4 sm:$0xff]   ;;  %v2477_v15 = vld [vmem:[%s3407_s1 + $0xc0] ss:$8 sps:$4 sm:$0xff]   ;;  %v2479_v17 = vld [vmem:[%s3407_s1 + $0xb4] ss:$8 sps:$4 sm:$0xff]  }
  0x12   : > { %v2478_v16 = vld [vmem:[%s3407_s1 + $0x40] ss:$8 sps:$4 sm:$0xff]   ;;  %v2481_v18 = vld [vmem:[%s3407_s1 + $0x34] ss:$8 sps:$4 sm:$0xff]   ;;  %s2429_s12 = smul.u32 56, %s3431_s18  ;;  %s2400_s17 = sshll.u32 %s3431_s18, 5 }
  0x13   : > { %398 = vmatpush1.bf16.msra.mxu0 %v2465_v7  ;;  %531 = vmatpush1.bf16.msra.mxu1 %v2466_v8  ;;  %v2483_v19 = vld [vmem:[%s3407_s1 + $0xb0] ss:$8 sps:$4 sm:$0xff]   ;;  %v2485_v21 = vld [vmem:[%s3407_s1 + $0xa4] ss:$8 sps:$4 sm:$0xff]   ;;  %v2489_v23 = vld [vmem:[%s3407_s1 + $0xa0] ss:$8 sps:$4 sm:$0xff]   ;;  %s246_s26 = scalar_lea.vmem %s3411_s5, %s2400_s17 }
  0x14   : > { %399 = vmatprep.subr.bf16.mxu0 %v2467_v9  ;;  %532 = vmatprep.subr.bf16.mxu1 %v2469_v10  ;;  %v2484_v20 = vld [vmem:[%s3407_s1 + $0x30] ss:$8 sps:$4 sm:$0xff]   ;;  %v2487_v22 = vld [vmem:[%s3407_s1 + $0x24] ss:$8 sps:$4 sm:$0xff]   ;;  %s2838_s27 = scalar_lea.vmem %s3406_s0, %s2429_s12  ;;  %v2490_v24 = vld [vmem:[%s3407_s1 + $0x20] ss:$8 sps:$4 sm:$0xff]  }
  0x15   : > { %v2491_v25 = vld [vmem:[%s3407_s1 + $0x94] ss:$8 sps:$4 sm:$0xff]   ;;  %v251_v27 = vld [vmem:[%s2838_s27] sm:$0xff]  ;;  %v2854_v28 = vld [vmem:[%s2838_s27 + $0x8] sm:$0xff]  ;;  %vm292_vm0 = vsmask.f32 7424 }
  0x16   : > { %v2493_v26 = vld [vmem:[%s3407_s1 + $0x14] ss:$8 sps:$4 sm:$0xff]   ;;  %v2863_v31 = vpack.c.bf16 %v2854_v28, %v251_v27  ;;  %v2495_v32 = vld [vmem:[%s3407_s1 + $0x90] ss:$8 sps:$4 sm:$0xff]   ;;  %v2497_v35 = vld [vmem:[%s3407_s1 + $0x84] ss:$8 sps:$4 sm:$0xff]  }
  0x17   : > { %400 = vmatpush1.bf16.msra.mxu0 %v2471_v11  ;;  %533 = vmatpush1.bf16.msra.mxu1 %v2472_v12  ;;  %v2857_v29 = vld [vmem:[%s2838_s27 + $0x10] sm:$0xff]  ;;  %v2860_v30 = vld [vmem:[%s2838_s27 + $0x18] sm:$0xff]  ;;  %v2499_v38 = vld [vmem:[%s3407_s1 + $0x4] ss:$8 sps:$4 sm:$0xff]  }
  0x18   : > { %401 = vmatprep.subr.bf16.mxu0 %v2473_v13  ;;  %534 = vmatprep.subr.bf16.mxu1 %v2475_v14  ;;  %v2496_v33 = vld [vmem:[%s3407_s1 + $0x10] ss:$8 sps:$4 sm:$0xff]   ;;  %v2873_v34 = vpack.c.bf16 %v2860_v30, %v2857_v29  ;;  %v294_v36 = vshrl.u32 %v2863_v31, 16  ;;  %v296_v37 = vshll.u32 %v2863_v31, 16  ;;  %v2501_v40 = vld [vmem:[%s3407_s1 + $0x80] ss:$8 sps:$4 sm:$0xff]  }
  0x19   : > { %v2502_v42 = vld [vmem:[%s3407_s1] ss:$8 sps:$4 sm:$0xff]   ;;  %v2505_v46 = vld [vmem:[%s3407_s1 + $0x174] ss:$8 sps:$4 sm:$0xff]   ;;  %v2503_v49 = vld [vmem:[%s3407_s1 + $0x170] ss:$8 sps:$4 sm:$0xff]  }
  0x1a   : > { %v301_v39 = vshll.u32 %v2873_v34, 16  ;;  %v298_v41 = vrot.slane %v296_v37, 1  ;;  %v305_v44 = vshrl.u32 %v2873_v34, 16  ;;  %v2508_v47 = vld [vmem:[%s3407_s1 + $0x1f4] ss:$8 sps:$4 sm:$0xff]   ;;  %v3039_v37 = vld [vmem:[%s2838_s27 + $0x20] sm:$0xff] }
  0x1b   : > { %402 = vmatpush1.bf16.msra.mxu0 %v2477_v15  ;;  %535 = vmatpush1.bf16.msra.mxu1 %v2478_v16  ;;  %v2506_v50 = vld [vmem:[%s3407_s1 + $0x1f0] ss:$8 sps:$4 sm:$0xff]   ;;  %v2511_v52 = vld [vmem:[%s3407_s1 + $0x164] ss:$8 sps:$4 sm:$0xff]   ;;  %v2509_v54 = vld [vmem:[%s3407_s1 + $0x160] ss:$8 sps:$4 sm:$0xff]  }
  0x1c   : > { %403 = vmatprep.subr.bf16.mxu0 %v2479_v17  ;;  %536 = vmatprep.subr.bf16.mxu1 %v2481_v18  ;;  %v303_v43 = vrot.slane %v301_v39, 1  ;;  %v299_v45 = vor.u32 %v298_v41, %v294_v36  ;;  %v2514_v53 = vld [vmem:[%s3407_s1 + $0x1e4] ss:$8 sps:$4 sm:$0xff]   ;;  %v2512_v55 = vld [vmem:[%s3407_s1 + $0x1e0] ss:$8 sps:$4 sm:$0xff]   ;;  %v3054_v41 = vpack.c.bf16 %v3039_v37, %v2860_v30 }
  0x1d   : > { %v255_v56 = vld [vmem:[%s2838_s27 + $0x20] sm:$0x3]  ;;  %v2517_v57 = vld [vmem:[%s3407_s1 + $0x154] ss:$8 sps:$4 sm:$0xff]   ;;  %v2515_v60 = vld [vmem:[%s3407_s1 + $0x150] ss:$8 sps:$4 sm:$0xff]  }
  0x1e   : > { %v2897_v48 = vor.u32 %v305_v44, %v303_v43  ;;  %v304_v51 = vsel %vm292_vm0, %v299_v45, %v303_v43  ;;  %v2520_v58 = vld [vmem:[%s3407_s1 + $0x1d4] ss:$8 sps:$4 sm:$0xff]   ;;  %v2926_v59 = vpack.c.bf16 %v255_v56, %v255_v56  ;;  %v2518_v62 = vld [vmem:[%s3407_s1 + $0x1d0] ss:$8 sps:$4 sm:$0xff]   ;;  %v2523_v63 = vld [vmem:[%s3407_s1 + $0x144] ss:$8 sps:$4 sm:$0xff]  }
  0x1f   : > { %404 = vmatpush1.bf16.msra.mxu0 %v2483_v19  ;;  %537 = vmatpush1.bf16.msra.mxu1 %v2484_v20  ;;  %v2526_v0 = vld [vmem:[%s3407_s1 + $0x1c4] ss:$8 sps:$4 sm:$0xff]   ;;  %v2521_v3 = vld [vmem:[%s3407_s1 + $0x140] ss:$8 sps:$4 sm:$0xff]   ;;  %v2529_v6 = vld [vmem:[%s3407_s1 + $0x134] ss:$8 sps:$4 sm:$0xff]  }
  0x20   : > { %405 = vmatprep.subr.bf16.mxu0 %v2485_v21  ;;  %538 = vmatprep.subr.bf16.mxu1 %v2487_v22  ;;  %v309_v61 = vshll.u32 %v2926_v59, 16  ;;  %v2524_v5 = vld [vmem:[%s3407_s1 + $0x1c0] ss:$8 sps:$4 sm:$0xff]   ;;  %v2532_v7 = vld [vmem:[%s3407_s1 + $0x1b4] ss:$8 sps:$4 sm:$0xff]   ;;  %v602_v20 = vrot.slane %v2863_v31, 1 }
  0x21   : > { %v2527_v8 = vld [vmem:[%s3407_s1 + $0x130] ss:$8 sps:$4 sm:$0xff]   ;;  %v2535_v10 = vld [vmem:[%s3407_s1 + $0x124] ss:$8 sps:$4 sm:$0xff]   ;;  %v2533_v12 = vld [vmem:[%s3407_s1 + $0x120] ss:$8 sps:$4 sm:$0xff]  }
  0x22   : > { %v311_v1 = vrot.slane %v309_v61, 1  ;;  %v2530_v9 = vld [vmem:[%s3407_s1 + $0x1b0] ss:$8 sps:$4 sm:$0xff]   ;;  %v2538_v11 = vld [vmem:[%s3407_s1 + $0x1a4] ss:$8 sps:$4 sm:$0xff]   ;;  %v605_v36 = vrot.slane %v2926_v59, 1 }
  0x23   : > { %406 = vmatpush1.bf16.msra.mxu0 %v2489_v23  ;;  %539 = vmatpush1.bf16.msra.mxu1 %v2490_v24  ;;  %v2536_v13 = vld [vmem:[%s3407_s1 + $0x1a0] ss:$8 sps:$4 sm:$0xff]   ;;  %v2541_v14 = vld [vmem:[%s3407_s1 + $0x114] ss:$8 sps:$4 sm:$0xff]   ;;  %v2539_v16 = vld [vmem:[%s3407_s1 + $0x110] ss:$8 sps:$4 sm:$0xff]  }
  0x24   : > { %407 = vmatprep.subr.bf16.mxu0 %v2491_v25  ;;  %540 = vmatprep.subr.bf16.mxu1 %v2493_v26  ;;  %v312_v4 = vsel %vm292_vm0, %v2897_v48, %v311_v1  ;;  %v2544_v15 = vld [vmem:[%s3407_s1 + $0x194] ss:$8 sps:$4 sm:$0xff]   ;;  %v2542_v17 = vld [vmem:[%s3407_s1 + $0x190] ss:$8 sps:$4 sm:$0xff]   ;;  %v2547_v18 = vld [vmem:[%s3407_s1 + $0x104] ss:$8 sps:$4 sm:$0xff]   ;;  %v3014_v26 = vpack.c.bf16 %v2857_v29, %v2854_v28 }
  0x25   : > { %v2550_v19 = vld [vmem:[%s3407_s1 + $0x184] ss:$8 sps:$4 sm:$0xff]   ;;  %v2545_v21 = vld [vmem:[%s3407_s1 + $0x100] ss:$8 sps:$4 sm:$0xff]   ;;  %v3004_v23 = vrot.slane %v2873_v34, 1  ;;  %v943_v1 = vshll.u32 %v3054_v41, 16 }
  0x26   : > { %v2548_v22 = vld [vmem:[%s3407_s1 + $0x180] ss:$8 sps:$4 sm:$0xff]   ;;  %v2553_v24 = vld [vmem:[%s3407_s1 + $0x274] ss:$8 sps:$4 sm:$0xff]   ;;  %v2559_v28 = vld [vmem:[%s3407_s1 + $0x264] ss:$8 sps:$4 sm:$0xff]  }
  0x27   : > { %408 = vmatpush1.bf16.msra.mxu0 %v2495_v32  ;;  %541 = vmatpush1.bf16.msra.mxu1 %v2496_v33  ;;  %v2556_v25 = vld [vmem:[%s3407_s1 + $0x2f4] ss:$8 sps:$4 sm:$0xff]   ;;  %v604_v27 = vsel %vm601_vm1, %v602_v20, %v3004_v23  ;;  %v2554_v32 = vld [vmem:[%s3407_s1 + $0x2f0] ss:$8 sps:$4 sm:$0xff]   ;;  %v2562_v29 = vld [vmem:[%s3407_s1 + $0x2e4] ss:$8 sps:$4 sm:$0xff]  }
  0x28   : > { %409 = vmatprep.subr.bf16.mxu0 %v2497_v35  ;;  %542 = vmatprep.subr.bf16.mxu1 %v2499_v38  ;;  %v2557_v33 = vld [vmem:[%s3407_s1 + $0x260] ss:$8 sps:$4 sm:$0xff]   ;;  %v2565_v38 = vld [vmem:[%s3407_s1 + $0x254] ss:$8 sps:$4 sm:$0xff]   ;;  %v2566_v43 = vld [vmem:[%s3407_s1 + $0x2d0] ss:$8 sps:$4 sm:$0xff]  }
  0x29   : > { %v2560_v35 = vld [vmem:[%s3407_s1 + $0x2e0] ss:$8 sps:$4 sm:$0xff]   ;;  %v2568_v39 = vld [vmem:[%s3407_s1 + $0x2d4] ss:$8 sps:$4 sm:$0xff]   ;;  %v2571_v44 = vld [vmem:[%s3407_s1 + $0x244] ss:$8 sps:$4 sm:$0xff]  }
  0x2a   : > { %v2574_v30 = vld [vmem:[%s3407_s1 + $0x2c4] ss:$8 sps:$4 sm:$0xff]   ;;  %v2569_v45 = vld [vmem:[%s3407_s1 + $0x240] ss:$8 sps:$4 sm:$0xff]   ;;  %v936_v59 = vshrl.u32 %v3014_v26, 16 }
  0x2b   : > { %410 = vmatpush1.bf16.msra.mxu0 %v2501_v40  ;;  %543 = vmatpush1.bf16.msra.mxu1 %v2502_v42  ;;  %v2563_v40 = vld [vmem:[%s3407_s1 + $0x250] ss:$8 sps:$4 sm:$0xff]   ;;  %v606_v42 = vsel %vm601_vm1, %v3004_v23, %v605_v36  ;;  %v2584_v56 = vld [vmem:[%s3407_s1 + $0x2a0] ss:$8 sps:$4 sm:$0xff]   ;;  %v2610_v20 = vld [vmem:[%s3407_s1 + $0x3e4] ss:$8 sps:$4 sm:$0xff]  }
  0x2c   : > { %689 = vmatprep.subr.bf16.mxu0 %v2505_v46  ;;  %856 = vmatprep.subr.bf16.mxu1 %v2508_v47  ;;  %v2572_v46 = vld [vmem:[%s3407_s1 + $0x2c0] ss:$8 sps:$4 sm:$0xff]   ;;  %v2577_v47 = vld [vmem:[%s3407_s1 + $0x234] ss:$8 sps:$4 sm:$0xff]  }
  0x2e   : > { %428 = vmatmul.mubr.bf16.vlgmr.msra.gmra.mxu0 %v304_v51  ;;  %561 = vmatmul.mubr.bf16.vlgmr.msra.gmra.mxu1 %v2863_v31  ;;  %v2551_v31 = vld [vmem:[%s3407_s1 + $0x270] ss:$8 sps:$4 sm:$0xff]  }
  0x2f   : > { %690 = vmatpush1.bf16.msra.mxu0 %v2503_v49  ;;  %857 = vmatpush1.bf16.msra.mxu1 %v2506_v50  ;;  %v2580_v49 = vld [vmem:[%s3407_s1 + $0x2b4] ss:$8 sps:$4 sm:$0xff]   ;;  %v2575_v50 = vld [vmem:[%s3407_s1 + $0x230] ss:$8 sps:$4 sm:$0xff]  }
  0x30   : > { %691 = vmatprep.subr.bf16.mxu0 %v2511_v52  ;;  %858 = vmatprep.subr.bf16.mxu1 %v2514_v53  ;;  %v2578_v51 = vld [vmem:[%s3407_s1 + $0x2b0] ss:$8 sps:$4 sm:$0xff]   ;;  %v2583_v52 = vld [vmem:[%s3407_s1 + $0x224] ss:$8 sps:$4 sm:$0xff]  }
  0x31   : > { %437 = vmatprep.mubr.bf16.mxu0 %v2711_v2  ;;  %570 = vmatprep.mubr.bf16.mxu1 %v2711_v2  ;;  %v2586_v53 = vld [vmem:[%s3407_s1 + $0x2a4] ss:$8 sps:$4 sm:$0xff]  }
  0x33   : > { %692 = vmatpush1.bf16.msra.mxu0 %v2509_v54  ;;  %859 = vmatpush1.bf16.msra.mxu1 %v2512_v55  ;;  %v2581_v54 = vld [vmem:[%s3407_s1 + $0x220] ss:$8 sps:$4 sm:$0xff]   ;;  %v938_v55 = vshll.u32 %v3014_v26, 16 }
  0x34   : > { %693 = vmatprep.subr.bf16.mxu0 %v2517_v57  ;;  %860 = vmatprep.subr.bf16.mxu1 %v2520_v58  ;;  %v2589_v57 = vld [vmem:[%s3407_s1 + $0x214] ss:$8 sps:$4 sm:$0xff]  }
  0x35   : > { %v2592_v58 = vld [vmem:[%s3407_s1 + $0x294] ss:$8 sps:$4 sm:$0xff]   ;;  %v940_v61 = vrot.slane %v938_v55, 1  ;;  %v2646_v55 = vld [vmem:[%s3407_s1 + $0x384] ss:$8 sps:$4 sm:$0xff]  }
  0x36   : > { %571 = vmatmul.mubr.bf16.gmra.mxu1 %v2873_v34  ;;  %438 = vmatmul.mubr.bf16.gmra.mxu0 %v312_v4 }
  0x37   : > { %694 = vmatpush1.bf16.msra.mxu0 %v2515_v60  ;;  %861 = vmatpush1.bf16.msra.mxu1 %v2518_v62  ;;  %v2587_v60 = vld [vmem:[%s3407_s1 + $0x210] ss:$8 sps:$4 sm:$0xff]   ;;  %v2183_v62 = vld [vmem:[%s2838_s27 + $0x28] sm:$0x3] }
  0x38   : > { %695 = vmatprep.subr.bf16.mxu0 %v2523_v63  ;;  %862 = vmatprep.subr.bf16.mxu1 %v2526_v0  ;;  %v2590_v63 = vld [vmem:[%s3407_s1 + $0x290] ss:$8 sps:$4 sm:$0xff]   ;;  %v2595_v0 = vld [vmem:[%s3407_s1 + $0x204] ss:$8 sps:$4 sm:$0xff]   ;;  %v917_v4 = vpack.c.bf16 %v2183_v62, %v2183_v62 }
  0x39   : > { %888 = vmatprep.mubr.bf16.mxu1 %v2711_v2  ;;  %721 = vmatprep.mubr.bf16.mxu0 %v2711_v2  ;;  %v2647_v62 = vld [vmem:[%s3407_s1 + $0x470] ss:$8 sps:$4 sm:$0xff]  }
  0x3b   : > { %696 = vmatpush1.bf16.msra.mxu0 %v2521_v3  ;;  %863 = vmatpush1.bf16.msra.mxu1 %v2524_v5  ;;  %v2598_v3 = vld [vmem:[%s3407_s1 + $0x284] ss:$8 sps:$4 sm:$0xff]   ;;  %v2593_v5 = vld [vmem:[%s3407_s1 + $0x200] ss:$8 sps:$4 sm:$0xff]  }
  0x3c   : > { %697 = vmatprep.subr.bf16.mxu0 %v2529_v6  ;;  %864 = vmatprep.subr.bf16.mxu1 %v2532_v7  ;;  %v1118_v6 = vrot.slane %v3014_v26, 1  ;;  %v2596_v7 = vld [vmem:[%s3407_s1 + $0x280] ss:$8 sps:$4 sm:$0xff]  }
  0x3f   : > { %698 = vmatpush1.bf16.msra.mxu0 %v2527_v8  ;;  %865 = vmatpush1.bf16.msra.mxu1 %v2530_v9  ;;  %v941_v8 = vor.u32 %v940_v61, %v936_v59  ;;  %v945_v9 = vrot.slane %v943_v1, 1  ;;  %v2649_v61 = vld [vmem:[%s3407_s1 + $0x474] ss:$8 sps:$4 sm:$0xff]  }
  0x40   : > { %699 = vmatprep.subr.bf16.mxu0 %v2535_v10  ;;  %866 = vmatprep.subr.bf16.mxu1 %v2538_v11  ;;  %v1119_v10 = vrot.slane %v3054_v41, 1  ;;  %v2601_v11 = vld [vmem:[%s3407_s1 + $0x374] ss:$8 sps:$4 sm:$0xff]  }
  0x43   : > { %700 = vmatpush1.bf16.msra.mxu0 %v2533_v12  ;;  %867 = vmatpush1.bf16.msra.mxu1 %v2536_v13  ;;  %v2604_v12 = vld [vmem:[%s3407_s1 + $0x3f4] ss:$8 sps:$4 sm:$0xff]   ;;  %v951_v13 = vshll.u32 %v917_v4, 16 }
  0x44   : > { %701 = vmatprep.subr.bf16.mxu0 %v2541_v14  ;;  %868 = vmatprep.subr.bf16.mxu1 %v2544_v15  ;;  %v2599_v14 = vld [vmem:[%s3407_s1 + $0x370] ss:$8 sps:$4 sm:$0xff]   ;;  %v946_v15 = vsel %vm292_vm0, %v941_v8, %v945_v9  ;;  %v2658_v8 = vld [vmem:[%s3407_s1 + $0x444] ss:$8 sps:$4 sm:$0xff]  }
  0x47   : > { %702 = vmatpush1.bf16.msra.mxu0 %v2539_v16  ;;  %869 = vmatpush1.bf16.msra.mxu1 %v2542_v17  ;;  %v1120_v16 = vsel %vm601_vm1, %v1118_v6, %v1119_v10  ;;  %v2602_v17 = vld [vmem:[%s3407_s1 + $0x3f0] ss:$8 sps:$4 sm:$0xff]   ;;  %v2655_v6 = vld [vmem:[%s3407_s1 + $0x454] ss:$8 sps:$4 sm:$0xff]  }
  0x48   : > { %703 = vmatprep.subr.bf16.mxu0 %v2547_v18  ;;  %870 = vmatprep.subr.bf16.mxu1 %v2550_v19  ;;  %v947_v18 = vshrl.u32 %v3054_v41, 16  ;;  %v2607_v19 = vld [vmem:[%s3407_s1 + $0x364] ss:$8 sps:$4 sm:$0xff]  }
  0x4b   : > { %704 = vmatpush1.bf16.msra.mxu0 %v2545_v21  ;;  %871 = vmatpush1.bf16.msra.mxu1 %v2548_v22  ;;  %v2605_v21 = vld [vmem:[%s3407_s1 + $0x360] ss:$8 sps:$4 sm:$0xff]  }
  0x4c   : > { %1037 = vmatprep.subr.bf16.mxu0 %v2553_v24  ;;  %1205 = vmatprep.subr.bf16.mxu1 %v2556_v25  ;;  %v2608_v22 = vld [vmem:[%s3407_s1 + $0x3e0] ss:$8 sps:$4 sm:$0xff]   ;;  %v953_v24 = vrot.slane %v951_v13, 1  ;;  %v1121_v25 = vrot.slane %v917_v4, 1 }
  0x4d   : > { %v2650_v4 = vld [vmem:[%s3407_s1 + $0x460] ss:$8 sps:$4 sm:$0xff]  }
  0x4e   : > { %722 = vmatmul.mubr.bf16.vlgmr.msra.gmra.mxu0 %v604_v27  ;;  %889 = vmatmul.mubr.bf16.vlgmr.msra.gmra.mxu1 %v3014_v26  ;;  %v2613_v26 = vld [vmem:[%s3407_s1 + $0x354] ss:$8 sps:$4 sm:$0xff]   ;;  %v1122_v36 = vsel %vm601_vm1, %v1119_v10, %v1121_v25  ;;  %v2662_v13 = vld [vmem:[%s3407_s1 + $0x420] ss:$8 sps:$4 sm:$0xff]  }
  0x4f   : > { %1038 = vmatpush1.bf16.msra.mxu0 %v2551_v31  ;;  %1206 = vmatpush1.bf16.msra.mxu1 %v2554_v32  ;;  %v2616_v27 = vld [vmem:[%s3407_s1 + $0x3d4] ss:$8 sps:$4 sm:$0xff]   ;;  %v949_v31 = vor.u32 %v947_v18, %v945_v9  ;;  %v2611_v32 = vld [vmem:[%s3407_s1 + $0x350] ss:$8 sps:$4 sm:$0xff]   ;;  %v2656_v9 = vld [vmem:[%s3407_s1 + $0x440] ss:$8 sps:$4 sm:$0xff]  }
  0x50   : > { %1039 = vmatprep.subr.bf16.mxu0 %v2559_v28  ;;  %1207 = vmatprep.subr.bf16.mxu1 %v2562_v29  ;;  %v2614_v28 = vld [vmem:[%s3407_s1 + $0x3d0] ss:$8 sps:$4 sm:$0xff]   ;;  %v2619_v29 = vld [vmem:[%s3407_s1 + $0x344] ss:$8 sps:$4 sm:$0xff]   ;;  %v2661_v10 = vld [vmem:[%s3407_s1 + $0x434] ss:$8 sps:$4 sm:$0xff]  }
  0x51   : > { %731 = vmatprep.mubr.bf16.mxu0 %v2711_v2  ;;  %898 = vmatprep.mubr.bf16.mxu1 %v2711_v2  ;;  %v2675_v25 = vld [vmem:[%s3409_s3 + $0x68] sm:$0xff]  }
  0x53   : > { %1040 = vmatpush1.bf16.msra.mxu0 %v2557_v33  ;;  %1208 = vmatpush1.bf16.msra.mxu1 %v2560_v35  ;;  %v2622_v33 = vld [vmem:[%s3407_s1 + $0x3c4] ss:$8 sps:$4 sm:$0xff]   ;;  %v954_v35 = vsel %vm292_vm0, %v949_v31, %v953_v24  ;;  %v2672_v24 = vld [vmem:[%s3409_s3 + $0x38] sm:$0xff]  }
  0x54   : > { %1041 = vmatprep.subr.bf16.mxu0 %v2565_v38  ;;  %1209 = vmatprep.subr.bf16.mxu1 %v2568_v39  ;;  %v2617_v38 = vld [vmem:[%s3407_s1 + $0x340] ss:$8 sps:$4 sm:$0xff]  }
  0x55   : > { %v2620_v39 = vld [vmem:[%s3407_s1 + $0x3c0] ss:$8 sps:$4 sm:$0xff]  }
  0x56   : > { %732 = vmatmul.mubr.bf16.gmra.mxu0 %v606_v42  ;;  %899 = vmatmul.mubr.bf16.gmra.mxu1 %v3054_v41  ;;  %v2628_v41 = vld [vmem:[%s3407_s1 + $0x3b4] ss:$8 sps:$4 sm:$0xff]   ;;  %v2623_v42 = vld [vmem:[%s3407_s1 + $0x330] ss:$8 sps:$4 sm:$0xff]   ;;  %v2678_v31 = vld [vmem:[%s3409_s3 + $0x20] sm:$0xff]  }
  0x57   : > { %1042 = vmatpush1.bf16.msra.mxu0 %v2563_v40  ;;  %1210 = vmatpush1.bf16.msra.mxu1 %v2566_v43  ;;  %v2625_v40 = vld [vmem:[%s3407_s1 + $0x334] ss:$8 sps:$4 sm:$0xff]   ;;  %v2626_v43 = vld [vmem:[%s3407_s1 + $0x3b0] ss:$8 sps:$4 sm:$0xff]  }
  0x58   : > { %1043 = vmatprep.subr.bf16.mxu0 %v2571_v44  ;;  %1211 = vmatprep.subr.bf16.mxu1 %v2574_v30  ;;  %v2631_v44 = vld [vmem:[%s3407_s1 + $0x324] ss:$8 sps:$4 sm:$0xff]  }
  0x59   : > { %1069 = vmatprep.mubr.bf16.mxu0 %v2711_v2  ;;  %1237 = vmatprep.mubr.bf16.mxu1 %v2711_v2  ;;  %v2634_v30 = vld [vmem:[%s3407_s1 + $0x3a4] ss:$8 sps:$4 sm:$0xff]  }
  0x5b   : > { %1044 = vmatpush1.bf16.msra.mxu0 %v2569_v45  ;;  %1212 = vmatpush1.bf16.msra.mxu1 %v2572_v46  ;;  %v2283_v45 = vld [vmem:[%s2838_s27 + $0x28] sm:$0xff] }
  0x5c   : > { %1045 = vmatprep.subr.bf16.mxu0 %v2577_v47  ;;  %1213 = vmatprep.subr.bf16.mxu1 %v2580_v49  ;;  %v2629_v46 = vld [vmem:[%s3407_s1 + $0x320] ss:$8 sps:$4 sm:$0xff]   ;;  %v3213_v49 = vpack.c.bf16 %v2283_v45, %v3039_v37  ;;  %v2638_v37 = vld [vmem:[%s3407_s1 + $0x390] ss:$8 sps:$4 sm:$0xff]  }
  0x5d   : > { %v2632_v47 = vld [vmem:[%s3407_s1 + $0x3a0] ss:$8 sps:$4 sm:$0xff]  }
  0x5e   : > { %v1635_v18 = vrot.slane %v3213_v49, 1 }
  0x5f   : > { %1046 = vmatpush1.bf16.msra.mxu0 %v2575_v50  ;;  %1214 = vmatpush1.bf16.msra.mxu1 %v2578_v51  ;;  %v2637_v50 = vld [vmem:[%s3407_s1 + $0x314] ss:$8 sps:$4 sm:$0xff]  }
  0x60   : > { %1047 = vmatprep.subr.bf16.mxu0 %v2583_v52  ;;  %1215 = vmatprep.subr.bf16.mxu1 %v2586_v53  ;;  %v2640_v51 = vld [vmem:[%s3407_s1 + $0x394] ss:$8 sps:$4 sm:$0xff]   ;;  %v2635_v52 = vld [vmem:[%s3407_s1 + $0x310] ss:$8 sps:$4 sm:$0xff]   ;;  %v1459_v53 = vshll.u32 %v3213_v49, 16 }
  0x62   : > { %v1461_v59 = vrot.slane %v1459_v53, 1 }
  0x63   : > { %1048 = vmatpush1.bf16.msra.mxu0 %v2581_v54  ;;  %1216 = vmatpush1.bf16.msra.mxu1 %v2584_v56  ;;  %v2643_v54 = vld [vmem:[%s3407_s1 + $0x304] ss:$8 sps:$4 sm:$0xff]   ;;  %v2284_v56 = vld [vmem:[%s2838_s27 + $0x30] sm:$0x3] }
  0x64   : > { %1049 = vmatprep.subr.bf16.mxu0 %v2589_v57  ;;  %1217 = vmatprep.subr.bf16.mxu1 %v2592_v58  ;;  %v2641_v57 = vld [vmem:[%s3407_s1 + $0x300] ss:$8 sps:$4 sm:$0xff]  }
  0x65   : > { %v2644_v58 = vld [vmem:[%s3407_s1 + $0x380] ss:$8 sps:$4 sm:$0xff]  }
  0x67   : > { %1050 = vmatpush1.bf16.msra.mxu0 %v2587_v60  ;;  %1218 = vmatpush1.bf16.msra.mxu1 %v2590_v63  ;;  %v1433_v60 = vpack.c.bf16 %v2284_v56, %v2284_v56  ;;  %v1462_v63 = vsel %vm292_vm0, %v2897_v48, %v1461_v59 }
  0x68   : > { %1051 = vmatprep.subr.bf16.mxu0 %v2595_v0  ;;  %1219 = vmatprep.subr.bf16.mxu1 %v2598_v3  ;;  %v1463_v0 = vshrl.u32 %v3213_v49, 16  ;;  %v2652_v3 = vld [vmem:[%s3407_s1 + $0x464] ss:$8 sps:$4 sm:$0xff]  }
  0x69   : > { %v1467_v1 = vshll.u32 %v1433_v60, 16 }
  0x6b   : > { %1052 = vmatpush1.bf16.msra.mxu0 %v2593_v5  ;;  %1220 = vmatpush1.bf16.msra.mxu1 %v2596_v7  ;;  %v1465_v5 = vor.u32 %v1463_v0, %v1461_v59  ;;  %v1469_v48 = vrot.slane %v1467_v1, 1 }
  0x6c   : > { %1372 = vmatprep.subr.bf16.mxu0 %v2601_v11  ;;  %1553 = vmatprep.subr.bf16.mxu1 %v2604_v12  ;;  %v2659_v11 = vld [vmem:[%s3407_s1 + $0x430] ss:$8 sps:$4 sm:$0xff]   ;;  %v2664_v12 = vld [vmem:[%s3407_s1 + $0x424] ss:$8 sps:$4 sm:$0xff]  }
  0x6d   : > { %v1470_v7 = vsel %vm292_vm0, %v1465_v5, %v1469_v48 }
  0x6e   : > { %1070 = vmatmul.mubr.bf16.vlgmr.msra.gmra.mxu0 %v946_v15  ;;  %1238 = vmatmul.mubr.bf16.vlgmr.msra.gmra.mxu1 %v1120_v16  ;;  %v2665_v15 = vld [vmem:[%s3407_s1 + $0x410] ss:$8 sps:$4 sm:$0xff]   ;;  %v2670_v16 = vld [vmem:[%s3407_s1 + $0x404] ss:$8 sps:$4 sm:$0xff]  }
  0x6f   : > { %1373 = vmatpush1.bf16.msra.mxu0 %v2599_v14  ;;  %1554 = vmatpush1.bf16.msra.mxu1 %v2602_v17  ;;  %v2667_v14 = vld [vmem:[%s3407_s1 + $0x414] ss:$8 sps:$4 sm:$0xff]   ;;  %v2668_v17 = vld [vmem:[%s3407_s1 + $0x400] ss:$8 sps:$4 sm:$0xff]  }
  0x70   : > { %1374 = vmatprep.subr.bf16.mxu0 %v2607_v19  ;;  %1555 = vmatprep.subr.bf16.mxu1 %v2610_v20  ;;  %v1636_v19 = vsel %vm601_vm1, %v3004_v23, %v1635_v18  ;;  %v1637_v20 = vrot.slane %v1433_v60, 1  ;;  %v2673_v23 = vld [vmem:[%s3409_s3 + $0x70] sm:$0xff]  }
  0x71   : > { %1079 = vmatprep.mubr.bf16.mxu0 %v2711_v2  ;;  %1247 = vmatprep.mubr.bf16.mxu1 %v2711_v2 }
  0x73   : > { %1375 = vmatpush1.bf16.msra.mxu0 %v2605_v21  ;;  %1556 = vmatpush1.bf16.msra.mxu1 %v2608_v22  ;;  %v1638_v21 = vsel %vm601_vm1, %v1635_v18, %v1637_v20  ;;  %v2671_v22 = vld [vmem:[%s3409_s3 + $0x78] sm:$0xff]  }
  0x74   : > { %1376 = vmatprep.subr.bf16.mxu0 %v2613_v26  ;;  %1557 = vmatprep.subr.bf16.mxu1 %v2616_v27  ;;  %v2676_v26 = vld [vmem:[%s3409_s3 + $0x28] sm:$0xff]   ;;  %v2677_v27 = vld [vmem:[%s3409_s3 + $0x60] sm:$0xff]  }
  0x76   : > { %1080 = vmatmul.mubr.bf16.gmra.mxu0 %v954_v35  ;;  %1248 = vmatmul.mubr.bf16.gmra.mxu1 %v1122_v36  ;;  %v2683_v35 = vld [vmem:[%s3409_s3 + $0x48] sm:$0xff]  }
  0x77   : > { %1377 = vmatpush1.bf16.msra.mxu0 %v2611_v32  ;;  %1558 = vmatpush1.bf16.msra.mxu1 %v2614_v28  ;;  %v2679_v32 = vld [vmem:[%s3409_s3 + $0x58] sm:$0xff]   ;;  %v2684_v36 = vld [vmem:[%s3409_s3 + $0x8] sm:$0xff]  }
  0x78   : > { %1378 = vmatprep.subr.bf16.mxu0 %v2619_v29  ;;  %1559 = vmatprep.subr.bf16.mxu1 %v2622_v33  ;;  %v2680_v28 = vld [vmem:[%s3409_s3 + $0x18] sm:$0xff]   ;;  %v2681_v29 = vld [vmem:[%s3409_s3 + $0x50] sm:$0xff]  }
  0x79   : > { %1404 = vmatprep.mubr.bf16.mxu0 %v2711_v2  ;;  %1585 = vmatprep.mubr.bf16.mxu1 %v2711_v2  ;;  %v2682_v33 = vld [vmem:[%s3409_s3 + $0x10] sm:$0xff]  }
  0x7b   : > { %1379 = vmatpush1.bf16.msra.mxu0 %v2617_v38  ;;  %1560 = vmatpush1.bf16.msra.mxu1 %v2620_v39  ;;  %v2685_v39 = vld [vmem:[%s3409_s3 + $0x40] sm:$0xff]  }
  0x7c   : > { %1380 = vmatprep.subr.bf16.mxu0 %v2625_v40  ;;  %1561 = vmatprep.subr.bf16.mxu1 %v2628_v41  ;;  %v2686_v40 = vld [vmem:[%s3409_s3] sm:$0xff]  }
  0x7f   : > { %1381 = vmatpush1.bf16.msra.mxu0 %v2623_v42  ;;  %1562 = vmatpush1.bf16.msra.mxu1 %v2626_v43 }
  0x80   : > { %1382 = vmatprep.subr.bf16.mxu0 %v2631_v44  ;;  %1563 = vmatprep.subr.bf16.mxu1 %v2634_v30 }
  0x83   : > { %1383 = vmatpush1.bf16.msra.mxu0 %v2629_v46  ;;  %1564 = vmatpush1.bf16.msra.mxu1 %v2632_v47 }
  0x84   : > { %1384 = vmatprep.subr.bf16.mxu0 %v2637_v50  ;;  %1565 = vmatprep.subr.bf16.mxu1 %v2640_v51 }
  0x87   : > { %1385 = vmatpush1.bf16.msra.mxu0 %v2635_v52  ;;  %1566 = vmatpush1.bf16.msra.mxu1 %v2638_v37 }
  0x88   : > { %1386 = vmatprep.subr.bf16.mxu0 %v2643_v54  ;;  %1567 = vmatprep.subr.bf16.mxu1 %v2646_v55 }
  0x8b   : > { %1387 = vmatpush1.bf16.msra.mxu0 %v2641_v57  ;;  %1568 = vmatpush1.bf16.msra.mxu1 %v2644_v58 }
  0x8c   : > { %1721 = vmatprep.subr.bf16.mxu0 %v2649_v61  ;;  %2401 = vmatprep.subr.bf16.mxu1 %v2671_v22 }
  0x8e   : > { %1405 = vmatmul.mubr.bf16.vlgmr.msra.gmra.mxu0 %v2873_v34  ;;  %1586 = vmatmul.mubr.bf16.vlgmr.msra.gmra.mxu1 %v1462_v63  ;;  %v2653_v34 = vld [vmem:[%s3407_s1 + $0x450] ss:$8 sps:$4 sm:$0xff]  }
  0x8f   : > { %1722 = vmatpush1.bf16.msra.mxu0 %v2647_v62  ;;  %1414 = vmatprep.mubr.bf16.mxu0 %v2711_v2 }
  0x90   : > { %1723 = vmatprep.subr.bf16.mxu0 %v2652_v3  ;;  %1595 = vmatprep.mubr.bf16.mxu1 %v2711_v2 }
  0x91   : > { %2402 = vmatpush3.bf16.msra.mxu1 %v2672_v24 }
  0x92   : > { %2403 = vmatprep.subr.bf16.mxu1 %v2673_v23 }
  0x93   : > { %1724 = vmatpush1.bf16.msra.mxu0 %v2650_v4 }
  0x94   : > { %1725 = vmatprep.subr.bf16.mxu0 %v2655_v6 }
  0x96   : > { %1415 = vmatmul.mubr.bf16.gmra.mxu0 %v3213_v49  ;;  %1596 = vmatmul.mubr.bf16.gmra.mxu1 %v1470_v7 }
  0x97   : > { %1726 = vmatpush1.bf16.msra.mxu0 %v2653_v34  ;;  %1753 = vmatprep.mubr.bf16.mxu0 %v2711_v2 }
  0x98   : > { %1727 = vmatprep.subr.bf16.mxu0 %v2658_v8 }
  0x9b   : > { %1728 = vmatpush1.bf16.msra.mxu0 %v2656_v9 }
  0x9c   : > { %1729 = vmatprep.subr.bf16.mxu0 %v2661_v10 }
  0x9f   : > { %1730 = vmatpush1.bf16.msra.mxu0 %v2659_v11 }
  0xa0   : > { %1731 = vmatprep.subr.bf16.mxu0 %v2664_v12 }
  0xa3   : > { %1732 = vmatpush1.bf16.msra.mxu0 %v2662_v13 }
  0xa4   : > { %1733 = vmatprep.subr.bf16.mxu0 %v2667_v14 }
  0xa7   : > { %1734 = vmatpush1.bf16.msra.mxu0 %v2665_v15 }
  0xa8   : > { %1735 = vmatprep.subr.bf16.mxu0 %v2670_v16 }
  0xab   : > { %1736 = vmatpush1.bf16.msra.mxu0 %v2668_v17 }
  0xae   : > { %1754 = vmatmul.mubr.bf16.vlgmr.msra.gmra.mxu0 %v1636_v19 }
  0xaf   : > { %1763 = vmatprep.mubr.bf16.mxu0 %v2711_v2  ;;  %v2674_v2 = vld [vmem:[%s3409_s3 + $0x30] sm:$0xff]  }
  0xb0   : > { %2404 = vmatpush3.bf16.msra.mxu1 %v2674_v2 }
  0xb1   : > { %2405 = vmatprep.subr.bf16.mxu1 %v2675_v25 }
  0xb4   : > { %2406 = vmatpush3.bf16.msra.mxu1 %v2676_v26 }
  0xb5   : > { %2407 = vmatprep.subr.bf16.mxu1 %v2677_v27 }
  0xb6   : > { %1764 = vmatmul.mubr.bf16.gmra.mxu0 %v1638_v21 }
  0xb8   : > { %2408 = vmatpush3.bf16.msra.mxu1 %v2678_v31 }
  0xb9   : > { %2409 = vmatprep.subr.bf16.mxu1 %v2679_v32 }
  0xbc   : > { %2410 = vmatpush3.bf16.msra.mxu1 %v2680_v28 }
  0xbd   : > { %2411 = vmatprep.subr.bf16.mxu1 %v2681_v29 }
  0xc0   : > { %2412 = vmatpush3.bf16.msra.mxu1 %v2682_v33 }
  0xc1   : > { %2413 = vmatprep.subr.bf16.mxu1 %v2683_v35 }
  0xc4   : > { %2414 = vmatpush3.bf16.msra.mxu1 %v2684_v36 }
  0xc5   : > { %2415 = vmatprep.subr.bf16.mxu1 %v2685_v39 }
  0xc8   : > { %2416 = vmatpush3.bf16.msra.mxu1 %v2686_v40 }
  0xee   : > { %v429_v38 = vpop.f32.mrf.mxu0  ;;  %v562_v43 = vpop.f32.mrf.mxu1 }
  0xef   : > { %v563_v27 = vadd.f32 %v562_v43, %v429_v38  ;;  %v1784_v38 = vlaneseq }
  0xf0   : > { %v431_v41 = vpop.f32.mrf.mxu0  ;;  %v564_v45 = vpop.f32.mrf.mxu1 }
  0xf1   : > { %v565_v26 = vadd.f32 %v564_v45, %v431_v41 }
  0xf2   : > { %v433_v42 = vpop.f32.mrf.mxu0  ;;  %v566_v47 = vpop.f32.mrf.mxu1 }
  0xf3   : > { %v567_v31 = vadd.f32 %v566_v47, %v433_v42 }
  0xf4   : > { %v435_v44 = vpop.f32.mrf.mxu0  ;;  %v568_v50 = vpop.f32.mrf.mxu1 }
  0xf5   : > { %v569_v35 = vadd.f32 %v568_v50, %v435_v44 }
  0xf6   : > { %v3351_v30 = vpop.f32.mrf.mxu0  ;;  %v572_v51 = vpop.f32.mrf.mxu1 }
  0xf8   : > { %v441_v46 = vpop.f32.mrf.mxu0  ;;  %v574_v53 = vpop.f32.mrf.mxu1 }
  0xfa   : > { %v3353_v49 = vpop.f32.mrf.mxu0  ;;  %v576_v55 = vpop.f32.mrf.mxu1 }
  0xfb   : > { %v577_v42 = vadd.f32 %v576_v55, %v3353_v49 }
  0xfc   : > { %v3355_v52 = vpop.f32.mrf.mxu0  ;;  %v578_v57 = vpop.f32.mrf.mxu1 }
  0xfd   : > { %v579_v44 = vadd.f32 %v578_v57, %v3355_v52 }
 0x10e   : > { %v723_v37 = vpop.f32.mrf.mxu0  ;;  %v890_v58 = vpop.f32.mrf.mxu1 }
 0x10f   : > { %v742_v28 = vadd.f32 %v723_v37, %v563_v27 }
 0x110   : > { %v725_v54 = vpop.f32.mrf.mxu0  ;;  %v892_v60 = vpop.f32.mrf.mxu1 }
 0x111   : > { %v743_v32 = vadd.f32 %v725_v54, %v565_v26 }
 0x112   : > { %v727_v56 = vpop.f32.mrf.mxu0  ;;  %v894_v62 = vpop.f32.mrf.mxu1 }
 0x113   : > { %v744_v36 = vadd.f32 %v727_v56, %v567_v31  ;;  %v910_v39 = vadd.f32 %v892_v60, %v743_v32  ;;  %v1785_v60 = vshrl.u32 %v1784_v38, 7 }
 0x114   : > { %v729_v59 = vpop.f32.mrf.mxu0  ;;  %v896_v0 = vpop.f32.mrf.mxu1 }
 0x115   : > { %v745_v40 = vadd.f32 %v729_v59, %v569_v35 }
 0x116   : > { %v733_v61 = vpop.f32.mrf.mxu0  ;;  %v3357_v3 = vpop.f32.mrf.mxu1 }
 0x117   : > { %v912_v43 = vadd.f32 %v896_v0, %v745_v40  ;;  %v1790_v0 = vsub.s32 1, %v1785_v60 }
 0x118   : > { %v735_v63 = vpop.f32.mrf.mxu0  ;;  %v902_v48 = vpop.f32.mrf.mxu1 }
 0x11a   : > { %v737_v1 = vpop.f32.mrf.mxu0  ;;  %v3359_v34 = vpop.f32.mrf.mxu1 }
 0x11b   : > { %3412 = vst [vmem:[#allocation2_spill] sm:$0xff] %v3359_v34  ;;  %v573_v34 = vadd.f32 %v572_v51, %v3351_v30  ;;  %v748_v56 = vadd.f32 %v737_v1, %v577_v42 }
 0x11c   : > { %v739_v4 = vpop.f32.mrf.mxu0  ;;  %v3361_v8 = vpop.f32.mrf.mxu1 }
 0x11d   : > { %3413 = vst [vmem:[#allocation3_spill] sm:$0xff] %v3361_v8  ;;  %v911_v8 = vadd.f32 %v894_v62, %v744_v36  ;;  %v746_v50 = vadd.f32 %v733_v61, %v573_v34 }
 0x124   : > { %v3420_v1 = vld [vmem:[#allocation3_spill] sm:$0xff] }
 0x12e   : > { %v1071_v5 = vpop.f32.mrf.mxu0  ;;  %v1239_v9 = vpop.f32.mrf.mxu1 }
 0x130   : > { %v1073_v6 = vpop.f32.mrf.mxu0  ;;  %v1241_v11 = vpop.f32.mrf.mxu1 }
 0x132   : > { %v1075_v7 = vpop.f32.mrf.mxu0  ;;  %v1243_v13 = vpop.f32.mrf.mxu1 }
 0x133   : > { %v1092_v47 = vadd.f32 %v1075_v7, %v911_v8 }
 0x134   : > { %v1077_v10 = vpop.f32.mrf.mxu0  ;;  %v1245_v15 = vpop.f32.mrf.mxu1 }
 0x135   : > { %v1093_v59 = vadd.f32 %v1077_v10, %v912_v43  ;;  %v1260_v30 = vadd.f32 %v1243_v13, %v1092_v47 }
 0x136   : > { %v1081_v12 = vpop.f32.mrf.mxu0  ;;  %v3363_v17 = vpop.f32.mrf.mxu1 }
 0x137   : > { %3414 = vst [vmem:[#allocation4_spill] sm:$0xff] %v3363_v17  ;;  %v909_v17 = vadd.f32 %v890_v58, %v742_v28  ;;  %v1261_v57 = vadd.f32 %v1245_v15, %v1093_v59 }
 0x138   : > { %v1083_v14 = vpop.f32.mrf.mxu0  ;;  %v3367_v20 = vpop.f32.mrf.mxu1 }
 0x139   : > { %3416 = vst [vmem:[#allocation6_spill] sm:$0xff] %v3367_v20  ;;  %v1090_v41 = vadd.f32 %v1071_v5, %v909_v17  ;;  %v913_v5 = vadd.f32 %v3357_v3, %v746_v50  ;;  %v1782_v3 = vld [vmem:[%s3408_s2] sm:$0x3] }
 0x13a   : > { %v1085_v16 = vpop.f32.mrf.mxu0  ;;  %v3369_v22 = vpop.f32.mrf.mxu1  ;;  %v1791_v26 = vrot.slane %v1782_v3, %v1790_v0 }
 0x13b   : > { %3417 = vst [vmem:[#allocation7_spill] sm:$0xff] %v3369_v22  ;;  %v1094_v8 = vadd.f32 %v1081_v12, %v913_v5 }
 0x13c   : > { %v3365_v18 = vpop.f32.mrf.mxu0  ;;  %v3371_v23 = vpop.f32.mrf.mxu1 }
 0x13d   : > { %3415 = vst [vmem:[#allocation5_spill] sm:$0xff] %v3365_v18  ;;  %3418 = vst [vmem:[#allocation8_spill] sm:$0xff] %v3371_v23  ;;  %v575_v18 = vadd.f32 %v574_v53, %v441_v46  ;;  %v1091_v23 = vadd.f32 %v1073_v6, %v910_v39  ;;  %v749_v46 = vadd.f32 %v739_v4, %v579_v44  ;;  %v3419_v6 = vld [vmem:[#allocation2_spill] sm:$0xff] }
 0x13e   : > { %v1258_v53 = vadd.f32 %v1239_v9, %v1090_v41  ;;  %v915_v52 = vadd.f32 %v3419_v6, %v748_v56  ;;  %v1786_v9 = vsub.s32 0, %v1785_v60  ;;  %v3423_v12 = vld [vmem:[#allocation4_spill] sm:$0xff] }
 0x13f   : > { %v747_v45 = vadd.f32 %v735_v63, %v575_v18  ;;  %v1259_v58 = vadd.f32 %v1241_v11, %v1091_v23  ;;  %v916_v7 = vadd.f32 %v3420_v1, %v749_v46  ;;  %v1262_v27 = vadd.f32 %v3423_v12, %v1094_v8 }
 0x140   : > { %v1096_v10 = vadd.f32 %v1085_v16, %v915_v52  ;;  %v3422_v15 = vld [vmem:[#allocation6_spill] sm:$0xff]  ;;  %v1787_v16 = vrot.slane %v1782_v3, %v1786_v9 }
 0x141   : > { %v914_v62 = vadd.f32 %v902_v48, %v747_v45 }
 0x143   : > { %v1095_v61 = vadd.f32 %v1083_v14, %v914_v62 }
 0x144   : > { %v3421_v13 = vld [vmem:[#allocation5_spill] sm:$0xff]  ;;  %v3425_v39 = vld [vmem:[#allocation8_spill] sm:$0xff] }
 0x145   : > { %v1097_v17 = vadd.f32 %v3421_v13, %v916_v7  ;;  %v1263_v14 = vadd.f32 %v3422_v15, %v1095_v61 }
 0x147   : > { %v1265_v40 = vadd.f32 %v3425_v39, %v1097_v17 }
 0x14e   : > { %v1406_v19 = vpop.f32.mrf.mxu0  ;;  %v1587_v2 = vpop.f32.mrf.mxu1 }
 0x14f   : > { %v1425_v49 = vadd.f32 %v1406_v19, %v1258_v53 }
 0x150   : > { %v1408_v21 = vpop.f32.mrf.mxu0  ;;  %v1589_v29 = vpop.f32.mrf.mxu1 }
 0x151   : > { %v1426_v51 = vadd.f32 %v1408_v21, %v1259_v58  ;;  %v1606_v18 = vadd.f32 %v1587_v2, %v1425_v49 }
 0x152   : > { %v1410_v24 = vpop.f32.mrf.mxu0  ;;  %v1591_v20 = vpop.f32.mrf.mxu1 }
 0x153   : > { %v1427_v34 = vadd.f32 %v1410_v24, %v1260_v30  ;;  %v1607_v48 = vadd.f32 %v1589_v29, %v1426_v51 }
 0x154   : > { %v1412_v25 = vpop.f32.mrf.mxu0  ;;  %v1593_v37 = vpop.f32.mrf.mxu1 }
 0x155   : > { %v1428_v11 = vadd.f32 %v1412_v25, %v1261_v57  ;;  %v1608_v24 = vadd.f32 %v1591_v20, %v1427_v34  ;;  %v3424_v25 = vld [vmem:[#allocation7_spill] sm:$0xff] }
 0x156   : > { %v3373_v33 = vpop.f32.mrf.mxu0  ;;  %v1597_v55 = vpop.f32.mrf.mxu1  ;;  %v1264_v28 = vadd.f32 %v3424_v25, %v1096_v10 }
 0x157   : > { %v1609_v29 = vadd.f32 %v1593_v37, %v1428_v11  ;;  %v1429_v2 = vadd.f32 %v3373_v33, %v1262_v27  ;;  %v2381_v11 = vld [vmem:[%s3410_s4] ss:$0 sm:$0xff] }
 0x158   : > { %v1418_v22 = vpop.f32.mrf.mxu0  ;;  %v1599_v19 = vpop.f32.mrf.mxu1 }
 0x159   : > { %v1430_v35 = vadd.f32 %v1418_v22, %v1263_v14  ;;  %v1610_v59 = vadd.f32 %v1597_v55, %v1429_v2 }
 0x15a   : > { %v1420_v54 = vpop.f32.mrf.mxu0  ;;  %v1601_v41 = vpop.f32.mrf.mxu1 }
 0x15b   : > { %v1431_v42 = vadd.f32 %v1420_v54, %v1264_v28  ;;  %v1611_v50 = vadd.f32 %v1599_v19, %v1430_v35 }
 0x15c   : > { %v1422_v63 = vpop.f32.mrf.mxu0  ;;  %v1603_v46 = vpop.f32.mrf.mxu1 }
 0x15d   : > { %v1432_v56 = vadd.f32 %v1422_v63, %v1265_v40  ;;  %v1612_v53 = vadd.f32 %v1601_v41, %v1431_v42 }
 0x15f   : > { %v1613_v54 = vadd.f32 %v1603_v46, %v1432_v56 }
 0x16e   : > { %v1755_v4 = vpop.f32.mrf.mxu0 }
 0x16f   : > { %v1774_v31 = vadd.f32 %v1755_v4, %v1606_v18 }
 0x170   : > { %v1757_v21 = vpop.f32.mrf.mxu0 }
 0x171   : > { %v1775_v23 = vadd.f32 %v1757_v21, %v1607_v48  ;;  %v1794_v47 = vadd.f32 %v1787_v16, %v1774_v31 }
 0x172   : > { %v1759_v32 = vpop.f32.mrf.mxu0 }
 0x173   : > { %v1776_v36 = vadd.f32 %v1759_v32, %v1608_v24  ;;  %v1795_v20 = vadd.f32 %v1791_v26, %v1775_v23  ;;  %v1802_v33 = vmax.f32 %v1794_v47, 0.0 }
 0x174   : > { %v1761_v38 = vpop.f32.mrf.mxu0 }
 0x175   : > { %v1796_v43 = vadd.f32 %v1787_v16, %v1776_v36  ;;  %v1777_v45 = vadd.f32 %v1761_v38, %v1609_v29  ;;  %v1803_v60 = vmax.f32 %v1795_v20, 0.0 }
 0x176   : > { %v1765_v44 = vpop.f32.mrf.mxu0 }
 0x177   : > { %v1797_v58 = vadd.f32 %v1791_v26, %v1777_v45  ;;  %v1804_v37 = vmax.f32 %v1796_v43, 0.0  ;;  %v1778_v51 = vadd.f32 %v1765_v44, %v1610_v59 }
 0x178   : > { %v1767_v22 = vpop.f32.mrf.mxu0 }
 0x179   : > { %v1805_v62 = vmax.f32 %v1797_v58, 0.0  ;;  %v1779_v30 = vadd.f32 %v1767_v22, %v1611_v50  ;;  %v1810_v6 = vpack.c.bf16 %v1804_v37, %v1802_v33  ;;  %v1798_v55 = vadd.f32 %v1787_v16, %v1778_v51 }
 0x17a   : > { %v1769_v5 = vpop.f32.mrf.mxu0 }
 0x17b   : > { %v1780_v49 = vadd.f32 %v1769_v5, %v1612_v53  ;;  %v1811_v0 = vpack.c.bf16 %v1805_v62, %v1803_v60  ;;  %v1799_v57 = vadd.f32 %v1791_v26, %v1779_v30  ;;  %v1806_v4 = vmax.f32 %v1798_v55, 0.0 }
 0x17c   : > { %v1771_v52 = vpop.f32.mrf.mxu0 }
 0x17d   : > { %v1800_v63 = vadd.f32 %v1787_v16, %v1780_v49  ;;  %v1781_v61 = vadd.f32 %v1771_v52, %v1613_v54  ;;  %1981 = vmatprep.mubr.bf16.mxu1 %v1811_v0  ;;  %v1807_v7 = vmax.f32 %v1799_v57, 0.0 }
 0x17e   : > { %1982 = vmatmul.mubr.bf16.vlgmr.msra.gmra.mxu1 %v1810_v6 }
 0x17f   : > { %v1801_v34 = vadd.f32 %v1791_v26, %v1781_v61  ;;  %v1808_v1 = vmax.f32 %v1800_v63, 0.0 }
 0x181   : > { %v1809_v8 = vmax.f32 %v1801_v34, 0.0  ;;  %v1812_v10 = vpack.c.bf16 %v1808_v1, %v1806_v4 }
 0x183   : > { %v1813_v9 = vpack.c.bf16 %v1809_v8, %v1807_v7 }
 0x185   : > { %1989 = vmatprep.mubr.bf16.mxu1 %v1813_v9 }
 0x186   : > { %1990 = vmatmul.mubr.bf16.gmra.mxu1 %v1812_v10 }
 0x23e   : > { %v2417_v48 = vpop.f32.mrf.mxu1 }
 0x240   : > { %v2418_v3 = vpop.f32.mrf.mxu1 }
 0x241   : > { %v2419_v13 = vadd.f32 %v2418_v3, %v2417_v48 }
 0x242   : > { %v2420_v17 = vpop.f32.mrf.mxu1 }
 0x243   : > { %v1984_v18 = vadd.f32 %v2419_v13, %v2381_v11 }
 0x244   : > { %v2421_v19 = vpop.f32.mrf.mxu1 }
 0x245   : > { %1998 = vst [vmem:[%s246_s26] sm:$0xff] %v1984_v18  ;;  %v2422_v21 = vadd.f32 %v2421_v19, %v2420_v17 }
 0x246   : > { %v2423_v15 = vpop.f32.mrf.mxu1 }
 0x247   : > { %v1987_v14 = vadd.f32 %v2422_v21, %v2381_v11 }
 0x248   : > { %v2424_v24 = vpop.f32.mrf.mxu1 }
 0x249   : > { %1999 = vst [vmem:[%s246_s26 + $0x8] sm:$0xff] %v1987_v14  ;;  %v2425_v23 = vadd.f32 %v2424_v24, %v2423_v15 }
 0x24a   : > { %v2426_v26 = vpop.f32.mrf.mxu1 }
 0x24b   : > { %v1992_v12 = vadd.f32 %v2425_v23, %v2381_v11 }
 0x24c   : > { %v2427_v27 = vpop.f32.mrf.mxu1 }
 0x24d   : > { %2000 = vst [vmem:[%s246_s26 + $0x10] sm:$0xff] %v1992_v12  ;;  %v2428_v31 = vadd.f32 %v2427_v27, %v2426_v26 }
 0x24f   : > { %v1995_v16 = vadd.f32 %v2428_v31, %v2381_v11 }
 0x251   : > { %2001 = vst [vmem:[%s246_s26 + $0x18] sm:$0xff] %v1995_v16 }
 0x252 PF: > { %s15_s20 = sadd.s32 1, %s2709_s20   ;;  %s3426_s18 = smov %s2705_s19 }
 0x253   : > { %p12_p5 = scmp.ge.s32.totalorder %s15_s20, 4   ;;  %s3427_s19 = smov %s3429_s21 }
 0x255   :  { %14 = sbr.rel (!%p12_p5) target bundleno = 2 (0x2), region = 81 }

</bundles_post_ra>
